<compile_context>
chip_gen: v7x
topology: tpu7x:2x2x1
jax: 0.10.0
libtpu: 0.0.40
codegen_flags: <defaults>
</compile_context>

<pallas_src>
import functools
import math

import jax
import jax.numpy as jnp
from jax.experimental import pallas as pl
from jax.experimental.pallas import tpu as pltpu

RES_GROUPS = 8     # GroupNorm groups inside the residual blocks
ATTN_GROUPS = 32   # matches nn.GroupNorm(32, in_channels) in Attention
EPS = 1e-5


def _cparams(*sems):
    return pltpu.CompilerParams(dimension_semantics=sems)


# ----------------------------------------------------------------------------
# In-kernel helpers
# ----------------------------------------------------------------------------

def _group_norm(x, gmat, gamma, beta, inv_n, eps):
    """Vectorized two-pass GroupNorm on an (C, L) tile.

    gmat is the (C, C) same-group membership matrix; group stats are computed with
    two small f32 matmuls + lane reductions (no per-group slicing loop)."""
    mu = jnp.sum(jnp.dot(gmat, x, preferred_element_type=jnp.float32),
                 axis=1, keepdims=True) * inv_n                       # (C, 1)
    d = x - mu
    var = jnp.sum(jnp.dot(gmat, d * d, preferred_element_type=jnp.float32),
                  axis=1, keepdims=True) * inv_n                      # (C, 1)
    return d * jax.lax.rsqrt(var + eps) * gamma + beta


# ----------------------------------------------------------------------------
# Kernel 1: fused GroupNorm + SiLU + 3x3 conv + bias + extra addend
# ----------------------------------------------------------------------------

def _gn_silu_conv_kernel(x_ref, gmat_ref, gamma_ref, beta_ref, w_ref, b_ref,
                         mask_ref, add_ref, o_ref, *, groups, eps, img_w):
    x = x_ref[0].astype(jnp.float32)                     # (Cin, L)
    cin, L = x.shape
    cout = o_ref.shape[1]
    inv_n = 1.0 / float((cin // groups) * L)

    h = _group_norm(x, gmat_ref[...], gamma_ref[...], beta_ref[...], inv_n, eps)
    h = h * jax.nn.sigmoid(h)                            # SiLU (f32 elementwise)
    hb = h.astype(jnp.bfloat16)

    # 3x3 conv = 9 shifted dot accumulations.  The per-tap shift+zero-padding is a
    # static (L, L) 0/1 matrix built from iota (exact semantics, stays in VMEM).
    rowi = jax.lax.broadcasted_iota(jnp.int32, (L, L), 0)   # input flat position j
    coli = jax.lax.broadcasted_iota(jnp.int32, (L, L), 1)   # output flat position l
    diff = rowi - coli
    masks = mask_ref[...]                                   # (3, L): column mask per dx

    acc = jnp.zeros((cout, L), jnp.float32)
    for t in range(9):
        dy = t // 3 - 1
        dx = t % 3 - 1
        shift = dy * img_w + dx
        sel = jnp.where(diff == shift, masks[dx + 1:dx + 2, :], 0.0)   # (L, L)
        shifted = jnp.dot(hb, sel.astype(jnp.bfloat16),
                          preferred_element_type=jnp.float32)          # (Cin, L)
        acc = acc + jnp.dot(w_ref[t].astype(jnp.bfloat16),
                            shifted.astype(jnp.bfloat16),
                            preferred_element_type=jnp.float32)        # (Cout, L)

    out = acc + b_ref[...] + add_ref[0].astype(jnp.float32)
    o_ref[0] = out.astype(o_ref.dtype)


def gn_silu_conv3x3(x3, gmat, gamma, beta, w_taps, bias, xmask, add, *,
                    W, groups, eps=EPS, out_dtype=jnp.float32):
    """Fused GN+SiLU+conv3x3(+bias+add) on (B, C, L) activations (NCHW flattened)."""
    B, C, L = x3.shape
    Cout = w_taps.shape[1]
    add_last = add.shape[-1]        # 1 (channel addend) or L (residual)
    kernel = functools.partial(_gn_silu_conv_kernel, groups=groups, eps=eps, img_w=W)
    return pl.pallas_call(
        kernel,
        out_shape=jax.ShapeDtypeStruct((B, Cout, L), out_dtype),
        grid=(B,),
        in_specs=[
            pl.BlockSpec((1, C, L), lambda b: (b, 0, 0)),
            pl.BlockSpec((C, C), lambda b: (0, 0)),
            pl.BlockSpec((C, 1), lambda b: (0, 0)),
            pl.BlockSpec((C, 1), lambda b: (0, 0)),
            pl.BlockSpec((9, Cout, C), lambda b: (0, 0, 0)),
            pl.BlockSpec((Cout, 1), lambda b: (0, 0)),
            pl.BlockSpec((3, L), lambda b: (0, 0)),
            pl.BlockSpec((1, Cout, add_last), lambda b: (b, 0, 0)),
        ],
        out_specs=pl.BlockSpec((1, Cout, L), lambda b: (b, 0, 0)),
        compiler_params=_cparams("parallel"),
    )(x3, gmat, gamma, beta, w_taps, bias, xmask, add)


# ----------------------------------------------------------------------------
# Kernel 2: fused SiLU + time MLP (both residual blocks in one matmul)
# ----------------------------------------------------------------------------

def _time_mlp_kernel(t_ref, w_ref, b_ref, o_ref):
    t = t_ref[...].astype(jnp.float32)
    h = t * jax.nn.sigmoid(t)
    y = jnp.dot(h.astype(jnp.bfloat16), w_ref[...].astype(jnp.bfloat16),
                preferred_element_type=jnp.float32) + b_ref[...]
    o_ref[...] = y.astype(o_ref.dtype)


def time_mlp(t_emb, w_cat, b_cat):
    B, T = t_emb.shape
    N = w_cat.shape[1]
    return pl.pallas_call(
        _time_mlp_kernel,
        out_shape=jax.ShapeDtypeStruct((B, N), jnp.float32),
        grid=(1,),
        in_specs=[
            pl.BlockSpec((B, T), lambda i: (0, 0)),
            pl.BlockSpec((T, N), lambda i: (0, 0)),
            pl.BlockSpec((1, N), lambda i: (0, 0)),
        ],
        out_specs=pl.BlockSpec((B, N), lambda i: (0, 0)),
        compiler_params=_cparams("arbitrary"),
    )(t_emb, w_cat, b_cat)


# ----------------------------------------------------------------------------
# Kernel 3: attention GN + fused QKV projection   (output (B, L, 3C))
# ----------------------------------------------------------------------------

def _attn_qkv_kernel(x_ref, gmat_ref, gamma_ref, beta_ref, w_ref, b_ref, o_ref,
                     *, groups, eps):
    x = x_ref[0].astype(jnp.float32)                     # (C, L)
    C, L = x.shape
    inv_n = 1.0 / float((C // groups) * L)
    xn = _group_norm(x, gmat_ref[...], gamma_ref[...], beta_ref[...], inv_n, eps)
    # y = xn^T @ Wqkv, expressed as a "tn" dot_general (no explicit transpose).
    y = jax.lax.dot_general(xn.astype(jnp.bfloat16), w_ref[...].astype(jnp.bfloat16),
                            dimension_numbers=(((0,), (0,)), ((), ())),
                            preferred_element_type=jnp.float32)        # (L, 3C)
    o_ref[0] = (y + b_ref[...]).astype(o_ref.dtype)


def attn_qkv(x3, gmat, gamma, beta, w_qkv, b_qkv, *, groups, eps=EPS,
             out_dtype=jnp.bfloat16):
    B, C, L = x3.shape
    N = w_qkv.shape[1]
    kernel = functools.partial(_attn_qkv_kernel, groups=groups, eps=eps)
    return pl.pallas_call(
        kernel,
        out_shape=jax.ShapeDtypeStruct((B, L, N), out_dtype),
        grid=(B,),
        in_specs=[
            pl.BlockSpec((1, C, L), lambda b: (b, 0, 0)),
            pl.BlockSpec((C, C), lambda b: (0, 0)),
            pl.BlockSpec((C, 1), lambda b: (0, 0)),
            pl.BlockSpec((C, 1), lambda b: (0, 0)),
            pl.BlockSpec((C, N), lambda b: (0, 0)),
            pl.BlockSpec((1, N), lambda b: (0, 0)),
        ],
        out_specs=pl.BlockSpec((1, L, N), lambda b: (b, 0, 0)),
        compiler_params=_cparams("parallel"),
    )(x3, gmat, gamma, beta, w_qkv, b_qkv)


# ----------------------------------------------------------------------------
# Kernel 4: attention core (scores, softmax, @V) + fused output projection
# ----------------------------------------------------------------------------

def _attn_core_kernel(q_ref, k_ref, v_ref, wo_ref, bo_ref, o_ref, *, scale):
    q = q_ref[0].astype(jnp.bfloat16)                    # (C, L)
    k = k_ref[0].astype(jnp.bfloat16)
    v = v_ref[0].astype(jnp.bfloat16)
    # scores = q @ k^T via L-contraction dot_general (no .T / XLU transpose).
    scores = scale * jax.lax.dot_general(q, k, (((1,), (1,)), ((), ())),
                                         preferred_element_type=jnp.float32)  # (C, C)
    m = jnp.max(scores, axis=-1, keepdims=True)
    e = jnp.exp(scores - m)
    wts = e * pl.reciprocal(jnp.sum(e, axis=-1, keepdims=True), approx=True)
    att = jnp.dot(wts.astype(jnp.bfloat16), v,
                  preferred_element_type=jnp.float32)                          # (C, L)
    # out = att^T @ Wo  (rows ordered per pixel -> matches permute(0,2,1).reshape).
    out = jax.lax.dot_general(att.astype(jnp.bfloat16), wo_ref[...].astype(jnp.bfloat16),
                              (((0,), (0,)), ((), ())),
                              preferred_element_type=jnp.float32)              # (L, C)
    o_ref[0] = (out + bo_ref[...]).astype(o_ref.dtype)


def attn_core(q, k, v, wo, bo, *, scale, out_dtype=jnp.float32):
    B, C, L = q.shape
    kernel = functools.partial(_attn_core_kernel, scale=scale)
    bspec = pl.BlockSpec((1, C, L), lambda b: (b, 0, 0))
    return pl.pallas_call(
        kernel,
        out_shape=jax.ShapeDtypeStruct((B, L, C), out_dtype),
        grid=(B,),
        in_specs=[bspec, bspec, bspec,
                  pl.BlockSpec((C, C), lambda b: (0, 0)),
                  pl.BlockSpec((1, C), lambda b: (0, 0))],
        out_specs=pl.BlockSpec((1, L, C), lambda b: (b, 0, 0)),
        compiler_params=_cparams("parallel"),
    )(q, k, v, wo, bo)


# ----------------------------------------------------------------------------
# Static helper tensors (constants under jit)
# ----------------------------------------------------------------------------

def _group_matrix(C, groups):
    cpg = C // groups
    c = jnp.arange(C)
    return (c[:, None] // cpg == c[None, :] // cpg).astype(jnp.float32)   # (C, C)


def _x_masks(H, W):
    """(3, L) column masks for dx = -1, 0, +1 (zero-padding at image x-borders)."""
    L = H * W
    xpos = jnp.arange(L) % W
    return jnp.stack([
        (xpos >= 1).astype(jnp.float32),        # dx = -1 needs x >= 1
        jnp.ones((L,), jnp.float32),            # dx =  0
        (xpos <= W - 2).astype(jnp.float32),    # dx = +1 needs x <= W-2
    ], axis=0)


# ----------------------------------------------------------------------------
# Module forward passes
# ----------------------------------------------------------------------------

def res_block_forward(p, x3, t_add, gmat, xmask, *, W):
    # x3: (B, C, L) f32, t_add: (B, C) time projection for this block.
    h = gn_silu_conv3x3(x3, gmat, p["gn1_w"], p["gn1_b"],
                        p["conv1_w_taps"], p["conv1_b"], xmask,
                        t_add[:, :, None], W=W, groups=RES_GROUPS,
                        out_dtype=jnp.bfloat16)              # fused: +bias +t_emb
    return gn_silu_conv3x3(h, gmat, p["gn2_w"], p["gn2_b"],
                           p["conv2_w_taps"], p["conv2_b"], xmask,
                           x3, W=W, groups=RES_GROUPS,
                           out_dtype=jnp.float32)            # fused: +bias +residual


def attention_forward(p, x3, gmat_attn):
    B, C, L = x3.shape
    qkv = attn_qkv(x3, gmat_attn, p["gn_w"], p["gn_b"], p["w_qkv"], p["b_qkv"],
                   groups=ATTN_GROUPS)                       # (B, L, 3C) bf16
    # Reference uses .view() (reshape, NOT transpose) of the (B*L, C) linear output
    # into (B, C, L); reproduced exactly here.
    q = qkv[:, :, 0:C].reshape(B, C, L)
    k = qkv[:, :, C:2 * C].reshape(B, C, L)
    v = qkv[:, :, 2 * C:3 * C].reshape(B, C, L)
    out = attn_core(q, k, v, p["wo"], p["bo"], scale=1.0 / math.sqrt(C))  # (B, L, C)
    return x3 + out.reshape(B, C, L)


def middle_block_forward(params, x, t_emb):
    B, C, H, W = x.shape
    L = H * W
    x3 = x.reshape(B, C, L)
    gmat_res = _group_matrix(C, RES_GROUPS)
    gmat_attn = _group_matrix(C, ATTN_GROUPS)
    xmask = _x_masks(H, W)

    t_both = time_mlp(t_emb, params["time_w_cat"], params["time_b_cat"])  # (B, 2C)
    h3 = res_block_forward(params["res1"], x3, t_both[:, :C], gmat_res, xmask, W=W)
    h3 = attention_forward(params["attn"], h3, gmat_attn)
    h3 = res_block_forward(params["res2"], h3, t_both[:, C:], gmat_res, xmask, W=W)
    return h3.reshape(B, C, H, W)


# ----------------------------------------------------------------------------
# Deterministic parameter init + one-time repack (hoisted out of the forward)
# ----------------------------------------------------------------------------

def init_res_block(key, c, t_dim):
    ks = jax.random.split(key, 6)
    s = 0.05
    return {
        "gn1_w": jnp.ones((c,), jnp.float32),
        "gn1_b": jnp.zeros((c,), jnp.float32),
        "conv1_w": s * jax.random.normal(ks[0], (c, c, 3, 3), jnp.float32),
        "conv1_b": s * jax.random.normal(ks[1], (c,), jnp.float32),
        "time_w": s * jax.random.normal(ks[2], (t_dim, c), jnp.float32),
        "time_b": s * jax.random.normal(ks[3], (c,), jnp.float32),
        "gn2_w": jnp.ones((c,), jnp.float32),
        "gn2_b": jnp.zeros((c,), jnp.float32),
        "conv2_w": s * jax.random.normal(ks[4], (c, c, 3, 3), jnp.float32),
        "conv2_b": s * jax.random.normal(ks[5], (c,), jnp.float32),
    }


def init_attention(key, c):
    ks = jax.random.split(key, 8)
    s = 0.05
    return {
        "gn_w": jnp.ones((c,), jnp.float32),
        "gn_b": jnp.zeros((c,), jnp.float32),
        "wq": s * jax.random.normal(ks[0], (c, c), jnp.float32),
        "bq": s * jax.random.normal(ks[1], (c,), jnp.float32),
        "wk": s * jax.random.normal(ks[2], (c, c), jnp.float32),
        "bk": s * jax.random.normal(ks[3], (c,), jnp.float32),
        "wv": s * jax.random.normal(ks[4], (c, c), jnp.float32),
        "bv": s * jax.random.normal(ks[5], (c,), jnp.float32),
        "wo": s * jax.random.normal(ks[6], (c, c), jnp.float32),
        "bo": s * jax.random.normal(ks[7], (c,), jnp.float32),
    }


def init_middle_block(key, c, t_dim):
    k1, k2, k3 = jax.random.split(key, 3)
    return {
        "res1": init_res_block(k1, c, t_dim),
        "attn": init_attention(k2, c),
        "res2": init_res_block(k3, c, t_dim),
    }


def _conv_taps(w):
    """(Cout, Cin, 3, 3) -> (9, Cout, Cin), tap index t = ky*3 + kx."""
    cout, cin = w.shape[0], w.shape[1]
    return jnp.transpose(w, (2, 3, 0, 1)).reshape(9, cout, cin)


def prepare_params(raw):
    """One-time weight repack (conv taps, fused QKV, fused time MLP, (C,1) vectors)."""
    def prep_res(p):
        return {
            "gn1_w": p["gn1_w"].reshape(-1, 1), "gn1_b": p["gn1_b"].reshape(-1, 1),
            "conv1_w_taps": _conv_taps(p["conv1_w"]),
            "conv1_b": p["conv1_b"].reshape(-1, 1),
            "gn2_w": p["gn2_w"].reshape(-1, 1), "gn2_b": p["gn2_b"].reshape(-1, 1),
            "conv2_w_taps": _conv_taps(p["conv2_w"]),
            "conv2_b": p["conv2_b"].reshape(-1, 1),
        }
    a = raw["attn"]
    return {
        "res1": prep_res(raw["res1"]),
        "res2": prep_res(raw["res2"]),
        "attn": {
            "gn_w": a["gn_w"].reshape(-1, 1), "gn_b": a["gn_b"].reshape(-1, 1),
            "w_qkv": jnp.concatenate([a["wq"], a["wk"], a["wv"]], axis=1),
            "b_qkv": jnp.concatenate([a["bq"], a["bk"], a["bv"]]).reshape(1, -1),
            "wo": a["wo"], "bo": a["bo"].reshape(1, -1),
        },
        "time_w_cat": jnp.concatenate([raw["res1"]["time_w"], raw["res2"]["time_w"]], axis=1),
        "time_b_cat": jnp.concatenate([raw["res1"]["time_b"], raw["res2"]["time_b"]]).reshape(1, -1),
    }


# ----------------------------------------------------------------------------

if __name__ == "__main__":
    # channels must be divisible by ATTN_GROUPS=32 (nn.GroupNorm(32, C) constraint)
    B, C, H, W = 2, 32, 8, 8
    T_DIM = 32

    root = jax.random.PRNGKey(0)
    kx, kt, kp = jax.random.split(root, 3)
    x = jax.random.normal(kx, (B, C, H, W), jnp.float32)
    t_emb = jax.random.normal(kt, (B, T_DIM), jnp.float32)
    params = prepare_params(init_middle_block(kp, C, T_DIM))

    fwd = jax.jit(middle_block_forward)
    out = jax.block_until_ready(fwd(params, x, t_emb))
    assert out.shape == (B, C, H, W), out.shape
    assert bool(jnp.all(jnp.isfinite(out)))
    print("KERNEL_OK")
</pallas_src>

<mosaic_0001>
module attributes {stable_mosaic.version = 11 : i64} {
  func.func @_time_mlp_kernel(%arg0: i32, %arg1: memref<2x32xf32, #tpu.memory_space<vmem>>, %arg2: memref<32x64xf32, #tpu.memory_space<vmem>>, %arg3: memref<1x64xf32, #tpu.memory_space<vmem>>, %arg4: memref<2x64xf32, #tpu.memory_space<vmem>>) attributes {dimension_semantics = [#tpu.dimension_semantics<arbitrary>], iteration_bounds = array<i64: 1>, scalar_prefetch = 0 : i64, scratch_operands = 0 : i64, tpu.core_type = #tpu.core_type<tc>, window_params = [{pipeline_mode = #tpu.pipeline_mode<synchronous>, transform_indices = @transform_0, window_bounds = array<i64: 2, 32>}, {pipeline_mode = #tpu.pipeline_mode<synchronous>, transform_indices = @transform_1, window_bounds = array<i64: 32, 64>}, {pipeline_mode = #tpu.pipeline_mode<synchronous>, transform_indices = @transform_2, window_bounds = array<i64: 1, 64>}, {pipeline_mode = #tpu.pipeline_mode<synchronous>, transform_indices = @transform_3, window_bounds = array<i64: 2, 64>}]} {
    %c0 = arith.constant 0 : index
    %c0_0 = arith.constant 0 : index
    %0 = vector.load %arg1[%c0, %c0_0] : memref<2x32xf32, #tpu.memory_space<vmem>>, vector<2x32xf32>
    %1 = arith.negf %0 : vector<2x32xf32>
    %2 = math.exp %1 : vector<2x32xf32>
    %cst = arith.constant 1.000000e+00 : f32
    %3 = vector.broadcast %cst : f32 to vector<2x32xf32>
    %4 = arith.addf %3, %2 : vector<2x32xf32>
    %5 = arith.divf %3, %4 : vector<2x32xf32>
    %6 = arith.mulf %0, %5 : vector<2x32xf32>
    %7 = arith.truncf %6 : vector<2x32xf32> to vector<2x32xbf16>
    %c0_1 = arith.constant 0 : index
    %c0_2 = arith.constant 0 : index
    %8 = vector.load %arg2[%c0_1, %c0_2] : memref<32x64xf32, #tpu.memory_space<vmem>>, vector<32x64xf32>
    %9 = arith.truncf %8 : vector<32x64xf32> to vector<32x64xbf16>
    %cst_3 = arith.constant dense<0.000000e+00> : vector<2x64xf32>
    %10 = tpu.matmul %7, %9, %cst_3 {dimension_numbers = #tpu.dot_dimension_numbers<[1], [0], [0], [1], [0, 0, 1, 1], [], []>} : vector<2x32xbf16>, vector<32x64xbf16>, vector<2x64xf32> -> vector<2x64xf32>
    %c0_4 = arith.constant 0 : index
    %c0_5 = arith.constant 0 : index
    %11 = vector.load %arg3[%c0_4, %c0_5] : memref<1x64xf32, #tpu.memory_space<vmem>>, vector<1x64xf32>
    %12 = vector.broadcast %11 : vector<1x64xf32> to vector<2x64xf32>
    %13 = arith.addf %10, %12 : vector<2x64xf32>
    %c0_6 = arith.constant 0 : index
    %c0_7 = arith.constant 0 : index
    %14 = vector.load %arg4[%c0_6, %c0_7] : memref<2x64xf32, #tpu.memory_space<vmem>>, vector<2x64xf32>
    tpu.vector_store %arg4[%c0_6, %c0_7], %13 {strides = array<i32>} : memref<2x64xf32, #tpu.memory_space<vmem>>, vector<2x64xf32>,
    return
  }
  func.func @transform_0(%arg0: i32) -> (i32, i32) {
    %c0_i32 = arith.constant 0 : i32
    %c0_i32_0 = arith.constant 0 : i32
    %c0_i32_1 = arith.constant 0 : i32
    return %c0_i32, %c0_i32_0 : i32, i32
  }
  func.func @transform_1(%arg0: i32) -> (i32, i32) {
    %c0_i32 = arith.constant 0 : i32
    %c0_i32_0 = arith.constant 0 : i32
    %c0_i32_1 = arith.constant 0 : i32
    return %c0_i32, %c0_i32_0 : i32, i32
  }
  func.func @transform_2(%arg0: i32) -> (i32, i32) {
    %c0_i32 = arith.constant 0 : i32
    %c0_i32_0 = arith.constant 0 : i32
    %c0_i32_1 = arith.constant 0 : i32
    return %c0_i32, %c0_i32_0 : i32, i32
  }
  func.func @transform_3(%arg0: i32) -> (i32, i32) {
    %c0_i32 = arith.constant 0 : i32
    %c0_i32_0 = arith.constant 0 : i32
    %c0_i32_1 = arith.constant 0 : i32
    return %c0_i32, %c0_i32_0 : i32, i32
  }
}

module attributes {stable_mosaic.version = 11 : i64} {
  func.func @_gn_silu_conv_kernel(%arg0: i32, %arg1: memref<1x32x64xf32, #tpu.memory_space<vmem>>, %arg2: memref<32x32xf32, #tpu.memory_space<vmem>>, %arg3: memref<32x1xf32, #tpu.memory_space<vmem>>, %arg4: memref<32x1xf32, #tpu.memory_space<vmem>>, %arg5: memref<9x32x32xf32, #tpu.memory_space<vmem>>, %arg6: memref<32x1xf32, #tpu.memory_space<vmem>>, %arg7: memref<3x64xf32, #tpu.memory_space<vmem>>, %arg8: memref<1x32x1xf32, #tpu.memory_space<vmem>>, %arg9: memref<1x32x64xbf16, #tpu.memory_space<vmem>>) attributes {dimension_semantics = [#tpu.dimension_semantics<parallel>], iteration_bounds = array<i64: 2>, scalar_prefetch = 0 : i64, scratch_operands = 0 : i64, tpu.core_type = #tpu.core_type<tc>, window_params = [{transform_indices = @transform_0, window_bounds = array<i64: 1, 32, 64>}, {pipeline_mode = #tpu.pipeline_mode<synchronous>, transform_indices = @transform_1, window_bounds = array<i64: 32, 32>}, {pipeline_mode = #tpu.pipeline_mode<synchronous>, transform_indices = @transform_2, window_bounds = array<i64: 32, 1>}, {pipeline_mode = #tpu.pipeline_mode<synchronous>, transform_indices = @transform_3, window_bounds = array<i64: 32, 1>}, {pipeline_mode = #tpu.pipeline_mode<synchronous>, transform_indices = @transform_4, window_bounds = array<i64: 9, 32, 32>}, {pipeline_mode = #tpu.pipeline_mode<synchronous>, transform_indices = @transform_5, window_bounds = array<i64: 32, 1>}, {pipeline_mode = #tpu.pipeline_mode<synchronous>, transform_indices = @transform_6, window_bounds = array<i64: 3, 64>}, {transform_indices = @transform_7, window_bounds = array<i64: 1, 32, 1>}, {transform_indices = @transform_8, window_bounds = array<i64: 1, 32, 64>}]} {
    %c0 = arith.constant 0 : index
    %c0_0 = arith.constant 0 : index
    %c0_1 = arith.constant 0 : index
    %0 = vector.load %arg1[%c0, %c0_0, %c0_1] : memref<1x32x64xf32, #tpu.memory_space<vmem>>, vector<1x32x64xf32>
    %1 = vector.shape_cast %0 : vector<1x32x64xf32> to vector<32x64xf32>
    %c0_2 = arith.constant 0 : index
    %c0_3 = arith.constant 0 : index
    %2 = vector.load %arg2[%c0_2, %c0_3] : memref<32x32xf32, #tpu.memory_space<vmem>>, vector<32x32xf32>
    %c0_4 = arith.constant 0 : index
    %c0_5 = arith.constant 0 : index
    %3 = vector.load %arg3[%c0_4, %c0_5] : memref<32x1xf32, #tpu.memory_space<vmem>>, vector<32x1xf32>
    %c0_6 = arith.constant 0 : index
    %c0_7 = arith.constant 0 : index
    %4 = vector.load %arg4[%c0_6, %c0_7] : memref<32x1xf32, #tpu.memory_space<vmem>>, vector<32x1xf32>
    %cst = arith.constant dense<0.000000e+00> : vector<32x64xf32>
    %5 = tpu.matmul %2, %1, %cst {dimension_numbers = #tpu.dot_dimension_numbers<[1], [0], [0], [1], [0, 0, 1, 1], [], []>} : vector<32x32xf32>, vector<32x64xf32>, vector<32x64xf32> -> vector<32x64xf32>
    %cst_8 = arith.constant dense<0.000000e+00> : vector<32xf32>
    %6 = vector.multi_reduction <add>, %5, %cst_8 [1] : vector<32x64xf32> to vector<32xf32>
    %7 = vector.shape_cast %6 : vector<32xf32> to vector<32x1xf32>
    %cst_9 = arith.constant 3.906250e-03 : f32
    %8 = vector.broadcast %cst_9 : f32 to vector<32x1xf32>
    %9 = arith.mulf %7, %8 : vector<32x1xf32>
    %10 = vector.broadcast %9 : vector<32x1xf32> to vector<32x64xf32>
    %11 = arith.subf %1, %10 : vector<32x64xf32>
    %12 = arith.mulf %11, %11 : vector<32x64xf32>
    %cst_10 = arith.constant dense<0.000000e+00> : vector<32x64xf32>
    %13 = tpu.matmul %2, %12, %cst_10 {dimension_numbers = #tpu.dot_dimension_numbers<[1], [0], [0], [1], [0, 0, 1, 1], [], []>} : vector<32x32xf32>, vector<32x64xf32>, vector<32x64xf32> -> vector<32x64xf32>
    %cst_11 = arith.constant dense<0.000000e+00> : vector<32xf32>
    %14 = vector.multi_reduction <add>, %13, %cst_11 [1] : vector<32x64xf32> to vector<32xf32>
    %15 = vector.shape_cast %14 : vector<32xf32> to vector<32x1xf32>
    %cst_12 = arith.constant 3.906250e-03 : f32
    %16 = vector.broadcast %cst_12 : f32 to vector<32x1xf32>
    %17 = arith.mulf %15, %16 : vector<32x1xf32>
    %cst_13 = arith.constant 9.99999974E-6 : f32
    %18 = vector.broadcast %cst_13 : f32 to vector<32x1xf32>
    %19 = arith.addf %17, %18 : vector<32x1xf32>
    %20 = math.rsqrt %19 : vector<32x1xf32>
    %21 = vector.broadcast %20 : vector<32x1xf32> to vector<32x64xf32>
    %22 = arith.mulf %11, %21 : vector<32x64xf32>
    %23 = vector.broadcast %3 : vector<32x1xf32> to vector<32x64xf32>
    %24 = arith.mulf %22, %23 : vector<32x64xf32>
    %25 = vector.broadcast %4 : vector<32x1xf32> to vector<32x64xf32>
    %26 = arith.addf %24, %25 : vector<32x64xf32>
    %27 = arith.negf %26 : vector<32x64xf32>
    %28 = math.exp %27 : vector<32x64xf32>
    %cst_14 = arith.constant 1.000000e+00 : f32
    %29 = vector.broadcast %cst_14 : f32 to vector<32x64xf32>
    %30 = arith.addf %29, %28 : vector<32x64xf32>
    %31 = arith.divf %29, %30 : vector<32x64xf32>
    %32 = arith.mulf %26, %31 : vector<32x64xf32>
    %33 = arith.truncf %32 : vector<32x64xf32> to vector<32x64xbf16>
    %34 = tpu.iota {dimensions = array<i32: 0>} : vector<64x64xi32>
    %35 = tpu.iota {dimensions = array<i32: 1>} : vector<64x64xi32>
    %36 = arith.subi %34, %35 : vector<64x64xi32>
    %c0_15 = arith.constant 0 : index
    %c0_16 = arith.constant 0 : index
    %37 = vector.load %arg7[%c0_15, %c0_16] : memref<3x64xf32, #tpu.memory_space<vmem>>, vector<3x64xf32>
    %cst_17 = arith.constant 0.000000e+00 : f32
    %38 = vector.broadcast %cst_17 : f32 to vector<32x64xf32>
    %c-9_i32 = arith.constant -9 : i32
    %39 = vector.broadcast %c-9_i32 : i32 to vector<64x64xi32>
    %40 = arith.cmpi eq, %36, %39 : vector<64x64xi32>
    %41 = vector.extract_strided_slice %37 {offsets = [0, 0], sizes = [1, 64], strides = [1, 1]} : vector<3x64xf32> to vector<1x64xf32>
    %cst_18 = arith.constant 0.000000e+00 : f32
    %42 = vector.shape_cast %41 : vector<1x64xf32> to vector<1x64xf32>
    %43 = vector.broadcast %42 : vector<1x64xf32> to vector<64x64xf32>
    %44 = vector.broadcast %cst_18 : f32 to vector<64x64xf32>
    %45 = arith.select %40, %43, %44 : vector<64x64xi1>, vector<64x64xf32>
    %46 = arith.truncf %45 : vector<64x64xf32> to vector<64x64xbf16>
    %cst_19 = arith.constant dense<0.000000e+00> : vector<32x64xf32>
    %47 = tpu.matmul %33, %46, %cst_19 {dimension_numbers = #tpu.dot_dimension_numbers<[1], [0], [0], [1], [0, 0, 1, 1], [], []>} : vector<32x64xbf16>, vector<64x64xbf16>, vector<32x64xf32> -> vector<32x64xf32>
    %c0_20 = arith.constant 0 : index
    %c0_21 = arith.constant 0 : index
    %c0_22 = arith.constant 0 : index
    %48 = vector.load %arg5[%c0_20, %c0_21, %c0_22] : memref<9x32x32xf32, #tpu.memory_space<vmem>>, vector<1x32x32xf32>
    %49 = vector.shape_cast %48 : vector<1x32x32xf32> to vector<32x32xf32>
    %50 = arith.truncf %49 : vector<32x32xf32> to vector<32x32xbf16>
    %51 = arith.truncf %47 : vector<32x64xf32> to vector<32x64xbf16>
    %cst_23 = arith.constant dense<0.000000e+00> : vector<32x64xf32>
    %52 = tpu.matmul %50, %51, %cst_23 {dimension_numbers = #tpu.dot_dimension_numbers<[1], [0], [0], [1], [0, 0, 1, 1], [], []>} : vector<32x32xbf16>, vector<32x64xbf16>, vector<32x64xf32> -> vector<32x64xf32>
    %53 = arith.addf %38, %52 : vector<32x64xf32>
    %c-8_i32 = arith.constant -8 : i32
    %54 = vector.broadcast %c-8_i32 : i32 to vector<64x64xi32>
    %55 = arith.cmpi eq, %36, %54 : vector<64x64xi32>
    %56 = vector.extract_strided_slice %37 {offsets = [1, 0], sizes = [1, 64], strides = [1, 1]} : vector<3x64xf32> to vector<1x64xf32>
    %cst_24 = arith.constant 0.000000e+00 : f32
    %57 = vector.shape_cast %56 : vector<1x64xf32> to vector<1x64xf32>
    %58 = vector.broadcast %57 : vector<1x64xf32> to vector<64x64xf32>
    %59 = vector.broadcast %cst_24 : f32 to vector<64x64xf32>
    %60 = arith.select %55, %58, %59 : vector<64x64xi1>, vector<64x64xf32>
    %61 = arith.truncf %60 : vector<64x64xf32> to vector<64x64xbf16>
    %cst_25 = arith.constant dense<0.000000e+00> : vector<32x64xf32>
    %62 = tpu.matmul %33, %61, %cst_25 {dimension_numbers = #tpu.dot_dimension_numbers<[1], [0], [0], [1], [0, 0, 1, 1], [], []>} : vector<32x64xbf16>, vector<64x64xbf16>, vector<32x64xf32> -> vector<32x64xf32>
    %c1 = arith.constant 1 : index
    %c0_26 = arith.constant 0 : index
    %c0_27 = arith.constant 0 : index
    %63 = vector.load %arg5[%c1, %c0_26, %c0_27] : memref<9x32x32xf32, #tpu.memory_space<vmem>>, vector<1x32x32xf32>
    %64 = vector.shape_cast %63 : vector<1x32x32xf32> to vector<32x32xf32>
    %65 = arith.truncf %64 : vector<32x32xf32> to vector<32x32xbf16>
    %66 = arith.truncf %62 : vector<32x64xf32> to vector<32x64xbf16>
    %cst_28 = arith.constant dense<0.000000e+00> : vector<32x64xf32>
    %67 = tpu.matmul %65, %66, %cst_28 {dimension_numbers = #tpu.dot_dimension_numbers<[1], [0], [0], [1], [0, 0, 1, 1], [], []>} : vector<32x32xbf16>, vector<32x64xbf16>, vector<32x64xf32> -> vector<32x64xf32>
    %68 = arith.addf %53, %67 : vector<32x64xf32>
    %c-7_i32 = arith.constant -7 : i32
    %69 = vector.broadcast %c-7_i32 : i32 to vector<64x64xi32>
    %70 = arith.cmpi eq, %36, %69 : vector<64x64xi32>
    %71 = vector.extract_strided_slice %37 {offsets = [2, 0], sizes = [1, 64], strides = [1, 1]} : vector<3x64xf32> to vector<1x64xf32>
    %cst_29 = arith.constant 0.000000e+00 : f32
    %72 = vector.shape_cast %71 : vector<1x64xf32> to vector<1x64xf32>
    %73 = vector.broadcast %72 : vector<1x64xf32> to vector<64x64xf32>
    %74 = vector.broadcast %cst_29 : f32 to vector<64x64xf32>
    %75 = arith.select %70, %73, %74 : vector<64x64xi1>, vector<64x64xf32>
    %76 = arith.truncf %75 : vector<64x64xf32> to vector<64x64xbf16>
    %cst_30 = arith.constant dense<0.000000e+00> : vector<32x64xf32>
    %77 = tpu.matmul %33, %76, %cst_30 {dimension_numbers = #tpu.dot_dimension_numbers<[1], [0], [0], [1], [0, 0, 1, 1], [], []>} : vector<32x64xbf16>, vector<64x64xbf16>, vector<32x64xf32> -> vector<32x64xf32>
    %c2 = arith.constant 2 : index
    %c0_31 = arith.constant 0 : index
    %c0_32 = arith.constant 0 : index
    %78 = vector.load %arg5[%c2, %c0_31, %c0_32] : memref<9x32x32xf32, #tpu.memory_space<vmem>>, vector<1x32x32xf32>
    %79 = vector.shape_cast %78 : vector<1x32x32xf32> to vector<32x32xf32>
    %80 = arith.truncf %79 : vector<32x32xf32> to vector<32x32xbf16>
    %81 = arith.truncf %77 : vector<32x64xf32> to vector<32x64xbf16>
    %cst_33 = arith.constant dense<0.000000e+00> : vector<32x64xf32>
    %82 = tpu.matmul %80, %81, %cst_33 {dimension_numbers = #tpu.dot_dimension_numbers<[1], [0], [0], [1], [0, 0, 1, 1], [], []>} : vector<32x32xbf16>, vector<32x64xbf16>, vector<32x64xf32> -> vector<32x64xf32>
    %83 = arith.addf %68, %82 : vector<32x64xf32>
    %c-1_i32 = arith.constant -1 : i32
    %84 = vector.broadcast %c-1_i32 : i32 to vector<64x64xi32>
    %85 = arith.cmpi eq, %36, %84 : vector<64x64xi32>
    %86 = vector.extract_strided_slice %37 {offsets = [0, 0], sizes = [1, 64], strides = [1, 1]} : vector<3x64xf32> to vector<1x64xf32>
    %cst_34 = arith.constant 0.000000e+00 : f32
    %87 = vector.shape_cast %86 : vector<1x64xf32> to vector<1x64xf32>
    %88 = vector.broadcast %87 : vector<1x64xf32> to vector<64x64xf32>
    %89 = vector.broadcast %cst_34 : f32 to vector<64x64xf32>
    %90 = arith.select %85, %88, %89 : vector<64x64xi1>, vector<64x64xf32>
    %91 = arith.truncf %90 : vector<64x64xf32> to vector<64x64xbf16>
    %cst_35 = arith.constant dense<0.000000e+00> : vector<32x64xf32>
    %92 = tpu.matmul %33, %91, %cst_35 {dimension_numbers = #tpu.dot_dimension_numbers<[1], [0], [0], [1], [0, 0, 1, 1], [], []>} : vector<32x64xbf16>, vector<64x64xbf16>, vector<32x64xf32> -> vector<32x64xf32>
    %c3 = arith.constant 3 : index
    %c0_36 = arith.constant 0 : index
    %c0_37 = arith.constant 0 : index
    %93 = vector.load %arg5[%c3, %c0_36, %c0_37] : memref<9x32x32xf32, #tpu.memory_space<vmem>>, vector<1x32x32xf32>
    %94 = vector.shape_cast %93 : vector<1x32x32xf32> to vector<32x32xf32>
    %95 = arith.truncf %94 : vector<32x32xf32> to vector<32x32xbf16>
    %96 = arith.truncf %92 : vector<32x64xf32> to vector<32x64xbf16>
    %cst_38 = arith.constant dense<0.000000e+00> : vector<32x64xf32>
    %97 = tpu.matmul %95, %96, %cst_38 {dimension_numbers = #tpu.dot_dimension_numbers<[1], [0], [0], [1], [0, 0, 1, 1], [], []>} : vector<32x32xbf16>, vector<32x64xbf16>, vector<32x64xf32> -> vector<32x64xf32>
    %98 = arith.addf %83, %97 : vector<32x64xf32>
    %c0_i32 = arith.constant 0 : i32
    %99 = vector.broadcast %c0_i32 : i32 to vector<64x64xi32>
    %100 = arith.cmpi eq, %36, %99 : vector<64x64xi32>
    %101 = vector.extract_strided_slice %37 {offsets = [1, 0], sizes = [1, 64], strides = [1, 1]} : vector<3x64xf32> to vector<1x64xf32>
    %cst_39 = arith.constant 0.000000e+00 : f32
    %102 = vector.shape_cast %101 : vector<1x64xf32> to vector<1x64xf32>
    %103 = vector.broadcast %102 : vector<1x64xf32> to vector<64x64xf32>
    %104 = vector.broadcast %cst_39 : f32 to vector<64x64xf32>
    %105 = arith.select %100, %103, %104 : vector<64x64xi1>, vector<64x64xf32>
    %106 = arith.truncf %105 : vector<64x64xf32> to vector<64x64xbf16>
    %cst_40 = arith.constant dense<0.000000e+00> : vector<32x64xf32>
    %107 = tpu.matmul %33, %106, %cst_40 {dimension_numbers = #tpu.dot_dimension_numbers<[1], [0], [0], [1], [0, 0, 1, 1], [], []>} : vector<32x64xbf16>, vector<64x64xbf16>, vector<32x64xf32> -> vector<32x64xf32>
    %c4 = arith.constant 4 : index
    %c0_41 = arith.constant 0 : index
    %c0_42 = arith.constant 0 : index
    %108 = vector.load %arg5[%c4, %c0_41, %c0_42] : memref<9x32x32xf32, #tpu.memory_space<vmem>>, vector<1x32x32xf32>
    %109 = vector.shape_cast %108 : vector<1x32x32xf32> to vector<32x32xf32>
    %110 = arith.truncf %109 : vector<32x32xf32> to vector<32x32xbf16>
    %111 = arith.truncf %107 : vector<32x64xf32> to vector<32x64xbf16>
    %cst_43 = arith.constant dense<0.000000e+00> : vector<32x64xf32>
    %112 = tpu.matmul %110, %111, %cst_43 {dimension_numbers = #tpu.dot_dimension_numbers<[1], [0], [0], [1], [0, 0, 1, 1], [], []>} : vector<32x32xbf16>, vector<32x64xbf16>, vector<32x64xf32> -> vector<32x64xf32>
    %113 = arith.addf %98, %112 : vector<32x64xf32>
    %c1_i32 = arith.constant 1 : i32
    %114 = vector.broadcast %c1_i32 : i32 to vector<64x64xi32>
    %115 = arith.cmpi eq, %36, %114 : vector<64x64xi32>
    %116 = vector.extract_strided_slice %37 {offsets = [2, 0], sizes = [1, 64], strides = [1, 1]} : vector<3x64xf32> to vector<1x64xf32>
    %cst_44 = arith.constant 0.000000e+00 : f32
    %117 = vector.shape_cast %116 : vector<1x64xf32> to vector<1x64xf32>
    %118 = vector.broadcast %117 : vector<1x64xf32> to vector<64x64xf32>
    %119 = vector.broadcast %cst_44 : f32 to vector<64x64xf32>
    %120 = arith.select %115, %118, %119 : vector<64x64xi1>, vector<64x64xf32>
    %121 = arith.truncf %120 : vector<64x64xf32> to vector<64x64xbf16>
    %cst_45 = arith.constant dense<0.000000e+00> : vector<32x64xf32>
    %122 = tpu.matmul %33, %121, %cst_45 {dimension_numbers = #tpu.dot_dimension_numbers<[1], [0], [0], [1], [0, 0, 1, 1], [], []>} : vector<32x64xbf16>, vector<64x64xbf16>, vector<32x64xf32> -> vector<32x64xf32>
    %c5 = arith.constant 5 : index
    %c0_46 = arith.constant 0 : index
    %c0_47 = arith.constant 0 : index
    %123 = vector.load %arg5[%c5, %c0_46, %c0_47] : memref<9x32x32xf32, #tpu.memory_space<vmem>>, vector<1x32x32xf32>
    %124 = vector.shape_cast %123 : vector<1x32x32xf32> to vector<32x32xf32>
    %125 = arith.truncf %124 : vector<32x32xf32> to vector<32x32xbf16>
    %126 = arith.truncf %122 : vector<32x64xf32> to vector<32x64xbf16>
    %cst_48 = arith.constant dense<0.000000e+00> : vector<32x64xf32>
    %127 = tpu.matmul %125, %126, %cst_48 {dimension_numbers = #tpu.dot_dimension_numbers<[1], [0], [0], [1], [0, 0, 1, 1], [], []>} : vector<32x32xbf16>, vector<32x64xbf16>, vector<32x64xf32> -> vector<32x64xf32>
    %128 = arith.addf %113, %127 : vector<32x64xf32>
    %c7_i32 = arith.constant 7 : i32
    %129 = vector.broadcast %c7_i32 : i32 to vector<64x64xi32>
    %130 = arith.cmpi eq, %36, %129 : vector<64x64xi32>
    %131 = vector.extract_strided_slice %37 {offsets = [0, 0], sizes = [1, 64], strides = [1, 1]} : vector<3x64xf32> to vector<1x64xf32>
    %cst_49 = arith.constant 0.000000e+00 : f32
    %132 = vector.shape_cast %131 : vector<1x64xf32> to vector<1x64xf32>
    %133 = vector.broadcast %132 : vector<1x64xf32> to vector<64x64xf32>
    %134 = vector.broadcast %cst_49 : f32 to vector<64x64xf32>
    %135 = arith.select %130, %133, %134 : vector<64x64xi1>, vector<64x64xf32>
    %136 = arith.truncf %135 : vector<64x64xf32> to vector<64x64xbf16>
    %cst_50 = arith.constant dense<0.000000e+00> : vector<32x64xf32>
    %137 = tpu.matmul %33, %136, %cst_50 {dimension_numbers = #tpu.dot_dimension_numbers<[1], [0], [0], [1], [0, 0, 1, 1], [], []>} : vector<32x64xbf16>, vector<64x64xbf16>, vector<32x64xf32> -> vector<32x64xf32>
    %c6 = arith.constant 6 : index
    %c0_51 = arith.constant 0 : index
    %c0_52 = arith.constant 0 : index
    %138 = vector.load %arg5[%c6, %c0_51, %c0_52] : memref<9x32x32xf32, #tpu.memory_space<vmem>>, vector<1x32x32xf32>
    %139 = vector.shape_cast %138 : vector<1x32x32xf32> to vector<32x32xf32>
    %140 = arith.truncf %139 : vector<32x32xf32> to vector<32x32xbf16>
    %141 = arith.truncf %137 : vector<32x64xf32> to vector<32x64xbf16>
    %cst_53 = arith.constant dense<0.000000e+00> : vector<32x64xf32>
    %142 = tpu.matmul %140, %141, %cst_53 {dimension_numbers = #tpu.dot_dimension_numbers<[1], [0], [0], [1], [0, 0, 1, 1], [], []>} : vector<32x32xbf16>, vector<32x64xbf16>, vector<32x64xf32> -> vector<32x64xf32>
    %143 = arith.addf %128, %142 : vector<32x64xf32>
    %c8_i32 = arith.constant 8 : i32
    %144 = vector.broadcast %c8_i32 : i32 to vector<64x64xi32>
    %145 = arith.cmpi eq, %36, %144 : vector<64x64xi32>
    %146 = vector.extract_strided_slice %37 {offsets = [1, 0], sizes = [1, 64], strides = [1, 1]} : vector<3x64xf32> to vector<1x64xf32>
    %cst_54 = arith.constant 0.000000e+00 : f32
    %147 = vector.shape_cast %146 : vector<1x64xf32> to vector<1x64xf32>
    %148 = vector.broadcast %147 : vector<1x64xf32> to vector<64x64xf32>
    %149 = vector.broadcast %cst_54 : f32 to vector<64x64xf32>
    %150 = arith.select %145, %148, %149 : vector<64x64xi1>, vector<64x64xf32>
    %151 = arith.truncf %150 : vector<64x64xf32> to vector<64x64xbf16>
    %cst_55 = arith.constant dense<0.000000e+00> : vector<32x64xf32>
    %152 = tpu.matmul %33, %151, %cst_55 {dimension_numbers = #tpu.dot_dimension_numbers<[1], [0], [0], [1], [0, 0, 1, 1], [], []>} : vector<32x64xbf16>, vector<64x64xbf16>, vector<32x64xf32> -> vector<32x64xf32>
    %c7 = arith.constant 7 : index
    %c0_56 = arith.constant 0 : index
    %c0_57 = arith.constant 0 : index
    %153 = vector.load %arg5[%c7, %c0_56, %c0_57] : memref<9x32x32xf32, #tpu.memory_space<vmem>>, vector<1x32x32xf32>
    %154 = vector.shape_cast %153 : vector<1x32x32xf32> to vector<32x32xf32>
    %155 = arith.truncf %154 : vector<32x32xf32> to vector<32x32xbf16>
    %156 = arith.truncf %152 : vector<32x64xf32> to vector<32x64xbf16>
    %cst_58 = arith.constant dense<0.000000e+00> : vector<32x64xf32>
    %157 = tpu.matmul %155, %156, %cst_58 {dimension_numbers = #tpu.dot_dimension_numbers<[1], [0], [0], [1], [0, 0, 1, 1], [], []>} : vector<32x32xbf16>, vector<32x64xbf16>, vector<32x64xf32> -> vector<32x64xf32>
    %158 = arith.addf %143, %157 : vector<32x64xf32>
    %c9_i32 = arith.constant 9 : i32
    %159 = vector.broadcast %c9_i32 : i32 to vector<64x64xi32>
    %160 = arith.cmpi eq, %36, %159 : vector<64x64xi32>
    %161 = vector.extract_strided_slice %37 {offsets = [2, 0], sizes = [1, 64], strides = [1, 1]} : vector<3x64xf32> to vector<1x64xf32>
    %cst_59 = arith.constant 0.000000e+00 : f32
    %162 = vector.shape_cast %161 : vector<1x64xf32> to vector<1x64xf32>
    %163 = vector.broadcast %162 : vector<1x64xf32> to vector<64x64xf32>
    %164 = vector.broadcast %cst_59 : f32 to vector<64x64xf32>
    %165 = arith.select %160, %163, %164 : vector<64x64xi1>, vector<64x64xf32>
    %166 = arith.truncf %165 : vector<64x64xf32> to vector<64x64xbf16>
    %cst_60 = arith.constant dense<0.000000e+00> : vector<32x64xf32>
    %167 = tpu.matmul %33, %166, %cst_60 {dimension_numbers = #tpu.dot_dimension_numbers<[1], [0], [0], [1], [0, 0, 1, 1], [], []>} : vector<32x64xbf16>, vector<64x64xbf16>, vector<32x64xf32> -> vector<32x64xf32>
    %c8 = arith.constant 8 : index
    %c0_61 = arith.constant 0 : index
    %c0_62 = arith.constant 0 : index
    %168 = vector.load %arg5[%c8, %c0_61, %c0_62] : memref<9x32x32xf32, #tpu.memory_space<vmem>>, vector<1x32x32xf32>
    %169 = vector.shape_cast %168 : vector<1x32x32xf32> to vector<32x32xf32>
    %170 = arith.truncf %169 : vector<32x32xf32> to vector<32x32xbf16>
    %171 = arith.truncf %167 : vector<32x64xf32> to vector<32x64xbf16>
    %cst_63 = arith.constant dense<0.000000e+00> : vector<32x64xf32>
    %172 = tpu.matmul %170, %171, %cst_63 {dimension_numbers = #tpu.dot_dimension_numbers<[1], [0], [0], [1], [0, 0, 1, 1], [], []>} : vector<32x32xbf16>, vector<32x64xbf16>, vector<32x64xf32> -> vector<32x64xf32>
    %173 = arith.addf %158, %172 : vector<32x64xf32>
    %c0_64 = arith.constant 0 : index
    %c0_65 = arith.constant 0 : index
    %174 = vector.load %arg6[%c0_64, %c0_65] : memref<32x1xf32, #tpu.memory_space<vmem>>, vector<32x1xf32>
    %175 = vector.broadcast %174 : vector<32x1xf32> to vector<32x64xf32>
    %176 = arith.addf %173, %175 : vector<32x64xf32>
    %c0_66 = arith.constant 0 : index
    %c0_67 = arith.constant 0 : index
    %c0_68 = arith.constant 0 : index
    %177 = vector.load %arg8[%c0_66, %c0_67, %c0_68] : memref<1x32x1xf32, #tpu.memory_space<vmem>>, vector<1x32x1xf32>
    %178 = vector.shape_cast %177 : vector<1x32x1xf32> to vector<32x1xf32>
    %179 = vector.broadcast %178 : vector<32x1xf32> to vector<32x64xf32>
    %180 = arith.addf %176, %179 : vector<32x64xf32>
    %181 = arith.truncf %180 : vector<32x64xf32> to vector<32x64xbf16>
    %c0_69 = arith.constant 0 : index
    %c0_70 = arith.constant 0 : index
    %c0_71 = arith.constant 0 : index
    %182 = vector.load %arg9[%c0_69, %c0_70, %c0_71] : memref<1x32x64xbf16, #tpu.memory_space<vmem>>, vector<1x32x64xbf16>
    %183 = vector.shape_cast %182 : vector<1x32x64xbf16> to vector<32x64xbf16>
    %184 = vector.shape_cast %181 : vector<32x64xbf16> to vector<1x32x64xbf16>
    tpu.vector_store %arg9[%c0_69, %c0_70, %c0_71], %184 {strides = array<i32>} : memref<1x32x64xbf16, #tpu.memory_space<vmem>>, vector<1x32x64xbf16>,
    return
  }
  func.func @transform_0(%arg0: i32) -> (i32, i32, i32) {
    %c0_i32 = arith.constant 0 : i32
    %c0_i32_0 = arith.constant 0 : i32
    %c0_i32_1 = arith.constant 0 : i32
    return %arg0, %c0_i32, %c0_i32_0 : i32, i32, i32
  }
  func.func @transform_1(%arg0: i32) -> (i32, i32) {
    %c0_i32 = arith.constant 0 : i32
    %c0_i32_0 = arith.constant 0 : i32
    %c0_i32_1 = arith.constant 0 : i32
    return %c0_i32, %c0_i32_0 : i32, i32
  }
  func.func @transform_2(%arg0: i32) -> (i32, i32) {
    %c0_i32 = arith.constant 0 : i32
    %c0_i32_0 = arith.constant 0 : i32
    %c0_i32_1 = arith.constant 0 : i32
    return %c0_i32, %c0_i32_0 : i32, i32
  }
  func.func @transform_3(%arg0: i32) -> (i32, i32) {
    %c0_i32 = arith.constant 0 : i32
    %c0_i32_0 = arith.constant 0 : i32
    %c0_i32_1 = arith.constant 0 : i32
    return %c0_i32, %c0_i32_0 : i32, i32
  }
  func.func @transform_4(%arg0: i32) -> (i32, i32, i32) {
    %c0_i32 = arith.constant 0 : i32
    %c0_i32_0 = arith.constant 0 : i32
    %c0_i32_1 = arith.constant 0 : i32
    %c0_i32_2 = arith.constant 0 : i32
    return %c0_i32, %c0_i32_0, %c0_i32_1 : i32, i32, i32
  }
  func.func @transform_5(%arg0: i32) -> (i32, i32) {
    %c0_i32 = arith.constant 0 : i32
    %c0_i32_0 = arith.constant 0 : i32
    %c0_i32_1 = arith.constant 0 : i32
    return %c0_i32, %c0_i32_0 : i32, i32
  }
  func.func @transform_6(%arg0: i32) -> (i32, i32) {
    %c0_i32 = arith.constant 0 : i32
    %c0_i32_0 = arith.constant 0 : i32
    %c0_i32_1 = arith.constant 0 : i32
    return %c0_i32, %c0_i32_0 : i32, i32
  }
  func.func @transform_7(%arg0: i32) -> (i32, i32, i32) {
    %c0_i32 = arith.constant 0 : i32
    %c0_i32_0 = arith.constant 0 : i32
    %c0_i32_1 = arith.constant 0 : i32
    return %arg0, %c0_i32, %c0_i32_0 : i32, i32, i32
  }
  func.func @transform_8(%arg0: i32) -> (i32, i32, i32) {
    %c0_i32 = arith.constant 0 : i32
    %c0_i32_0 = arith.constant 0 : i32
    %c0_i32_1 = arith.constant 0 : i32
    return %arg0, %c0_i32, %c0_i32_0 : i32, i32, i32
  }
}

module attributes {stable_mosaic.version = 11 : i64} {
  func.func @_attn_qkv_kernel(%arg0: i32, %arg1: memref<1x32x64xf32, #tpu.memory_space<vmem>>, %arg2: memref<32x32xf32, #tpu.memory_space<vmem>>, %arg3: memref<32x1xf32, #tpu.memory_space<vmem>>, %arg4: memref<32x1xf32, #tpu.memory_space<vmem>>, %arg5: memref<32x96xf32, #tpu.memory_space<vmem>>, %arg6: memref<1x96xf32, #tpu.memory_space<vmem>>, %arg7: memref<1x64x96xbf16, #tpu.memory_space<vmem>>) attributes {dimension_semantics = [#tpu.dimension_semantics<parallel>], iteration_bounds = array<i64: 2>, scalar_prefetch = 0 : i64, scratch_operands = 0 : i64, tpu.core_type = #tpu.core_type<tc>, window_params = [{transform_indices = @transform_0, window_bounds = array<i64: 1, 32, 64>}, {pipeline_mode = #tpu.pipeline_mode<synchronous>, transform_indices = @transform_1, window_bounds = array<i64: 32, 32>}, {pipeline_mode = #tpu.pipeline_mode<synchronous>, transform_indices = @transform_2, window_bounds = array<i64: 32, 1>}, {pipeline_mode = #tpu.pipeline_mode<synchronous>, transform_indices = @transform_3, window_bounds = array<i64: 32, 1>}, {pipeline_mode = #tpu.pipeline_mode<synchronous>, transform_indices = @transform_4, window_bounds = array<i64: 32, 96>}, {pipeline_mode = #tpu.pipeline_mode<synchronous>, transform_indices = @transform_5, window_bounds = array<i64: 1, 96>}, {transform_indices = @transform_6, window_bounds = array<i64: 1, 64, 96>}]} {
    %c0 = arith.constant 0 : index
    %c0_0 = arith.constant 0 : index
    %c0_1 = arith.constant 0 : index
    %0 = vector.load %arg1[%c0, %c0_0, %c0_1] : memref<1x32x64xf32, #tpu.memory_space<vmem>>, vector<1x32x64xf32>
    %1 = vector.shape_cast %0 : vector<1x32x64xf32> to vector<32x64xf32>
    %c0_2 = arith.constant 0 : index
    %c0_3 = arith.constant 0 : index
    %2 = vector.load %arg2[%c0_2, %c0_3] : memref<32x32xf32, #tpu.memory_space<vmem>>, vector<32x32xf32>
    %c0_4 = arith.constant 0 : index
    %c0_5 = arith.constant 0 : index
    %3 = vector.load %arg3[%c0_4, %c0_5] : memref<32x1xf32, #tpu.memory_space<vmem>>, vector<32x1xf32>
    %c0_6 = arith.constant 0 : index
    %c0_7 = arith.constant 0 : index
    %4 = vector.load %arg4[%c0_6, %c0_7] : memref<32x1xf32, #tpu.memory_space<vmem>>, vector<32x1xf32>
    %cst = arith.constant dense<0.000000e+00> : vector<32x64xf32>
    %5 = tpu.matmul %2, %1, %cst {dimension_numbers = #tpu.dot_dimension_numbers<[1], [0], [0], [1], [0, 0, 1, 1], [], []>} : vector<32x32xf32>, vector<32x64xf32>, vector<32x64xf32> -> vector<32x64xf32>
    %cst_8 = arith.constant dense<0.000000e+00> : vector<32xf32>
    %6 = vector.multi_reduction <add>, %5, %cst_8 [1] : vector<32x64xf32> to vector<32xf32>
    %7 = vector.shape_cast %6 : vector<32xf32> to vector<32x1xf32>
    %cst_9 = arith.constant 1.562500e-02 : f32
    %8 = vector.broadcast %cst_9 : f32 to vector<32x1xf32>
    %9 = arith.mulf %7, %8 : vector<32x1xf32>
    %10 = vector.broadcast %9 : vector<32x1xf32> to vector<32x64xf32>
    %11 = arith.subf %1, %10 : vector<32x64xf32>
    %12 = arith.mulf %11, %11 : vector<32x64xf32>
    %cst_10 = arith.constant dense<0.000000e+00> : vector<32x64xf32>
    %13 = tpu.matmul %2, %12, %cst_10 {dimension_numbers = #tpu.dot_dimension_numbers<[1], [0], [0], [1], [0, 0, 1, 1], [], []>} : vector<32x32xf32>, vector<32x64xf32>, vector<32x64xf32> -> vector<32x64xf32>
    %cst_11 = arith.constant dense<0.000000e+00> : vector<32xf32>
    %14 = vector.multi_reduction <add>, %13, %cst_11 [1] : vector<32x64xf32> to vector<32xf32>
    %15 = vector.shape_cast %14 : vector<32xf32> to vector<32x1xf32>
    %cst_12 = arith.constant 1.562500e-02 : f32
    %16 = vector.broadcast %cst_12 : f32 to vector<32x1xf32>
    %17 = arith.mulf %15, %16 : vector<32x1xf32>
    %cst_13 = arith.constant 9.99999974E-6 : f32
    %18 = vector.broadcast %cst_13 : f32 to vector<32x1xf32>
    %19 = arith.addf %17, %18 : vector<32x1xf32>
    %20 = math.rsqrt %19 : vector<32x1xf32>
    %21 = vector.broadcast %20 : vector<32x1xf32> to vector<32x64xf32>
    %22 = arith.mulf %11, %21 : vector<32x64xf32>
    %23 = vector.broadcast %3 : vector<32x1xf32> to vector<32x64xf32>
    %24 = arith.mulf %22, %23 : vector<32x64xf32>
    %25 = vector.broadcast %4 : vector<32x1xf32> to vector<32x64xf32>
    %26 = arith.addf %24, %25 : vector<32x64xf32>
    %27 = arith.truncf %26 : vector<32x64xf32> to vector<32x64xbf16>
    %c0_14 = arith.constant 0 : index
    %c0_15 = arith.constant 0 : index
    %28 = vector.load %arg5[%c0_14, %c0_15] : memref<32x96xf32, #tpu.memory_space<vmem>>, vector<32x96xf32>
    %29 = arith.truncf %28 : vector<32x96xf32> to vector<32x96xbf16>
    %cst_16 = arith.constant dense<0.000000e+00> : vector<64x96xf32>
    %30 = tpu.matmul %27, %29, %cst_16 {dimension_numbers = #tpu.dot_dimension_numbers<[0], [0], [1], [1], [0, 1, 1, 1], [], []>} : vector<32x64xbf16>, vector<32x96xbf16>, vector<64x96xf32> -> vector<64x96xf32>
    %c0_17 = arith.constant 0 : index
    %c0_18 = arith.constant 0 : index
    %31 = vector.load %arg6[%c0_17, %c0_18] : memref<1x96xf32, #tpu.memory_space<vmem>>, vector<1x96xf32>
    %32 = vector.broadcast %31 : vector<1x96xf32> to vector<64x96xf32>
    %33 = arith.addf %30, %32 : vector<64x96xf32>
    %34 = arith.truncf %33 : vector<64x96xf32> to vector<64x96xbf16>
    %c0_19 = arith.constant 0 : index
    %c0_20 = arith.constant 0 : index
    %c0_21 = arith.constant 0 : index
    %35 = vector.load %arg7[%c0_19, %c0_20, %c0_21] : memref<1x64x96xbf16, #tpu.memory_space<vmem>>, vector<1x64x96xbf16>
    %36 = vector.shape_cast %35 : vector<1x64x96xbf16> to vector<64x96xbf16>
    %37 = vector.shape_cast %34 : vector<64x96xbf16> to vector<1x64x96xbf16>
    tpu.vector_store %arg7[%c0_19, %c0_20, %c0_21], %37 {strides = array<i32>} : memref<1x64x96xbf16, #tpu.memory_space<vmem>>, vector<1x64x96xbf16>,
    return
  }
  func.func @transform_0(%arg0: i32) -> (i32, i32, i32) {
    %c0_i32 = arith.constant 0 : i32
    %c0_i32_0 = arith.constant 0 : i32
    %c0_i32_1 = arith.constant 0 : i32
    return %arg0, %c0_i32, %c0_i32_0 : i32, i32, i32
  }
  func.func @transform_1(%arg0: i32) -> (i32, i32) {
    %c0_i32 = arith.constant 0 : i32
    %c0_i32_0 = arith.constant 0 : i32
    %c0_i32_1 = arith.constant 0 : i32
    return %c0_i32, %c0_i32_0 : i32, i32
  }
  func.func @transform_2(%arg0: i32) -> (i32, i32) {
    %c0_i32 = arith.constant 0 : i32
    %c0_i32_0 = arith.constant 0 : i32
    %c0_i32_1 = arith.constant 0 : i32
    return %c0_i32, %c0_i32_0 : i32, i32
  }
  func.func @transform_3(%arg0: i32) -> (i32, i32) {
    %c0_i32 = arith.constant 0 : i32
    %c0_i32_0 = arith.constant 0 : i32
    %c0_i32_1 = arith.constant 0 : i32
    return %c0_i32, %c0_i32_0 : i32, i32
  }
  func.func @transform_4(%arg0: i32) -> (i32, i32) {
    %c0_i32 = arith.constant 0 : i32
    %c0_i32_0 = arith.constant 0 : i32
    %c0_i32_1 = arith.constant 0 : i32
    return %c0_i32, %c0_i32_0 : i32, i32
  }
  func.func @transform_5(%arg0: i32) -> (i32, i32) {
    %c0_i32 = arith.constant 0 : i32
    %c0_i32_0 = arith.constant 0 : i32
    %c0_i32_1 = arith.constant 0 : i32
    return %c0_i32, %c0_i32_0 : i32, i32
  }
  func.func @transform_6(%arg0: i32) -> (i32, i32, i32) {
    %c0_i32 = arith.constant 0 : i32
    %c0_i32_0 = arith.constant 0 : i32
    %c0_i32_1 = arith.constant 0 : i32
    return %arg0, %c0_i32, %c0_i32_0 : i32, i32, i32
  }
}

module attributes {stable_mosaic.version = 11 : i64} {
  func.func @_gn_silu_conv_kernel(%arg0: i32, %arg1: memref<1x32x64xbf16, #tpu.memory_space<vmem>>, %arg2: memref<32x32xf32, #tpu.memory_space<vmem>>, %arg3: memref<32x1xf32, #tpu.memory_space<vmem>>, %arg4: memref<32x1xf32, #tpu.memory_space<vmem>>, %arg5: memref<9x32x32xf32, #tpu.memory_space<vmem>>, %arg6: memref<32x1xf32, #tpu.memory_space<vmem>>, %arg7: memref<3x64xf32, #tpu.memory_space<vmem>>, %arg8: memref<1x32x64xf32, #tpu.memory_space<vmem>>, %arg9: memref<1x32x64xf32, #tpu.memory_space<vmem>>) attributes {dimension_semantics = [#tpu.dimension_semantics<parallel>], iteration_bounds = array<i64: 2>, scalar_prefetch = 0 : i64, scratch_operands = 0 : i64, tpu.core_type = #tpu.core_type<tc>, window_params = [{transform_indices = @transform_0, window_bounds = array<i64: 1, 32, 64>}, {pipeline_mode = #tpu.pipeline_mode<synchronous>, transform_indices = @transform_1, window_bounds = array<i64: 32, 32>}, {pipeline_mode = #tpu.pipeline_mode<synchronous>, transform_indices = @transform_2, window_bounds = array<i64: 32, 1>}, {pipeline_mode = #tpu.pipeline_mode<synchronous>, transform_indices = @transform_3, window_bounds = array<i64: 32, 1>}, {pipeline_mode = #tpu.pipeline_mode<synchronous>, transform_indices = @transform_4, window_bounds = array<i64: 9, 32, 32>}, {pipeline_mode = #tpu.pipeline_mode<synchronous>, transform_indices = @transform_5, window_bounds = array<i64: 32, 1>}, {pipeline_mode = #tpu.pipeline_mode<synchronous>, transform_indices = @transform_6, window_bounds = array<i64: 3, 64>}, {transform_indices = @transform_7, window_bounds = array<i64: 1, 32, 64>}, {transform_indices = @transform_8, window_bounds = array<i64: 1, 32, 64>}]} {
    %c0 = arith.constant 0 : index
    %c0_0 = arith.constant 0 : index
    %c0_1 = arith.constant 0 : index
    %0 = vector.load %arg1[%c0, %c0_0, %c0_1] : memref<1x32x64xbf16, #tpu.memory_space<vmem>>, vector<1x32x64xbf16>
    %1 = vector.shape_cast %0 : vector<1x32x64xbf16> to vector<32x64xbf16>
    %2 = arith.extf %1 : vector<32x64xbf16> to vector<32x64xf32>
    %c0_2 = arith.constant 0 : index
    %c0_3 = arith.constant 0 : index
    %3 = vector.load %arg2[%c0_2, %c0_3] : memref<32x32xf32, #tpu.memory_space<vmem>>, vector<32x32xf32>
    %c0_4 = arith.constant 0 : index
    %c0_5 = arith.constant 0 : index
    %4 = vector.load %arg3[%c0_4, %c0_5] : memref<32x1xf32, #tpu.memory_space<vmem>>, vector<32x1xf32>
    %c0_6 = arith.constant 0 : index
    %c0_7 = arith.constant 0 : index
    %5 = vector.load %arg4[%c0_6, %c0_7] : memref<32x1xf32, #tpu.memory_space<vmem>>, vector<32x1xf32>
    %cst = arith.constant dense<0.000000e+00> : vector<32x64xf32>
    %6 = tpu.matmul %3, %2, %cst {dimension_numbers = #tpu.dot_dimension_numbers<[1], [0], [0], [1], [0, 0, 1, 1], [], []>} : vector<32x32xf32>, vector<32x64xf32>, vector<32x64xf32> -> vector<32x64xf32>
    %cst_8 = arith.constant dense<0.000000e+00> : vector<32xf32>
    %7 = vector.multi_reduction <add>, %6, %cst_8 [1] : vector<32x64xf32> to vector<32xf32>
    %8 = vector.shape_cast %7 : vector<32xf32> to vector<32x1xf32>
    %cst_9 = arith.constant 3.906250e-03 : f32
    %9 = vector.broadcast %cst_9 : f32 to vector<32x1xf32>
    %10 = arith.mulf %8, %9 : vector<32x1xf32>
    %11 = vector.broadcast %10 : vector<32x1xf32> to vector<32x64xf32>
    %12 = arith.subf %2, %11 : vector<32x64xf32>
    %13 = arith.mulf %12, %12 : vector<32x64xf32>
    %cst_10 = arith.constant dense<0.000000e+00> : vector<32x64xf32>
    %14 = tpu.matmul %3, %13, %cst_10 {dimension_numbers = #tpu.dot_dimension_numbers<[1], [0], [0], [1], [0, 0, 1, 1], [], []>} : vector<32x32xf32>, vector<32x64xf32>, vector<32x64xf32> -> vector<32x64xf32>
    %cst_11 = arith.constant dense<0.000000e+00> : vector<32xf32>
    %15 = vector.multi_reduction <add>, %14, %cst_11 [1] : vector<32x64xf32> to vector<32xf32>
    %16 = vector.shape_cast %15 : vector<32xf32> to vector<32x1xf32>
    %cst_12 = arith.constant 3.906250e-03 : f32
    %17 = vector.broadcast %cst_12 : f32 to vector<32x1xf32>
    %18 = arith.mulf %16, %17 : vector<32x1xf32>
    %cst_13 = arith.constant 9.99999974E-6 : f32
    %19 = vector.broadcast %cst_13 : f32 to vector<32x1xf32>
    %20 = arith.addf %18, %19 : vector<32x1xf32>
    %21 = math.rsqrt %20 : vector<32x1xf32>
    %22 = vector.broadcast %21 : vector<32x1xf32> to vector<32x64xf32>
    %23 = arith.mulf %12, %22 : vector<32x64xf32>
    %24 = vector.broadcast %4 : vector<32x1xf32> to vector<32x64xf32>
    %25 = arith.mulf %23, %24 : vector<32x64xf32>
    %26 = vector.broadcast %5 : vector<32x1xf32> to vector<32x64xf32>
    %27 = arith.addf %25, %26 : vector<32x64xf32>
    %28 = arith.negf %27 : vector<32x64xf32>
    %29 = math.exp %28 : vector<32x64xf32>
    %cst_14 = arith.constant 1.000000e+00 : f32
    %30 = vector.broadcast %cst_14 : f32 to vector<32x64xf32>
    %31 = arith.addf %30, %29 : vector<32x64xf32>
    %32 = arith.divf %30, %31 : vector<32x64xf32>
    %33 = arith.mulf %27, %32 : vector<32x64xf32>
    %34 = arith.truncf %33 : vector<32x64xf32> to vector<32x64xbf16>
    %35 = tpu.iota {dimensions = array<i32: 0>} : vector<64x64xi32>
    %36 = tpu.iota {dimensions = array<i32: 1>} : vector<64x64xi32>
    %37 = arith.subi %35, %36 : vector<64x64xi32>
    %c0_15 = arith.constant 0 : index
    %c0_16 = arith.constant 0 : index
    %38 = vector.load %arg7[%c0_15, %c0_16] : memref<3x64xf32, #tpu.memory_space<vmem>>, vector<3x64xf32>
    %cst_17 = arith.constant 0.000000e+00 : f32
    %39 = vector.broadcast %cst_17 : f32 to vector<32x64xf32>
    %c-9_i32 = arith.constant -9 : i32
    %40 = vector.broadcast %c-9_i32 : i32 to vector<64x64xi32>
    %41 = arith.cmpi eq, %37, %40 : vector<64x64xi32>
    %42 = vector.extract_strided_slice %38 {offsets = [0, 0], sizes = [1, 64], strides = [1, 1]} : vector<3x64xf32> to vector<1x64xf32>
    %cst_18 = arith.constant 0.000000e+00 : f32
    %43 = vector.shape_cast %42 : vector<1x64xf32> to vector<1x64xf32>
    %44 = vector.broadcast %43 : vector<1x64xf32> to vector<64x64xf32>
    %45 = vector.broadcast %cst_18 : f32 to vector<64x64xf32>
    %46 = arith.select %41, %44, %45 : vector<64x64xi1>, vector<64x64xf32>
    %47 = arith.truncf %46 : vector<64x64xf32> to vector<64x64xbf16>
    %cst_19 = arith.constant dense<0.000000e+00> : vector<32x64xf32>
    %48 = tpu.matmul %34, %47, %cst_19 {dimension_numbers = #tpu.dot_dimension_numbers<[1], [0], [0], [1], [0, 0, 1, 1], [], []>} : vector<32x64xbf16>, vector<64x64xbf16>, vector<32x64xf32> -> vector<32x64xf32>
    %c0_20 = arith.constant 0 : index
    %c0_21 = arith.constant 0 : index
    %c0_22 = arith.constant 0 : index
    %49 = vector.load %arg5[%c0_20, %c0_21, %c0_22] : memref<9x32x32xf32, #tpu.memory_space<vmem>>, vector<1x32x32xf32>
    %50 = vector.shape_cast %49 : vector<1x32x32xf32> to vector<32x32xf32>
    %51 = arith.truncf %50 : vector<32x32xf32> to vector<32x32xbf16>
    %52 = arith.truncf %48 : vector<32x64xf32> to vector<32x64xbf16>
    %cst_23 = arith.constant dense<0.000000e+00> : vector<32x64xf32>
    %53 = tpu.matmul %51, %52, %cst_23 {dimension_numbers = #tpu.dot_dimension_numbers<[1], [0], [0], [1], [0, 0, 1, 1], [], []>} : vector<32x32xbf16>, vector<32x64xbf16>, vector<32x64xf32> -> vector<32x64xf32>
    %54 = arith.addf %39, %53 : vector<32x64xf32>
    %c-8_i32 = arith.constant -8 : i32
    %55 = vector.broadcast %c-8_i32 : i32 to vector<64x64xi32>
    %56 = arith.cmpi eq, %37, %55 : vector<64x64xi32>
    %57 = vector.extract_strided_slice %38 {offsets = [1, 0], sizes = [1, 64], strides = [1, 1]} : vector<3x64xf32> to vector<1x64xf32>
    %cst_24 = arith.constant 0.000000e+00 : f32
    %58 = vector.shape_cast %57 : vector<1x64xf32> to vector<1x64xf32>
    %59 = vector.broadcast %58 : vector<1x64xf32> to vector<64x64xf32>
    %60 = vector.broadcast %cst_24 : f32 to vector<64x64xf32>
    %61 = arith.select %56, %59, %60 : vector<64x64xi1>, vector<64x64xf32>
    %62 = arith.truncf %61 : vector<64x64xf32> to vector<64x64xbf16>
    %cst_25 = arith.constant dense<0.000000e+00> : vector<32x64xf32>
    %63 = tpu.matmul %34, %62, %cst_25 {dimension_numbers = #tpu.dot_dimension_numbers<[1], [0], [0], [1], [0, 0, 1, 1], [], []>} : vector<32x64xbf16>, vector<64x64xbf16>, vector<32x64xf32> -> vector<32x64xf32>
    %c1 = arith.constant 1 : index
    %c0_26 = arith.constant 0 : index
    %c0_27 = arith.constant 0 : index
    %64 = vector.load %arg5[%c1, %c0_26, %c0_27] : memref<9x32x32xf32, #tpu.memory_space<vmem>>, vector<1x32x32xf32>
    %65 = vector.shape_cast %64 : vector<1x32x32xf32> to vector<32x32xf32>
    %66 = arith.truncf %65 : vector<32x32xf32> to vector<32x32xbf16>
    %67 = arith.truncf %63 : vector<32x64xf32> to vector<32x64xbf16>
    %cst_28 = arith.constant dense<0.000000e+00> : vector<32x64xf32>
    %68 = tpu.matmul %66, %67, %cst_28 {dimension_numbers = #tpu.dot_dimension_numbers<[1], [0], [0], [1], [0, 0, 1, 1], [], []>} : vector<32x32xbf16>, vector<32x64xbf16>, vector<32x64xf32> -> vector<32x64xf32>
    %69 = arith.addf %54, %68 : vector<32x64xf32>
    %c-7_i32 = arith.constant -7 : i32
    %70 = vector.broadcast %c-7_i32 : i32 to vector<64x64xi32>
    %71 = arith.cmpi eq, %37, %70 : vector<64x64xi32>
    %72 = vector.extract_strided_slice %38 {offsets = [2, 0], sizes = [1, 64], strides = [1, 1]} : vector<3x64xf32> to vector<1x64xf32>
    %cst_29 = arith.constant 0.000000e+00 : f32
    %73 = vector.shape_cast %72 : vector<1x64xf32> to vector<1x64xf32>
    %74 = vector.broadcast %73 : vector<1x64xf32> to vector<64x64xf32>
    %75 = vector.broadcast %cst_29 : f32 to vector<64x64xf32>
    %76 = arith.select %71, %74, %75 : vector<64x64xi1>, vector<64x64xf32>
    %77 = arith.truncf %76 : vector<64x64xf32> to vector<64x64xbf16>
    %cst_30 = arith.constant dense<0.000000e+00> : vector<32x64xf32>
    %78 = tpu.matmul %34, %77, %cst_30 {dimension_numbers = #tpu.dot_dimension_numbers<[1], [0], [0], [1], [0, 0, 1, 1], [], []>} : vector<32x64xbf16>, vector<64x64xbf16>, vector<32x64xf32> -> vector<32x64xf32>
    %c2 = arith.constant 2 : index
    %c0_31 = arith.constant 0 : index
    %c0_32 = arith.constant 0 : index
    %79 = vector.load %arg5[%c2, %c0_31, %c0_32] : memref<9x32x32xf32, #tpu.memory_space<vmem>>, vector<1x32x32xf32>
    %80 = vector.shape_cast %79 : vector<1x32x32xf32> to vector<32x32xf32>
    %81 = arith.truncf %80 : vector<32x32xf32> to vector<32x32xbf16>
    %82 = arith.truncf %78 : vector<32x64xf32> to vector<32x64xbf16>
    %cst_33 = arith.constant dense<0.000000e+00> : vector<32x64xf32>
    %83 = tpu.matmul %81, %82, %cst_33 {dimension_numbers = #tpu.dot_dimension_numbers<[1], [0], [0], [1], [0, 0, 1, 1], [], []>} : vector<32x32xbf16>, vector<32x64xbf16>, vector<32x64xf32> -> vector<32x64xf32>
    %84 = arith.addf %69, %83 : vector<32x64xf32>
    %c-1_i32 = arith.constant -1 : i32
    %85 = vector.broadcast %c-1_i32 : i32 to vector<64x64xi32>
    %86 = arith.cmpi eq, %37, %85 : vector<64x64xi32>
    %87 = vector.extract_strided_slice %38 {offsets = [0, 0], sizes = [1, 64], strides = [1, 1]} : vector<3x64xf32> to vector<1x64xf32>
    %cst_34 = arith.constant 0.000000e+00 : f32
    %88 = vector.shape_cast %87 : vector<1x64xf32> to vector<1x64xf32>
    %89 = vector.broadcast %88 : vector<1x64xf32> to vector<64x64xf32>
    %90 = vector.broadcast %cst_34 : f32 to vector<64x64xf32>
    %91 = arith.select %86, %89, %90 : vector<64x64xi1>, vector<64x64xf32>
    %92 = arith.truncf %91 : vector<64x64xf32> to vector<64x64xbf16>
    %cst_35 = arith.constant dense<0.000000e+00> : vector<32x64xf32>
    %93 = tpu.matmul %34, %92, %cst_35 {dimension_numbers = #tpu.dot_dimension_numbers<[1], [0], [0], [1], [0, 0, 1, 1], [], []>} : vector<32x64xbf16>, vector<64x64xbf16>, vector<32x64xf32> -> vector<32x64xf32>
    %c3 = arith.constant 3 : index
    %c0_36 = arith.constant 0 : index
    %c0_37 = arith.constant 0 : index
    %94 = vector.load %arg5[%c3, %c0_36, %c0_37] : memref<9x32x32xf32, #tpu.memory_space<vmem>>, vector<1x32x32xf32>
    %95 = vector.shape_cast %94 : vector<1x32x32xf32> to vector<32x32xf32>
    %96 = arith.truncf %95 : vector<32x32xf32> to vector<32x32xbf16>
    %97 = arith.truncf %93 : vector<32x64xf32> to vector<32x64xbf16>
    %cst_38 = arith.constant dense<0.000000e+00> : vector<32x64xf32>
    %98 = tpu.matmul %96, %97, %cst_38 {dimension_numbers = #tpu.dot_dimension_numbers<[1], [0], [0], [1], [0, 0, 1, 1], [], []>} : vector<32x32xbf16>, vector<32x64xbf16>, vector<32x64xf32> -> vector<32x64xf32>
    %99 = arith.addf %84, %98 : vector<32x64xf32>
    %c0_i32 = arith.constant 0 : i32
    %100 = vector.broadcast %c0_i32 : i32 to vector<64x64xi32>
    %101 = arith.cmpi eq, %37, %100 : vector<64x64xi32>
    %102 = vector.extract_strided_slice %38 {offsets = [1, 0], sizes = [1, 64], strides = [1, 1]} : vector<3x64xf32> to vector<1x64xf32>
    %cst_39 = arith.constant 0.000000e+00 : f32
    %103 = vector.shape_cast %102 : vector<1x64xf32> to vector<1x64xf32>
    %104 = vector.broadcast %103 : vector<1x64xf32> to vector<64x64xf32>
    %105 = vector.broadcast %cst_39 : f32 to vector<64x64xf32>
    %106 = arith.select %101, %104, %105 : vector<64x64xi1>, vector<64x64xf32>
    %107 = arith.truncf %106 : vector<64x64xf32> to vector<64x64xbf16>
    %cst_40 = arith.constant dense<0.000000e+00> : vector<32x64xf32>
    %108 = tpu.matmul %34, %107, %cst_40 {dimension_numbers = #tpu.dot_dimension_numbers<[1], [0], [0], [1], [0, 0, 1, 1], [], []>} : vector<32x64xbf16>, vector<64x64xbf16>, vector<32x64xf32> -> vector<32x64xf32>
    %c4 = arith.constant 4 : index
    %c0_41 = arith.constant 0 : index
    %c0_42 = arith.constant 0 : index
    %109 = vector.load %arg5[%c4, %c0_41, %c0_42] : memref<9x32x32xf32, #tpu.memory_space<vmem>>, vector<1x32x32xf32>
    %110 = vector.shape_cast %109 : vector<1x32x32xf32> to vector<32x32xf32>
    %111 = arith.truncf %110 : vector<32x32xf32> to vector<32x32xbf16>
    %112 = arith.truncf %108 : vector<32x64xf32> to vector<32x64xbf16>
    %cst_43 = arith.constant dense<0.000000e+00> : vector<32x64xf32>
    %113 = tpu.matmul %111, %112, %cst_43 {dimension_numbers = #tpu.dot_dimension_numbers<[1], [0], [0], [1], [0, 0, 1, 1], [], []>} : vector<32x32xbf16>, vector<32x64xbf16>, vector<32x64xf32> -> vector<32x64xf32>
    %114 = arith.addf %99, %113 : vector<32x64xf32>
    %c1_i32 = arith.constant 1 : i32
    %115 = vector.broadcast %c1_i32 : i32 to vector<64x64xi32>
    %116 = arith.cmpi eq, %37, %115 : vector<64x64xi32>
    %117 = vector.extract_strided_slice %38 {offsets = [2, 0], sizes = [1, 64], strides = [1, 1]} : vector<3x64xf32> to vector<1x64xf32>
    %cst_44 = arith.constant 0.000000e+00 : f32
    %118 = vector.shape_cast %117 : vector<1x64xf32> to vector<1x64xf32>
    %119 = vector.broadcast %118 : vector<1x64xf32> to vector<64x64xf32>
    %120 = vector.broadcast %cst_44 : f32 to vector<64x64xf32>
    %121 = arith.select %116, %119, %120 : vector<64x64xi1>, vector<64x64xf32>
    %122 = arith.truncf %121 : vector<64x64xf32> to vector<64x64xbf16>
    %cst_45 = arith.constant dense<0.000000e+00> : vector<32x64xf32>
    %123 = tpu.matmul %34, %122, %cst_45 {dimension_numbers = #tpu.dot_dimension_numbers<[1], [0], [0], [1], [0, 0, 1, 1], [], []>} : vector<32x64xbf16>, vector<64x64xbf16>, vector<32x64xf32> -> vector<32x64xf32>
    %c5 = arith.constant 5 : index
    %c0_46 = arith.constant 0 : index
    %c0_47 = arith.constant 0 : index
    %124 = vector.load %arg5[%c5, %c0_46, %c0_47] : memref<9x32x32xf32, #tpu.memory_space<vmem>>, vector<1x32x32xf32>
    %125 = vector.shape_cast %124 : vector<1x32x32xf32> to vector<32x32xf32>
    %126 = arith.truncf %125 : vector<32x32xf32> to vector<32x32xbf16>
    %127 = arith.truncf %123 : vector<32x64xf32> to vector<32x64xbf16>
    %cst_48 = arith.constant dense<0.000000e+00> : vector<32x64xf32>
    %128 = tpu.matmul %126, %127, %cst_48 {dimension_numbers = #tpu.dot_dimension_numbers<[1], [0], [0], [1], [0, 0, 1, 1], [], []>} : vector<32x32xbf16>, vector<32x64xbf16>, vector<32x64xf32> -> vector<32x64xf32>
    %129 = arith.addf %114, %128 : vector<32x64xf32>
    %c7_i32 = arith.constant 7 : i32
    %130 = vector.broadcast %c7_i32 : i32 to vector<64x64xi32>
    %131 = arith.cmpi eq, %37, %130 : vector<64x64xi32>
    %132 = vector.extract_strided_slice %38 {offsets = [0, 0], sizes = [1, 64], strides = [1, 1]} : vector<3x64xf32> to vector<1x64xf32>
    %cst_49 = arith.constant 0.000000e+00 : f32
    %133 = vector.shape_cast %132 : vector<1x64xf32> to vector<1x64xf32>
    %134 = vector.broadcast %133 : vector<1x64xf32> to vector<64x64xf32>
    %135 = vector.broadcast %cst_49 : f32 to vector<64x64xf32>
    %136 = arith.select %131, %134, %135 : vector<64x64xi1>, vector<64x64xf32>
    %137 = arith.truncf %136 : vector<64x64xf32> to vector<64x64xbf16>
    %cst_50 = arith.constant dense<0.000000e+00> : vector<32x64xf32>
    %138 = tpu.matmul %34, %137, %cst_50 {dimension_numbers = #tpu.dot_dimension_numbers<[1], [0], [0], [1], [0, 0, 1, 1], [], []>} : vector<32x64xbf16>, vector<64x64xbf16>, vector<32x64xf32> -> vector<32x64xf32>
    %c6 = arith.constant 6 : index
    %c0_51 = arith.constant 0 : index
    %c0_52 = arith.constant 0 : index
    %139 = vector.load %arg5[%c6, %c0_51, %c0_52] : memref<9x32x32xf32, #tpu.memory_space<vmem>>, vector<1x32x32xf32>
    %140 = vector.shape_cast %139 : vector<1x32x32xf32> to vector<32x32xf32>
    %141 = arith.truncf %140 : vector<32x32xf32> to vector<32x32xbf16>
    %142 = arith.truncf %138 : vector<32x64xf32> to vector<32x64xbf16>
    %cst_53 = arith.constant dense<0.000000e+00> : vector<32x64xf32>
    %143 = tpu.matmul %141, %142, %cst_53 {dimension_numbers = #tpu.dot_dimension_numbers<[1], [0], [0], [1], [0, 0, 1, 1], [], []>} : vector<32x32xbf16>, vector<32x64xbf16>, vector<32x64xf32> -> vector<32x64xf32>
    %144 = arith.addf %129, %143 : vector<32x64xf32>
    %c8_i32 = arith.constant 8 : i32
    %145 = vector.broadcast %c8_i32 : i32 to vector<64x64xi32>
    %146 = arith.cmpi eq, %37, %145 : vector<64x64xi32>
    %147 = vector.extract_strided_slice %38 {offsets = [1, 0], sizes = [1, 64], strides = [1, 1]} : vector<3x64xf32> to vector<1x64xf32>
    %cst_54 = arith.constant 0.000000e+00 : f32
    %148 = vector.shape_cast %147 : vector<1x64xf32> to vector<1x64xf32>
    %149 = vector.broadcast %148 : vector<1x64xf32> to vector<64x64xf32>
    %150 = vector.broadcast %cst_54 : f32 to vector<64x64xf32>
    %151 = arith.select %146, %149, %150 : vector<64x64xi1>, vector<64x64xf32>
    %152 = arith.truncf %151 : vector<64x64xf32> to vector<64x64xbf16>
    %cst_55 = arith.constant dense<0.000000e+00> : vector<32x64xf32>
    %153 = tpu.matmul %34, %152, %cst_55 {dimension_numbers = #tpu.dot_dimension_numbers<[1], [0], [0], [1], [0, 0, 1, 1], [], []>} : vector<32x64xbf16>, vector<64x64xbf16>, vector<32x64xf32> -> vector<32x64xf32>
    %c7 = arith.constant 7 : index
    %c0_56 = arith.constant 0 : index
    %c0_57 = arith.constant 0 : index
    %154 = vector.load %arg5[%c7, %c0_56, %c0_57] : memref<9x32x32xf32, #tpu.memory_space<vmem>>, vector<1x32x32xf32>
    %155 = vector.shape_cast %154 : vector<1x32x32xf32> to vector<32x32xf32>
    %156 = arith.truncf %155 : vector<32x32xf32> to vector<32x32xbf16>
    %157 = arith.truncf %153 : vector<32x64xf32> to vector<32x64xbf16>
    %cst_58 = arith.constant dense<0.000000e+00> : vector<32x64xf32>
    %158 = tpu.matmul %156, %157, %cst_58 {dimension_numbers = #tpu.dot_dimension_numbers<[1], [0], [0], [1], [0, 0, 1, 1], [], []>} : vector<32x32xbf16>, vector<32x64xbf16>, vector<32x64xf32> -> vector<32x64xf32>
    %159 = arith.addf %144, %158 : vector<32x64xf32>
    %c9_i32 = arith.constant 9 : i32
    %160 = vector.broadcast %c9_i32 : i32 to vector<64x64xi32>
    %161 = arith.cmpi eq, %37, %160 : vector<64x64xi32>
    %162 = vector.extract_strided_slice %38 {offsets = [2, 0], sizes = [1, 64], strides = [1, 1]} : vector<3x64xf32> to vector<1x64xf32>
    %cst_59 = arith.constant 0.000000e+00 : f32
    %163 = vector.shape_cast %162 : vector<1x64xf32> to vector<1x64xf32>
    %164 = vector.broadcast %163 : vector<1x64xf32> to vector<64x64xf32>
    %165 = vector.broadcast %cst_59 : f32 to vector<64x64xf32>
    %166 = arith.select %161, %164, %165 : vector<64x64xi1>, vector<64x64xf32>
    %167 = arith.truncf %166 : vector<64x64xf32> to vector<64x64xbf16>
    %cst_60 = arith.constant dense<0.000000e+00> : vector<32x64xf32>
    %168 = tpu.matmul %34, %167, %cst_60 {dimension_numbers = #tpu.dot_dimension_numbers<[1], [0], [0], [1], [0, 0, 1, 1], [], []>} : vector<32x64xbf16>, vector<64x64xbf16>, vector<32x64xf32> -> vector<32x64xf32>
    %c8 = arith.constant 8 : index
    %c0_61 = arith.constant 0 : index
    %c0_62 = arith.constant 0 : index
    %169 = vector.load %arg5[%c8, %c0_61, %c0_62] : memref<9x32x32xf32, #tpu.memory_space<vmem>>, vector<1x32x32xf32>
    %170 = vector.shape_cast %169 : vector<1x32x32xf32> to vector<32x32xf32>
    %171 = arith.truncf %170 : vector<32x32xf32> to vector<32x32xbf16>
    %172 = arith.truncf %168 : vector<32x64xf32> to vector<32x64xbf16>
    %cst_63 = arith.constant dense<0.000000e+00> : vector<32x64xf32>
    %173 = tpu.matmul %171, %172, %cst_63 {dimension_numbers = #tpu.dot_dimension_numbers<[1], [0], [0], [1], [0, 0, 1, 1], [], []>} : vector<32x32xbf16>, vector<32x64xbf16>, vector<32x64xf32> -> vector<32x64xf32>
    %174 = arith.addf %159, %173 : vector<32x64xf32>
    %c0_64 = arith.constant 0 : index
    %c0_65 = arith.constant 0 : index
    %175 = vector.load %arg6[%c0_64, %c0_65] : memref<32x1xf32, #tpu.memory_space<vmem>>, vector<32x1xf32>
    %176 = vector.broadcast %175 : vector<32x1xf32> to vector<32x64xf32>
    %177 = arith.addf %174, %176 : vector<32x64xf32>
    %c0_66 = arith.constant 0 : index
    %c0_67 = arith.constant 0 : index
    %c0_68 = arith.constant 0 : index
    %178 = vector.load %arg8[%c0_66, %c0_67, %c0_68] : memref<1x32x64xf32, #tpu.memory_space<vmem>>, vector<1x32x64xf32>
    %179 = vector.shape_cast %178 : vector<1x32x64xf32> to vector<32x64xf32>
    %180 = arith.addf %177, %179 : vector<32x64xf32>
    %c0_69 = arith.constant 0 : index
    %c0_70 = arith.constant 0 : index
    %c0_71 = arith.constant 0 : index
    %181 = vector.load %arg9[%c0_69, %c0_70, %c0_71] : memref<1x32x64xf32, #tpu.memory_space<vmem>>, vector<1x32x64xf32>
    %182 = vector.shape_cast %181 : vector<1x32x64xf32> to vector<32x64xf32>
    %183 = vector.shape_cast %180 : vector<32x64xf32> to vector<1x32x64xf32>
    tpu.vector_store %arg9[%c0_69, %c0_70, %c0_71], %183 {strides = array<i32>} : memref<1x32x64xf32, #tpu.memory_space<vmem>>, vector<1x32x64xf32>,
    return
  }
  func.func @transform_0(%arg0: i32) -> (i32, i32, i32) {
    %c0_i32 = arith.constant 0 : i32
    %c0_i32_0 = arith.constant 0 : i32
    %c0_i32_1 = arith.constant 0 : i32
    return %arg0, %c0_i32, %c0_i32_0 : i32, i32, i32
  }
  func.func @transform_1(%arg0: i32) -> (i32, i32) {
    %c0_i32 = arith.constant 0 : i32
    %c0_i32_0 = arith.constant 0 : i32
    %c0_i32_1 = arith.constant 0 : i32
    return %c0_i32, %c0_i32_0 : i32, i32
  }
  func.func @transform_2(%arg0: i32) -> (i32, i32) {
    %c0_i32 = arith.constant 0 : i32
    %c0_i32_0 = arith.constant 0 : i32
    %c0_i32_1 = arith.constant 0 : i32
    return %c0_i32, %c0_i32_0 : i32, i32
  }
  func.func @transform_3(%arg0: i32) -> (i32, i32) {
    %c0_i32 = arith.constant 0 : i32
    %c0_i32_0 = arith.constant 0 : i32
    %c0_i32_1 = arith.constant 0 : i32
    return %c0_i32, %c0_i32_0 : i32, i32
  }
  func.func @transform_4(%arg0: i32) -> (i32, i32, i32) {
    %c0_i32 = arith.constant 0 : i32
    %c0_i32_0 = arith.constant 0 : i32
    %c0_i32_1 = arith.constant 0 : i32
    %c0_i32_2 = arith.constant 0 : i32
    return %c0_i32, %c0_i32_0, %c0_i32_1 : i32, i32, i32
  }
  func.func @transform_5(%arg0: i32) -> (i32, i32) {
    %c0_i32 = arith.constant 0 : i32
    %c0_i32_0 = arith.constant 0 : i32
    %c0_i32_1 = arith.constant 0 : i32
    return %c0_i32, %c0_i32_0 : i32, i32
  }
  func.func @transform_6(%arg0: i32) -> (i32, i32) {
    %c0_i32 = arith.constant 0 : i32
    %c0_i32_0 = arith.constant 0 : i32
    %c0_i32_1 = arith.constant 0 : i32
    return %c0_i32, %c0_i32_0 : i32, i32
  }
  func.func @transform_7(%arg0: i32) -> (i32, i32, i32) {
    %c0_i32 = arith.constant 0 : i32
    %c0_i32_0 = arith.constant 0 : i32
    %c0_i32_1 = arith.constant 0 : i32
    return %arg0, %c0_i32, %c0_i32_0 : i32, i32, i32
  }
  func.func @transform_8(%arg0: i32) -> (i32, i32, i32) {
    %c0_i32 = arith.constant 0 : i32
    %c0_i32_0 = arith.constant 0 : i32
    %c0_i32_1 = arith.constant 0 : i32
    return %arg0, %c0_i32, %c0_i32_0 : i32, i32, i32
  }
}

module attributes {stable_mosaic.version = 11 : i64} {
  func.func @_attn_core_kernel(%arg0: i32, %arg1: memref<1x32x64xbf16, #tpu.memory_space<vmem>>, %arg2: memref<1x32x64xbf16, #tpu.memory_space<vmem>>, %arg3: memref<1x32x64xbf16, #tpu.memory_space<vmem>>, %arg4: memref<32x32xf32, #tpu.memory_space<vmem>>, %arg5: memref<1x32xf32, #tpu.memory_space<vmem>>, %arg6: memref<1x64x32xf32, #tpu.memory_space<vmem>>) attributes {dimension_semantics = [#tpu.dimension_semantics<parallel>], iteration_bounds = array<i64: 2>, scalar_prefetch = 0 : i64, scratch_operands = 0 : i64, tpu.core_type = #tpu.core_type<tc>, window_params = [{transform_indices = @transform_0, window_bounds = array<i64: 1, 32, 64>}, {transform_indices = @transform_1, window_bounds = array<i64: 1, 32, 64>}, {transform_indices = @transform_2, window_bounds = array<i64: 1, 32, 64>}, {pipeline_mode = #tpu.pipeline_mode<synchronous>, transform_indices = @transform_3, window_bounds = array<i64: 32, 32>}, {pipeline_mode = #tpu.pipeline_mode<synchronous>, transform_indices = @transform_4, window_bounds = array<i64: 1, 32>}, {transform_indices = @transform_5, window_bounds = array<i64: 1, 64, 32>}]} {
    %c0 = arith.constant 0 : index
    %c0_0 = arith.constant 0 : index
    %c0_1 = arith.constant 0 : index
    %0 = vector.load %arg1[%c0, %c0_0, %c0_1] : memref<1x32x64xbf16, #tpu.memory_space<vmem>>, vector<1x32x64xbf16>
    %1 = vector.shape_cast %0 : vector<1x32x64xbf16> to vector<32x64xbf16>
    %c0_2 = arith.constant 0 : index
    %c0_3 = arith.constant 0 : index
    %c0_4 = arith.constant 0 : index
    %2 = vector.load %arg2[%c0_2, %c0_3, %c0_4] : memref<1x32x64xbf16, #tpu.memory_space<vmem>>, vector<1x32x64xbf16>
    %3 = vector.shape_cast %2 : vector<1x32x64xbf16> to vector<32x64xbf16>
    %c0_5 = arith.constant 0 : index
    %c0_6 = arith.constant 0 : index
    %c0_7 = arith.constant 0 : index
    %4 = vector.load %arg3[%c0_5, %c0_6, %c0_7] : memref<1x32x64xbf16, #tpu.memory_space<vmem>>, vector<1x32x64xbf16>
    %5 = vector.shape_cast %4 : vector<1x32x64xbf16> to vector<32x64xbf16>
    %cst = arith.constant dense<0.000000e+00> : vector<32x32xf32>
    %6 = tpu.matmul %1, %3, %cst {dimension_numbers = #tpu.dot_dimension_numbers<[1], [1], [0], [0], [0, 0, 1, 0], [], []>} : vector<32x64xbf16>, vector<32x64xbf16>, vector<32x32xf32> -> vector<32x32xf32>
    %cst_8 = arith.constant 0.176776692 : f32
    %7 = vector.broadcast %cst_8 : f32 to vector<32x32xf32>
    %8 = arith.mulf %7, %6 : vector<32x32xf32>
    %cst_9 = arith.constant dense<0xFF800000> : vector<32xf32>
    %9 = vector.multi_reduction <maximumf>, %8, %cst_9 [1] : vector<32x32xf32> to vector<32xf32>
    %10 = vector.shape_cast %9 : vector<32xf32> to vector<32x1xf32>
    %11 = vector.broadcast %10 : vector<32x1xf32> to vector<32x32xf32>
    %12 = arith.subf %8, %11 : vector<32x32xf32>
    %13 = math.exp %12 : vector<32x32xf32>
    %cst_10 = arith.constant dense<0.000000e+00> : vector<32xf32>
    %14 = vector.multi_reduction <add>, %13, %cst_10 [1] : vector<32x32xf32> to vector<32xf32>
    %15 = vector.shape_cast %14 : vector<32xf32> to vector<32x1xf32>
    %16 = tpu.reciprocal %15 {approx = true} : vector<32x1xf32> -> vector<32x1xf32>
    %17 = vector.broadcast %16 : vector<32x1xf32> to vector<32x32xf32>
    %18 = arith.mulf %13, %17 : vector<32x32xf32>
    %19 = arith.truncf %18 : vector<32x32xf32> to vector<32x32xbf16>
    %cst_11 = arith.constant dense<0.000000e+00> : vector<32x64xf32>
    %20 = tpu.matmul %19, %5, %cst_11 {dimension_numbers = #tpu.dot_dimension_numbers<[1], [0], [0], [1], [0, 0, 1, 1], [], []>} : vector<32x32xbf16>, vector<32x64xbf16>, vector<32x64xf32> -> vector<32x64xf32>
    %21 = arith.truncf %20 : vector<32x64xf32> to vector<32x64xbf16>
    %c0_12 = arith.constant 0 : index
    %c0_13 = arith.constant 0 : index
    %22 = vector.load %arg4[%c0_12, %c0_13] : memref<32x32xf32, #tpu.memory_space<vmem>>, vector<32x32xf32>
    %23 = arith.truncf %22 : vector<32x32xf32> to vector<32x32xbf16>
    %cst_14 = arith.constant dense<0.000000e+00> : vector<64x32xf32>
    %24 = tpu.matmul %21, %23, %cst_14 {dimension_numbers = #tpu.dot_dimension_numbers<[0], [0], [1], [1], [0, 1, 1, 1], [], []>} : vector<32x64xbf16>, vector<32x32xbf16>, vector<64x32xf32> -> vector<64x32xf32>
    %c0_15 = arith.constant 0 : index
    %c0_16 = arith.constant 0 : index
    %25 = vector.load %arg5[%c0_15, %c0_16] : memref<1x32xf32, #tpu.memory_space<vmem>>, vector<1x32xf32>
    %26 = vector.broadcast %25 : vector<1x32xf32> to vector<64x32xf32>
    %27 = arith.addf %24, %26 : vector<64x32xf32>
    %c0_17 = arith.constant 0 : index
    %c0_18 = arith.constant 0 : index
    %c0_19 = arith.constant 0 : index
    %28 = vector.load %arg6[%c0_17, %c0_18, %c0_19] : memref<1x64x32xf32, #tpu.memory_space<vmem>>, vector<1x64x32xf32>
    %29 = vector.shape_cast %28 : vector<1x64x32xf32> to vector<64x32xf32>
    %30 = vector.shape_cast %27 : vector<64x32xf32> to vector<1x64x32xf32>
    tpu.vector_store %arg6[%c0_17, %c0_18, %c0_19], %30 {strides = array<i32>} : memref<1x64x32xf32, #tpu.memory_space<vmem>>, vector<1x64x32xf32>,
    return
  }
  func.func @transform_0(%arg0: i32) -> (i32, i32, i32) {
    %c0_i32 = arith.constant 0 : i32
    %c0_i32_0 = arith.constant 0 : i32
    %c0_i32_1 = arith.constant 0 : i32
    return %arg0, %c0_i32, %c0_i32_0 : i32, i32, i32
  }
  func.func @transform_1(%arg0: i32) -> (i32, i32, i32) {
    %c0_i32 = arith.constant 0 : i32
    %c0_i32_0 = arith.constant 0 : i32
    %c0_i32_1 = arith.constant 0 : i32
    return %arg0, %c0_i32, %c0_i32_0 : i32, i32, i32
  }
  func.func @transform_2(%arg0: i32) -> (i32, i32, i32) {
    %c0_i32 = arith.constant 0 : i32
    %c0_i32_0 = arith.constant 0 : i32
    %c0_i32_1 = arith.constant 0 : i32
    return %arg0, %c0_i32, %c0_i32_0 : i32, i32, i32
  }
  func.func @transform_3(%arg0: i32) -> (i32, i32) {
    %c0_i32 = arith.constant 0 : i32
    %c0_i32_0 = arith.constant 0 : i32
    %c0_i32_1 = arith.constant 0 : i32
    return %c0_i32, %c0_i32_0 : i32, i32
  }
  func.func @transform_4(%arg0: i32) -> (i32, i32) {
    %c0_i32 = arith.constant 0 : i32
    %c0_i32_0 = arith.constant 0 : i32
    %c0_i32_1 = arith.constant 0 : i32
    return %c0_i32, %c0_i32_0 : i32, i32
  }
  func.func @transform_5(%arg0: i32) -> (i32, i32, i32) {
    %c0_i32 = arith.constant 0 : i32
    %c0_i32_0 = arith.constant 0 : i32
    %c0_i32_1 = arith.constant 0 : i32
    return %arg0, %c0_i32, %c0_i32_0 : i32, i32, i32
  }
}

</mosaic_0001>

<bundles_post_ra>
// kernel: middle_block_forward.7
= control target key start
LH: loop header
LB: loop body
LE: loop exit
PB: predicated region body
PF: predicated region fallthrough
CT: control target
= control target key end

     0   :  { %v107_v0 = vmov 0.0   ;;  %vm108_vm0 = vmmov 0   ;;  %vm37_vm1 = vcmask 261120   ;;  %vm81_vm2 = vcmask 517120   ;;  %s150_s1 = inlined_call_operand.vmem [shape: f32[32,64], index: 1, kind: input, shape index: {}]   ;;  %s151_s0 = inlined_call_operand.vmem [shape: f32[2,32], index: 0, kind: input, shape index: {}]   ;;  %s152_s2 = inlined_call_operand.vmem [shape: f32[1,64], index: 2, kind: input, shape index: {}]   ;;  %s153_s3 = inlined_call_operand.vmem [shape: f32[2,64], index: 3, kind: output, shape index: {}]  }
   0x1   :  { %93 = vmatprep.subr.bf16.mxu0 %v107_v0  ;;  %v24_v1 = vld [vmem:[%s150_s1] sm:$0xff]  ;;  %v25_v2 = vld [vmem:[%s150_s1 + $0x8] sm:$0xff]  ;;  %v26_v3 = vld [vmem:[%s150_s1 + $0x10] sm:$0xff]  ;;  %97 = vmatprep.mubr.msk.bf16.mxu0 %vm108_vm0, %v107_v0 }
   0x2   :  { %v28_v4 = vpack.c.bf16 %v25_v2, %v24_v1  ;;  %v27_v5 = vld [vmem:[%s150_s1 + $0x18] sm:$0xff]  ;;  %v15_v6 = vld [vmem:[%s151_s0] sm:$0x3] }
   0x3   :  { %v87_v7 = vmul.f32 -1.442695, %v15_v6  ;;  %v29_v8 = vpack.c.bf16 %v27_v5, %v26_v3  ;;  %v88_v14 = vld [vmem:[%s152_s2] ss:$0 sm:$0xff] }
   0x4   :  { %94 = vmatpush3.bf16.msra.mxu0 %v28_v4 }
   0x5   :  { %95 = vmatprep.subr.bf16.mxu0 %v107_v0  ;;  %103 = vpow2.f32 %v87_v7 }
   0x8   :  { %96 = vmatpush3.bf16.msra.mxu0 %v29_v8 }
   0xf   :  { %v104_v9 = vpop.eup %103 }
  0x10   :  { %v19_v10 = vadd.f32 1.0, %v104_v9 }
  0x12   :  { %105 = vrcp.f32 %v19_v10 }
  0x1c   :  { %v106_v11 = vpop.eup %105 }
  0x1d   :  { %v22_v12 = vmul.f32 %v106_v11, %v15_v6 }
  0x1f   :  { %v23_v13 = vpack.c.bf16 %v22_v12, %v22_v12 }
  0x21   :  { %98 = vmatmul.mubr.msk.bf16.vlgmr.msra.gmra.mrb[0].mxu0 %vm37_vm1, %v23_v13 }
  0xf4   :  { %v75_v15 = vpop.f32.mrb[0].mxu0 }
  0xf5   :  { %v76_v16 = vadd.f32 %v88_v14, %v75_v15  ;;  %v99_v17 = vpop.f32.mrb[1].mxu0 }
  0xf6   :  { %v78_v18 = vpop.f32.mrb[2].mxu0 }
  0xf7   :  { %82 = vst.msk [vmem:[%s153_s3] sm:$0x3] %vm81_vm2, %v76_v16  ;;  %v100_v19 = vpop.f32.mrb[3].mxu0 }

// kernel: middle_block_forward.10
= control target key start
LH: loop header
LB: loop body
LE: loop exit
PB: predicated region body
PF: predicated region fallthrough
CT: control target
= control target key end

     0   :  { %s940_s21 = smov 0   ;;  %s1063_s0 = inlined_call_operand.vmem [shape: f32[2,32,64], index: 0, kind: input, shape index: {}]   ;;  %s1064_s1 = inlined_call_operand.vmem [shape: f32[32,32], index: 1, kind: input, shape index: {}]   ;;  %s1065_s2 = inlined_call_operand.vmem [shape: f32[32,1], index: 2, kind: input, shape index: {}]   ;;  %s1066_s3 = inlined_call_operand.vmem [shape: f32[32,1], index: 3, kind: input, shape index: {}]   ;;  %s1067_s4 = inlined_call_operand.vmem [shape: f32[32,96], index: 4, kind: input, shape index: {}]   ;;  %s1068_s5 = inlined_call_operand.vmem [shape: f32[1,96], index: 5, kind: input, shape index: {}]   ;;  %s1069_s6 = inlined_call_operand.vmem [shape: bf16[2,64,96], index: 6, kind: output, shape index: {}]  }
   0x1 LB: > { %s757_s22 = sadd.s32 4294967295, %s902_s21   ;;  %p761_p0 = scmp.ge.s32.totalorder %s902_s21, 1  ;;  %s902_s21 = sphi %s940_s21, %s16_s21  }
   0x2   : > { %p212_p1 = scmp.lt.s32.totalorder %s902_s21, 3 }
   0x4   : > { %p213_p2 = pnand %p761_p0, %p212_p1 }
   0x5   : > { %p242_p3 = scmp.lt.s32.totalorder (!%p213_p2), %s757_s22, 1  ;;  %v257_v0 = vld [vmem:[%s1064_s1] sm:$0xff] (!%p213_p2)  ;;  %vm269_vm0 = vcmask (!%p213_p2), 261120   ;;  %v258_v7 = vld [vmem:[%s1064_s1 + $0x8] sm:$0xff] (!%p213_p2)  ;;  %v259_v8 = vld [vmem:[%s1064_s1 + $0x10] sm:$0xff] (!%p213_p2)  ;;  %vm367_vm1 = vcmask (!%p213_p2), 523264  }
   0x6   : > { %216 = sbr.rel (%p213_p2) target bundleno = 1125 (0x465), region = 44  ;;  %829 = vmatprep.mubr.msk.f32.mxu1 (!%p213_p2), %vm269_vm0, %v257_v0  ;;  %v260_v9 = vld [vmem:[%s1064_s1 + $0x18] sm:$0xff] (!%p213_p2)  ;;  %v904_v36 = vmov (!%p213_p2), 0   ;;  %v262_v45 = vld [vmem:[%s1065_s2 + $0x8] sm:$0xff] (!%p213_p2)  ;;  %v263_v46 = vld [vmem:[%s1065_s2 + $0x10] sm:$0xff] (!%p213_p2)  ;;  %vm693_vm2 = vcmask (!%p213_p2), 781312  }
   0x7   : > { %887 = vset.pattern.permute.xlu1 (!%p213_p2), %v904_v36  ;;  %886 = vset.pattern.permute.xlu0 (!%p213_p2), %v904_v36  ;;  %v261_v47 = vld [vmem:[%s1065_s2] sm:$0xff] (!%p213_p2)  ;;  %v264_v48 = vld [vmem:[%s1065_s2 + $0x18] sm:$0xff] (!%p213_p2)  ;;  %v266_v50 = vld [vmem:[%s1066_s3 + $0x8] sm:$0xff] (!%p213_p2) }
   0x8   : > { %v265_v49 = vld [vmem:[%s1066_s3] sm:$0xff] (!%p213_p2)  ;;  %v267_v51 = vld [vmem:[%s1066_s3 + $0x10] sm:$0xff] (!%p213_p2)  ;;  %v268_v52 = vld [vmem:[%s1066_s3 + $0x18] sm:$0xff] (!%p213_p2) }
   0x9   : > { %v555_v53 = vld [vmem:[%s1067_s4] sm:$0xff] (!%p213_p2)  ;;  %v556_v54 = vld [vmem:[%s1067_s4 + $0x8] sm:$0xff] (!%p213_p2) }
   0xa   : > { %v559_v55 = vpack.c.bf16 (!%p213_p2), %v556_v54, %v555_v53 }
   0xc   : > { %849 = vmatprep.subr.bf16.mxu0 (!%p213_p2), %v559_v55 }
   0xd   : > { %s1071_s22 = smov (!%p242_p3, %s757_s22), 1  ;;  %850 = vmatpush3.bf16.msra.mxu0 %v559_v55 }
   0xe   : > { %s789_s25 = sshll.u32 %s1071_s22, 5 }
   0xf   : > { %s246_s28 = scalar_lea.vmem %s1063_s0, %s789_s25  ;;  %s251_s18 = scalar_lea.vmem %s1069_s6, %s789_s25 }
  0x10   : > { %v253_v1 = vld [vmem:[%s246_s28] sm:$0xff]  ;;  %v254_v2 = vld [vmem:[%s246_s28 + $0x8] sm:$0xff]  ;;  %v255_v3 = vld [vmem:[%s246_s28 + $0x10] sm:$0xff] }
  0x11   : > { %v861_v4 = vpack.c.bf16 %v254_v2, %v253_v1  ;;  %v256_v5 = vld [vmem:[%s246_s28 + $0x18] sm:$0xff] }
  0x12   : > { %v865_v6 = vpack.c.bf16 %v256_v5, %v255_v3 }
  0x13   : > { %862 = vmatprep.subr.bf16.mxu1 %v861_v4 }
  0x14   : > { %864 = vmatpush3.bf16.msra.mxu1 %v861_v4 }
  0x15   : > { %866 = vmatprep.subr.bf16.mxu1 %v865_v6 }
  0x18   : > { %868 = vmatpush3.bf16.msra.mxu1 %v865_v6 }
  0x1b   : > { %830 = vmatmul.mubr.msk.f32.vlgmr.msra.gmra.mrb[0].mxu1 %vm269_vm0, %v258_v7 }
  0x1c   : > { %832 = vmatprep.mubr.msk.f32.mxu1 %vm269_vm0, %v259_v8 }
  0x1f   : > { %833 = vmatmul.mubr.msk.f32.gmra.mrb[2].mxu1 %vm269_vm0, %v260_v9 }
  0x20   : > { %843 = vmatprep.mubr.msk.f32.mxu1 %vm269_vm0, %v257_v0 }
  0xee   : > { %v831_v10 = vpop.f32.mrb[0].mxu1 }
  0xef   : > { %v348_v11 = vpop.f32.mrb[1].mxu1  ;;  %v371_v15 = vsel %vm367_vm1, %v831_v10, 0.0 }
  0xf0   : > { %v368_v12 = vsel %vm367_vm1, %v348_v11, 0.0 }
  0xf1   : > { %369 = vadd.xlane.f32.xlu0 %v368_v12 }
  0xf2   : > { %v834_v13 = vpop.f32.mrb[2].mxu1 }
  0xf3   : > { %v358_v14 = vpop.f32.mrb[3].mxu1  ;;  %v377_v17 = vsel %vm367_vm1, %v834_v13, 0.0 }
  0xf4   : > { %v374_v16 = vsel %vm367_vm1, %v358_v14, 0.0 }
  0xf5   : > { %372 = vadd.xlane.f32.xlu0 %v371_v15  ;;  %375 = vadd.xlane.f32.xlu1 %v374_v16 }
  0xf9   : > { %378 = vadd.xlane.f32.xlu1 %v377_v17 }
 0x17e   : > { %v370_v18 = vpop.xlane.xlu0 %369 }
 0x17f   : > { %v380_v19 = vmul.f32 0.015625, %v370_v18 }
 0x181   : > { %v977_v22 = vsub.f32 %v253_v1, %v380_v19  ;;  %v557_v1 = vld [vmem:[%s1067_s4 + $0x10] sm:$0xff] }
 0x182   : > { %v373_v20 = vpop.xlane.xlu0 %372  ;;  %v376_v21 = vpop.xlane.xlu1 %375 }
 0x183   : > { %v381_v23 = vmul.f32 0.015625, %v373_v20  ;;  %v382_v24 = vmul.f32 0.015625, %v376_v21  ;;  %v388_v27 = vmul.f32 %v977_v22, %v977_v22 }
 0x185   : > { %v979_v25 = vsub.f32 %v254_v2, %v381_v23  ;;  %v985_v29 = vsub.f32 %v255_v3, %v382_v24  ;;  %v558_v2 = vld [vmem:[%s1067_s4 + $0x18] sm:$0xff] }
 0x186   : > { %v379_v26 = vpop.xlane.xlu1 %378  ;;  %v560_v4 = vpack.c.bf16 %v558_v2, %v557_v1 }
 0x187   : > { %v389_v28 = vmul.f32 %v979_v25, %v979_v25  ;;  %v383_v30 = vmul.f32 0.015625, %v379_v26  ;;  %v390_v33 = vmul.f32 %v985_v29, %v985_v29 }
 0x188   : > { %851 = vmatprep.subr.bf16.mxu0 %v560_v4 }
 0x189   : > { %v987_v31 = vsub.f32 %v256_v5, %v383_v30  ;;  %v869_v32 = vpack.c.bf16 %v389_v28, %v388_v27  ;;  %852 = vmatpush3.bf16.msra.mxu0 %v560_v4 }
 0x18b   : > { %v391_v34 = vmul.f32 %v987_v31, %v987_v31  ;;  %870 = vmatprep.subr.bf16.mxu1 %v869_v32 }
 0x18c   : > { %872 = vmatpush3.bf16.msra.mxu1 %v869_v32 }
 0x18d   : > { %v873_v35 = vpack.c.bf16 %v391_v34, %v390_v33 }
 0x18f   : > { %874 = vmatprep.subr.bf16.mxu1 %v873_v35 }
 0x190   : > { %876 = vmatpush3.bf16.msra.mxu1 %v873_v35 }
 0x193   : > { %844 = vmatmul.mubr.msk.f32.vlgmr.msra.gmra.mrb[4].mxu1 %vm269_vm0, %v258_v7 }
 0x194   : > { %846 = vmatprep.mubr.msk.f32.mxu1 %vm269_vm0, %v259_v8 }
 0x197   : > { %847 = vmatmul.mubr.msk.f32.gmra.mrb[6].mxu1 %vm269_vm0, %v260_v9 }
 0x266   : > { %v845_v37 = vpop.f32.mrb[4].mxu1 }
 0x267   : > { %v458_v38 = vpop.f32.mrb[5].mxu1  ;;  %v480_v39 = vsel %vm367_vm1, %v845_v37, 0.0  ;;  %v774_v37 = vld [vmem:[%s1068_s5] ss:$0 sm:$0xff] }
 0x268   : > { %481 = vadd.xlane.f32.xlu1 %v480_v39  ;;  %v477_v40 = vsel %vm367_vm1, %v458_v38, 0.0 }
 0x269   : > { %478 = vadd.xlane.f32.xlu0 %v477_v40 }
 0x26a   : > { %v848_v41 = vpop.f32.mrb[6].mxu1 }
 0x26b   : > { %v468_v42 = vpop.f32.mrb[7].mxu1  ;;  %v486_v43 = vsel %vm367_vm1, %v848_v41, 0.0 }
 0x26c   : > { %487 = vadd.xlane.f32.xlu1 %v486_v43  ;;  %v483_v44 = vsel %vm367_vm1, %v468_v42, 0.0 }
 0x26d   : > { %484 = vadd.xlane.f32.xlu0 %v483_v44 }
 0x27d   : > { %512 = vperm.xlu1 %887, %v262_v45  }
 0x281   : > { %517 = vperm.xlu1 %887, %v263_v46  }
 0x283   : > { %507 = vperm.xlu0 %886, %v261_v47  }
 0x285   : > { %522 = vperm.xlu1 %887, %v264_v48  }
 0x289   : > { %531 = vperm.xlu1 %887, %v265_v49  }
 0x28d   : > { %536 = vperm.xlu1 %887, %v266_v50  }
 0x291   : > { %541 = vperm.xlu1 %887, %v267_v51  }
 0x295   : > { %546 = vperm.xlu1 %887, %v268_v52  }
 0x2f5   : > { %v482_v56 = vpop.xlane.xlu1 %481 }
 0x2f6   : > { %v490_v57 = vmul.f32 0.015625, %v482_v56  ;;  %v479_v58 = vpop.xlane.xlu0 %478 }
 0x2f7   : > { %v489_v59 = vmul.f32 0.015625, %v479_v58 }
 0x2f8   : > { %v494_v60 = vadd.f32 1e-05, %v490_v57 }
 0x2f9   : > { %v493_v61 = vadd.f32 1e-05, %v489_v59  ;;  %v488_v62 = vpop.xlane.xlu1 %487 }
 0x2fa   : > { %888 = vrsqrt.f32 %v494_v60  ;;  %v492_v63 = vmul.f32 0.015625, %v488_v62  ;;  %v485_v0 = vpop.xlane.xlu0 %484 }
 0x2fb   : > { %890 = vrsqrt.f32 %v493_v61  ;;  %v491_v3 = vmul.f32 0.015625, %v485_v0 }
 0x2fc   : > { %v496_v6 = vadd.f32 1e-05, %v492_v63 }
 0x2fd   : > { %v513_v5 = vpop.permute.xlu1 %512  ;;  %v495_v7 = vadd.f32 1e-05, %v491_v3 }
 0x2fe   : > { %892 = vrsqrt.f32 %v496_v6 }
 0x2ff   : > { %894 = vrsqrt.f32 %v495_v7 }
 0x301   : > { %v518_v8 = vpop.permute.xlu1 %517 }
 0x302   : > { %v508_v13 = vpop.permute.xlu0 %507 }
 0x304   : > { %v889_v9 = vpop.eup %888 }
 0x305   : > { %v891_v10 = vpop.eup %890  ;;  %v523_v11 = vpop.permute.xlu1 %522  ;;  %v502_v14 = vmul.f32 %v889_v9, %v979_v25 }
 0x306   : > { %v501_v12 = vmul.f32 %v891_v10, %v977_v22 }
 0x307   : > { %v526_v18 = vmul.f32 %v513_v5, %v502_v14 }
 0x308   : > { %v525_v16 = vmul.f32 %v508_v13, %v501_v12  ;;  %v893_v17 = vpop.eup %892 }
 0x309   : > { %v532_v15 = vpop.permute.xlu1 %531  ;;  %v895_v19 = vpop.eup %894  ;;  %v504_v26 = vmul.f32 %v893_v17, %v987_v31 }
 0x30a   : > { %v549_v21 = vadd.f32 %v532_v15, %v525_v16  ;;  %v503_v24 = vmul.f32 %v895_v19, %v985_v29 }
 0x30b   : > { %v528_v22 = vmul.f32 %v523_v11, %v504_v26 }
 0x30c   : > { %v527_v30 = vmul.f32 %v518_v8, %v503_v24 }
 0x30d   : > { %v537_v20 = vpop.permute.xlu1 %536 }
 0x30e   : > { %v550_v23 = vadd.f32 %v537_v20, %v526_v18 }
 0x310   : > { %v553_v27 = vpack.c.bf16 %v550_v23, %v549_v21 }
 0x311   : > { %v542_v28 = vpop.permute.xlu1 %541 }
 0x312   : > { %568 = vxpose.xlu1.c.b16.start [1/2] (short) (narrow) %v553_v27, 64  ;;  %v551_v33 = vadd.f32 %v542_v28, %v527_v30 }
 0x315   : > { %v547_v32 = vpop.permute.xlu1 %546 }
 0x316   : > { %v552_v25 = vadd.f32 %v547_v32, %v528_v22 }
 0x318   : > { %v554_v34 = vpack.c.bf16 %v552_v25, %v551_v33 }
 0x31a   : > { %569 = vxpose.xlu1.c.b16.end [2/2] (short) (narrow) %v554_v34, 64 }
 0x37c   : > { %v576_v35 = vpop.trf.xlu1 }
 0x37d   : > { %853 = vmatprep.mubr.msk.bf16.mxu0 %vm269_vm0, %v576_v35 }
 0x380   : > { %v577_v36 = vpop.trf.xlu1 }
 0x381   : > { %854 = vmatmul.mubr.msk.bf16.vlgmr.msra.gmra.mrb[0].mxu0 %vm269_vm0, %v577_v36 }
 0x384   : > { %v578_v29 = vpop.trf.xlu1 }
 0x385   : > { %857 = vmatprep.mubr.msk.bf16.mxu0 %vm269_vm0, %v578_v29 }
 0x388   : > { %v579_v31 = vpop.trf.xlu1 }
 0x389   : > { %858 = vmatmul.mubr.msk.bf16.gmra.mrb[4].mxu0 %vm269_vm0, %v579_v31 }
 0x454   : > { %v855_v38 = vpop.f32.mrb[0].mxu0 }
 0x455   : > { %v639_v39 = vadd.f32 %v855_v38, %v774_v37  ;;  %v630_v40 = vpop.f32.mrb[1].mxu0 }
 0x456   : > { %v631_v41 = vadd.f32 %v774_v37, %v630_v40  ;;  %v856_v42 = vpop.f32.mrb[2].mxu0 }
 0x457   : > { %v793_v43 = vpack.c.bf16 %v639_v39, %v639_v39  ;;  %v642_v44 = vadd.f32 %v856_v42, %v774_v37  ;;  %v633_v45 = vpop.f32.mrb[3].mxu0 }
 0x458   : > { %v791_v46 = vpack.c.bf16 %v631_v41, %v631_v41  ;;  %v634_v47 = vadd.f32 %v774_v37, %v633_v45 }
 0x459   : > { %696 = vst.msk [vmem:[%s251_s18 + $0x8] sm:$0xf] %vm693_vm2, %v793_v43  ;;  %v794_v48 = vpack.c.bf16 %v642_v44, %v642_v44 }
 0x45a   : > { %694 = vst.msk [vmem:[%s251_s18] sm:$0xf] %vm693_vm2, %v791_v46  ;;  %v792_v49 = vpack.c.bf16 %v634_v47, %v634_v47 }
 0x45b   : > { %697 = vst.msk [vmem:[%s251_s18 + $0xc] sm:$0xf] %vm693_vm2, %v794_v48 }
 0x45c   : > { %695 = vst.msk [vmem:[%s251_s18 + $0x4] sm:$0xf] %vm693_vm2, %v792_v49  ;;  %v859_v50 = vpop.f32.mrb[4].mxu0 }
 0x45d   : > { %v655_v51 = vadd.f32 %v859_v50, %v774_v37  ;;  %v646_v52 = vpop.f32.mrb[5].mxu0 }
 0x45e   : > { %v647_v53 = vadd.f32 %v774_v37, %v646_v52  ;;  %v860_v54 = vpop.f32.mrb[6].mxu0 }
 0x45f   : > { %v797_v55 = vpack.c.bf16 %v655_v51, %v655_v51  ;;  %v658_v56 = vadd.f32 %v860_v54, %v774_v37  ;;  %v649_v57 = vpop.f32.mrb[7].mxu0 }
 0x460   : > { %v795_v58 = vpack.c.bf16 %v647_v53, %v647_v53  ;;  %v650_v59 = vadd.f32 %v774_v37, %v649_v57 }
 0x461   : > { %700 = vst.msk [vmem:[%s251_s18 + $0x18] sm:$0xf] %vm693_vm2, %v797_v55  ;;  %v798_v60 = vpack.c.bf16 %v658_v56, %v658_v56 }
 0x462   : > { %698 = vst.msk [vmem:[%s251_s18 + $0x10] sm:$0xf] %vm693_vm2, %v795_v58  ;;  %v796_v61 = vpack.c.bf16 %v650_v59, %v650_v59 }
 0x463   : > { %701 = vst.msk [vmem:[%s251_s18 + $0x1c] sm:$0xf] %vm693_vm2, %v798_v60 }
 0x464   : > { %699 = vst.msk [vmem:[%s251_s18 + $0x14] sm:$0xf] %vm693_vm2, %v796_v61 }
 0x465 PF: > { %s16_s21 = sadd.s32 1, %s902_s21  }
 0x466   : > { %p13_p4 = scmp.ge.s32.totalorder %s16_s21, 4  }
 0x468   :  { %15 = sbr.rel (!%p13_p4) target bundleno = 1 (0x1), region = 74 }

// kernel: middle_block_forward.11
= control target key start
LH: loop header
LB: loop body
LE: loop exit
PB: predicated region body
PF: predicated region fallthrough
CT: control target
= control target key end

     0   :  { %s820_s18 = smov 0   ;;  %s889_s0 = inlined_call_operand.vmem [shape: bf16[2,32,64], index: 0, kind: input, shape index: {}]   ;;  %s890_s1 = inlined_call_operand.vmem [shape: bf16[2,32,64], index: 1, kind: input, shape index: {}]   ;;  %s891_s2 = inlined_call_operand.vmem [shape: bf16[2,32,64], index: 2, kind: input, shape index: {}]   ;;  %s892_s3 = inlined_call_operand.vmem [shape: f32[32,32], index: 3, kind: input, shape index: {}]   ;;  %s893_s4 = inlined_call_operand.vmem [shape: f32[1,32], index: 4, kind: input, shape index: {}]   ;;  %s894_s5 = inlined_call_operand.vmem [shape: f32[2,64,32], index: 5, kind: output, shape index: {}]  }
   0x1 LB: > { %s673_s19 = sadd.s32 4294967295, %s788_s18   ;;  %p677_p0 = scmp.ge.s32.totalorder %s788_s18, 1  ;;  %s788_s18 = sphi %s820_s18, %s15_s18  }
   0x2   : > { %p207_p1 = scmp.lt.s32.totalorder %s788_s18, 3 }
   0x4   : > { %p208_p2 = pnand %p677_p0, %p207_p1 }
   0x5   : > { %p245_p3 = scmp.lt.s32.totalorder (!%p208_p2), %s673_s19, 1  ;;  %vm298_vm0 = vcmask (!%p208_p2), 523264   ;;  %vm364_vm1 = vcmask (!%p208_p2), 261120   ;;  %v480_v54 = vld [vmem:[%s892_s3] sm:$0xff] (!%p208_p2)  ;;  %v481_v55 = vld [vmem:[%s892_s3 + $0x8] sm:$0xff] (!%p208_p2)  ;;  %v482_v56 = vld [vmem:[%s892_s3 + $0x10] sm:$0xff] (!%p208_p2) }
   0x6   : > { %211 = sbr.rel (%p208_p2) target bundleno = 1122 (0x462), region = 40  ;;  %v484_v57 = vpack.c.bf16 (!%p208_p2), %v481_v55, %v480_v54  ;;  %v483_v58 = vld [vmem:[%s892_s3 + $0x18] sm:$0xff] (!%p208_p2) }
   0x7   : > { %v485_v59 = vpack.c.bf16 (!%p208_p2), %v483_v58, %v482_v56 }
   0xd   : > { %s896_s19 = smov (!%p245_p3, %s673_s19), 1 }
   0xe   : > { %s831_s20 = sshll.u32 %s896_s19, 4  ;;  %s706_s13 = sshll.u32 %s896_s19, 6 }
   0xf   : > { %s254_s23 = scalar_lea.vmem %s890_s1, %s831_s20  ;;  %s249_s26 = scalar_lea.vmem %s889_s0, %s831_s20 }
  0x10   : > { %v760_v0 = vld [vmem:[%s254_s23] sm:$0xff]   ;;  %v761_v1 = vld [vmem:[%s254_s23 + $0x8] sm:$0xff]   ;;  %s259_s29 = scalar_lea.vmem %s891_s2, %s831_s20  ;;  %s264_s20 = scalar_lea.vmem %s894_s5, %s706_s13 }
  0x11   : > { %749 = vmatprep.subr.msk.bf16.mxu0 %vm298_vm0, %v760_v0  ;;  %v306_v2 = vsel %vm298_vm0, %v760_v0, 0  ;;  %v762_v3 = vld [vmem:[%s249_s26] sm:$0xff]   ;;  %v309_v4 = vsel %vm298_vm0, %v761_v1, 0  ;;  %v763_v5 = vld [vmem:[%s249_s26 + $0x8] sm:$0xff]  }
  0x12   : > { %722 = vmatpush3.bf16.xpose.msra.mxu0 %v306_v2  ;;  %725 = vmatprep.mubr.msk.bf16.mxu0 %vm298_vm0, %v762_v3  ;;  %v764_v38 = vld [vmem:[%s259_s29] sm:$0xff]   ;;  %v765_v39 = vld [vmem:[%s259_s29 + $0x8] sm:$0xff]  }
  0x13   : > { %750 = vmatprep.subr.msk.bf16.mxu0 %vm298_vm0, %v761_v1  ;;  %729 = vmatprep.subr.bf16.mxu1 %v764_v38 }
  0x14   : > { %730 = vmatpush3.bf16.msra.mxu1 %v764_v38 }
  0x15   : > { %731 = vmatprep.subr.bf16.mxu1 %v765_v39 }
  0x18   : > { %732 = vmatpush3.bf16.msra.mxu1 %v765_v39 }
  0x19   : > { %737 = vmatprep.subr.bf16.mxu1 %v484_v57 }
  0x1a   : > { %724 = vmatpush3.bf16.xpose.msra.mxu0 %v309_v4 }
  0x21   : > { %726 = vmatmul.mubr.msk.bf16.vlgmr.msra.gmra.mrb[0].mxu0 %vm298_vm0, %v763_v5 }
  0xf4   : > { %v727_v6 = vpop.f32.mrb[0].mxu0 }
  0xf5   : > { %v362_v7 = vmul.f32 0.17677669, %v727_v6  ;;  %v345_v8 = vpop.f32.mrb[1].mxu0  ;;  %v696_v6 = vld [vmem:[%s893_s4] ss:$0 sm:$0xff] }
  0xf6   : > { %v360_v9 = vmul.f32 0.17677669, %v345_v8  ;;  %v728_v10 = vpop.f32.mrb[2].mxu0 }
  0xf7   : > { %v363_v11 = vmul.f32 0.17677669, %v728_v10  ;;  %v348_v12 = vpop.f32.mrb[3].mxu0  ;;  %v371_v13 = vsel %vm364_vm1, %v362_v7, -inf }
  0xf8   : > { %v361_v14 = vmul.f32 0.17677669, %v348_v12  ;;  %372 = vmax.xlane.f32.xlu1 %v371_v13  ;;  %v365_v15 = vsel %vm364_vm1, %v360_v9, -inf }
  0xf9   : > { %366 = vmax.xlane.f32.xlu0 %v365_v15  ;;  %v374_v16 = vsel %vm364_vm1, %v363_v11, -inf }
  0xfa   : > { %v368_v17 = vsel %vm364_vm1, %v361_v14, -inf }
  0xfc   : > { %375 = vmax.xlane.f32.xlu1 %v374_v16 }
  0xfd   : > { %369 = vmax.xlane.f32.xlu0 %v368_v17 }
 0x185   : > { %v373_v18 = vpop.xlane.xlu1 %372 }
 0x186   : > { %v379_v19 = vsub.f32 %v362_v7, %v373_v18  ;;  %v367_v20 = vpop.xlane.xlu0 %366 }
 0x187   : > { %v377_v21 = vsub.f32 %v360_v9, %v367_v20 }
 0x188   : > { %v385_v22 = vmul.f32 1.442695, %v379_v19 }
 0x189   : > { %v381_v23 = vmul.f32 1.442695, %v377_v21  ;;  %v376_v24 = vpop.xlane.xlu1 %375 }
 0x18a   : > { %v380_v25 = vsub.f32 %v363_v11, %v376_v24  ;;  %v370_v26 = vpop.xlane.xlu0 %369 }
 0x18b   : > { %766 = vpow2.f32 %v381_v23  ;;  %v378_v27 = vsub.f32 %v361_v14, %v370_v26 }
 0x18c   : > { %768 = vpow2.f32 %v385_v22  ;;  %v387_v28 = vmul.f32 1.442695, %v380_v25 }
 0x18d   : > { %v383_v29 = vmul.f32 1.442695, %v378_v27 }
 0x18f   : > { %770 = vpow2.f32 %v383_v29 }
 0x190   : > { %772 = vpow2.f32 %v387_v28 }
 0x195   : > { %v767_v30 = vpop.eup %766 }
 0x196   : > { %v389_v31 = vsel %vm364_vm1, %v767_v30, 0.0  ;;  %v769_v32 = vpop.eup %768 }
 0x197   : > { %390 = vadd.xlane.f32.xlu0 %v389_v31  ;;  %v395_v34 = vsel %vm364_vm1, %v769_v32, 0.0 }
 0x199   : > { %v771_v33 = vpop.eup %770 }
 0x19a   : > { %v392_v35 = vsel %vm364_vm1, %v771_v33, 0.0  ;;  %v773_v36 = vpop.eup %772 }
 0x19b   : > { %396 = vadd.xlane.f32.xlu0 %v395_v34  ;;  %393 = vadd.xlane.f32.xlu1 %v392_v35  ;;  %v398_v37 = vsel %vm364_vm1, %v773_v36, 0.0 }
 0x19f   : > { %399 = vadd.xlane.f32.xlu1 %v398_v37 }
 0x224   : > { %v391_v40 = vpop.xlane.xlu0 %390 }
 0x225   : > { %774 = vrcp.f32 %v391_v40 }
 0x228   : > { %v394_v41 = vpop.xlane.xlu1 %393  ;;  %v397_v42 = vpop.xlane.xlu0 %396 }
 0x229   : > { %776 = vrcp.f32 %v394_v41 }
 0x22a   : > { %778 = vrcp.f32 %v397_v42 }
 0x22c   : > { %v400_v43 = vpop.xlane.xlu1 %399 }
 0x22d   : > { %780 = vrcp.f32 %v400_v43 }
 0x22f   : > { %v775_v44 = vpop.eup %774 }
 0x230   : > { %v405_v46 = vmul.f32 %v775_v44, %v767_v30 }
 0x233   : > { %v777_v45 = vpop.eup %776 }
 0x234   : > { %v406_v47 = vmul.f32 %v777_v45, %v771_v33  ;;  %v779_v48 = vpop.eup %778 }
 0x235   : > { %v407_v51 = vmul.f32 %v779_v48, %v769_v32 }
 0x236   : > { %v409_v49 = vpack.c.bf16 %v406_v47, %v405_v46 }
 0x237   : > { %v781_v50 = vpop.eup %780 }
 0x238   : > { %733 = vmatprep.mubr.msk.bf16.mxu1 %vm364_vm1, %v409_v49  ;;  %v408_v52 = vmul.f32 %v781_v50, %v773_v36 }
 0x23a   : > { %v410_v53 = vpack.c.bf16 %v408_v52, %v407_v51 }
 0x23c   : > { %734 = vmatmul.mubr.msk.bf16.vlgmr.msra.gmra.mrb[0].mxu1 %vm364_vm1, %v410_v53 }
 0x23d   : > { %738 = vmatpush3.bf16.msra.mxu1 %v484_v57 }
 0x23e   : > { %739 = vmatprep.subr.bf16.mxu1 %v485_v59 }
 0x241   : > { %740 = vmatpush3.bf16.msra.mxu1 %v485_v59 }
 0x30f   : > { %v735_v60 = vpop.f32.mrb[0].mxu1 }
 0x310   : > { %v463_v61 = vpop.f32.mrb[1].mxu1 }
 0x311   : > { %v736_v62 = vpop.f32.mrb[2].mxu1 }
 0x312   : > { %v479_v63 = vpack.c.bf16 %v736_v62, %v735_v60  ;;  %v466_v0 = vpop.f32.mrb[3].mxu1 }
 0x313   : > { %v478_v1 = vpack.c.bf16 %v466_v0, %v463_v61 }
 0x315   : > { %493 = vxpose.xlu0.c.b16.start [1/2] (short) (narrow) %v478_v1, 64 }
 0x319   : > { %494 = vxpose.xlu0.c.b16.end [2/2] (short) (narrow) %v479_v63, 64 }
 0x37b   : > { %v501_v2 = vpop.trf.xlu0 }
 0x37c   : > { %741 = vmatprep.mubr.msk.bf16.mxu1 %vm364_vm1, %v501_v2 }
 0x37f   : > { %v502_v3 = vpop.trf.xlu0 }
 0x380   : > { %742 = vmatmul.mubr.msk.bf16.vlgmr.msra.gmra.mrb[4].mxu1 %vm364_vm1, %v502_v3 }
 0x383   : > { %v503_v4 = vpop.trf.xlu0 }
 0x384   : > { %745 = vmatprep.mubr.msk.bf16.mxu1 %vm364_vm1, %v503_v4 }
 0x387   : > { %v504_v5 = vpop.trf.xlu0 }
 0x388   : > { %746 = vmatmul.mubr.msk.bf16.gmra.mrb[8].mxu1 %vm364_vm1, %v504_v5 }
 0x453   : > { %v743_v7 = vpop.f32.mrb[4].mxu1 }
 0x454   : > { %v564_v8 = vadd.f32 %v743_v7, %v696_v6  ;;  %v555_v9 = vpop.f32.mrb[5].mxu1 }
 0x455   : > { %v556_v10 = vadd.f32 %v696_v6, %v555_v9  ;;  %v744_v11 = vpop.f32.mrb[6].mxu1 }
 0x456   : > { %588 = vst.msk [vmem:[%s264_s20 + $0x10] sm:$0xff] %vm364_vm1, %v564_v8  ;;  %v567_v12 = vadd.f32 %v744_v11, %v696_v6  ;;  %v558_v13 = vpop.f32.mrb[7].mxu1 }
 0x457   : > { %586 = vst.msk [vmem:[%s264_s20] sm:$0xff] %vm364_vm1, %v556_v10  ;;  %v559_v14 = vadd.f32 %v696_v6, %v558_v13 }
 0x458   : > { %589 = vst.msk [vmem:[%s264_s20 + $0x18] sm:$0xff] %vm364_vm1, %v567_v12 }
 0x459   : > { %587 = vst.msk [vmem:[%s264_s20 + $0x8] sm:$0xff] %vm364_vm1, %v559_v14 }
 0x45b   : > { %v747_v15 = vpop.f32.mrb[8].mxu1 }
 0x45c   : > { %v580_v16 = vadd.f32 %v747_v15, %v696_v6  ;;  %v571_v17 = vpop.f32.mrb[9].mxu1 }
 0x45d   : > { %v572_v18 = vadd.f32 %v696_v6, %v571_v17  ;;  %v748_v19 = vpop.f32.mrb[10].mxu1 }
 0x45e   : > { %592 = vst.msk [vmem:[%s264_s20 + $0x30] sm:$0xff] %vm364_vm1, %v580_v16  ;;  %v583_v20 = vadd.f32 %v748_v19, %v696_v6  ;;  %v574_v21 = vpop.f32.mrb[11].mxu1 }
 0x45f   : > { %590 = vst.msk [vmem:[%s264_s20 + $0x20] sm:$0xff] %vm364_vm1, %v572_v18  ;;  %v575_v22 = vadd.f32 %v696_v6, %v574_v21 }
 0x460   : > { %593 = vst.msk [vmem:[%s264_s20 + $0x38] sm:$0xff] %vm364_vm1, %v583_v20 }
 0x461   : > { %591 = vst.msk [vmem:[%s264_s20 + $0x28] sm:$0xff] %vm364_vm1, %v575_v22 }
 0x462 PF: > { %s15_s18 = sadd.s32 1, %s788_s18  }
 0x463   : > { %p12_p4 = scmp.ge.s32.totalorder %s15_s18, 4  }
 0x465   :  { %14 = sbr.rel (!%p12_p4) target bundleno = 1 (0x1), region = 76 }

// kernel: middle_block_forward.8
= control target key start
LH: loop header
LB: loop body
LE: loop exit
PB: predicated region body
PF: predicated region fallthrough
CT: control target
= control target key end

     0   :  { %s2730_s27 = smov 0   ;;  %s3214_s0 = inlined_call_operand.vmem [shape: f32[2,32,64], index: 0, kind: input, shape index: {}]   ;;  %s3215_s1 = inlined_call_operand.vmem [shape: f32[32,32], index: 1, kind: input, shape index: {}]   ;;  %s3216_s2 = inlined_call_operand.vmem [shape: f32[32,1], index: 2, kind: input, shape index: {}]   ;;  %s3217_s3 = inlined_call_operand.vmem [shape: f32[32,1], index: 3, kind: input, shape index: {}]   ;;  %s3218_s4 = inlined_call_operand.vmem [shape: f32[9,32,32], index: 4, kind: input, shape index: {}]   ;;  %s3219_s5 = inlined_call_operand.vmem [shape: f32[32,1], index: 5, kind: input, shape index: {}]   ;;  %s3220_s6 = inlined_call_operand.vmem [shape: f32[3,64], index: 6, kind: input, shape index: {}]   ;;  %s3221_s7 = inlined_call_operand.vmem [shape: f32[2,32,1], index: 7, kind: input, shape index: {}]   ;;  %s3222_s8 = inlined_call_operand.vmem [shape: bf16[2,32,64], index: 8, kind: output, shape index: {}]  }
   0x1 LB: > { %s2063_s28 = sadd.s32 4294967295, %s2680_s27   ;;  %p2067_p0 = scmp.ge.s32.totalorder %s2680_s27, 1  ;;  %s2680_s27 = sphi %s2730_s27, %s18_s27  }
   0x2   : > { %p272_p1 = scmp.lt.s32.totalorder %s2680_s27, 3 }
   0x4   : > { %p273_p2 = pnand %p2067_p0, %p272_p1 }
   0x5   : > { %p311_p3 = scmp.lt.s32.totalorder (!%p273_p2), %s2063_s28, 1  ;;  %v331_v0 = vld [vmem:[%s3215_s1] sm:$0xff] (!%p273_p2)  ;;  %vm343_vm0 = vcmask (!%p273_p2), 261120   ;;  %v332_v7 = vld [vmem:[%s3215_s1 + $0x8] sm:$0xff] (!%p273_p2)  ;;  %v333_v8 = vld [vmem:[%s3215_s1 + $0x10] sm:$0xff] (!%p273_p2)  ;;  %vm441_vm1 = vcmask (!%p273_p2), 523264   ;;  %v657_v59 = vlaneseq (!%p273_p2) }
   0x6   : > { %276 = sbr.rel (%p273_p2) target bundleno = 1823 (0x71f), region = 52  ;;  %2389 = vmatprep.mubr.msk.f32.mxu1 (!%p273_p2), %vm343_vm0, %v331_v0  ;;  %v334_v9 = vld [vmem:[%s3215_s1 + $0x18] sm:$0xff] (!%p273_p2)  ;;  %v2682_v36 = vmov (!%p273_p2), 0   ;;  %v336_v45 = vld [vmem:[%s3216_s2 + $0x8] sm:$0xff] (!%p273_p2)  ;;  %v337_v46 = vld [vmem:[%s3216_s2 + $0x10] sm:$0xff] (!%p273_p2) }
   0x7   : > { %2649 = vset.pattern.permute.xlu1 (!%p273_p2), %v2682_v36  ;;  %2648 = vset.pattern.permute.xlu0 (!%p273_p2), %v2682_v36  ;;  %v335_v47 = vld [vmem:[%s3216_s2] sm:$0xff] (!%p273_p2)  ;;  %v338_v48 = vld [vmem:[%s3216_s2 + $0x18] sm:$0xff] (!%p273_p2)  ;;  %v1920_v49 = vld [vmem:[%s3219_s5 + $0x8] sm:$0xff] (!%p273_p2)  ;;  %v2831_v60 = vshrl.u32 (!%p273_p2), %v657_v59, 7  ;;  %v667_v63 = vand.u32 (!%p273_p2), 127, %v657_v59 }
   0x8   : > { %v339_v50 = vld [vmem:[%s3217_s3] sm:$0xff] (!%p273_p2)  ;;  %v1922_v51 = vld [vmem:[%s3219_s5 + $0x18] sm:$0xff] (!%p273_p2)  ;;  %v340_v52 = vld [vmem:[%s3217_s3 + $0x8] sm:$0xff] (!%p273_p2) }
   0x9   : > { %v341_v54 = vld [vmem:[%s3217_s3 + $0x10] sm:$0xff] (!%p273_p2)  ;;  %v342_v56 = vld [vmem:[%s3217_s3 + $0x18] sm:$0xff] (!%p273_p2)  ;;  %v1919_v57 = vld [vmem:[%s3219_s5] sm:$0xff] (!%p273_p2)  ;;  %v659_v62 = vadd.s32 (!%p273_p2), 8, %v2831_v60 }
   0xa   : > { %v1921_v58 = vld [vmem:[%s3219_s5 + $0x10] sm:$0xff] (!%p273_p2) }
   0xd   : > { %s3228_s28 = smov (!%p311_p3, %s2063_s28), 1 }
   0xe   : > { %s2268_s9 = sshll.u32 %s3228_s28, 5  ;;  %s2270_s21 = sshll.u32 %s3228_s28, 4 }
   0xf   : > { %s315_s12 = scalar_lea.vmem %s3214_s0, %s2268_s9  ;;  %s320_s16 = scalar_lea.vmem %s3221_s7, %s2268_s9 }
  0x10   : > { %v327_v1 = vld [vmem:[%s315_s12] sm:$0xff]  ;;  %v328_v2 = vld [vmem:[%s315_s12 + $0x8] sm:$0xff]  ;;  %v329_v3 = vld [vmem:[%s315_s12 + $0x10] sm:$0xff]  ;;  %s325_s23 = scalar_lea.vmem %s3222_s8, %s2270_s21 }
  0x11   : > { %v2589_v4 = vpack.c.bf16 %v328_v2, %v327_v1  ;;  %v330_v5 = vld [vmem:[%s315_s12 + $0x18] sm:$0xff]  ;;  %v1948_v53 = vld [vmem:[%s320_s16 + $0x8] sm:$0xff]  ;;  %v1947_v61 = vld [vmem:[%s320_s16] sm:$0xff] }
  0x12   : > { %v2593_v6 = vpack.c.bf16 %v330_v5, %v329_v3  ;;  %v1950_v55 = vld [vmem:[%s320_s16 + $0x18] sm:$0xff] }
  0x13   : > { %2590 = vmatprep.subr.bf16.mxu1 %v2589_v4 }
  0x14   : > { %2592 = vmatpush3.bf16.msra.mxu1 %v2589_v4  ;;  %v2842_v4 = vsub.s32 %v659_v62, %v667_v63 }
  0x15   : > { %2594 = vmatprep.subr.bf16.mxu1 %v2593_v6 }
  0x16   : > { %vm765_vm3 = vcmp.eq.s32.totalorder %v2842_v4, 4294967288  ;;  %vm678_vm6 = vcmp.eq.s32.totalorder %v2842_v4, 4294967287 }
  0x18   : > { %2596 = vmatpush3.bf16.msra.mxu1 %v2593_v6  ;;  %v1949_v6 = vld [vmem:[%s320_s16 + $0x10] sm:$0xff] }
  0x1b   : > { %2390 = vmatmul.mubr.msk.f32.vlgmr.msra.gmra.mrb[0].mxu1 %vm343_vm0, %v332_v7 }
  0x1c   : > { %2392 = vmatprep.mubr.msk.f32.mxu1 %vm343_vm0, %v333_v8 }
  0x1f   : > { %2393 = vmatmul.mubr.msk.f32.gmra.mrb[2].mxu1 %vm343_vm0, %v334_v9 }
  0x20   : > { %2403 = vmatprep.mubr.msk.f32.mxu1 %vm343_vm0, %v331_v0  ;;  %v774_v0 = vsub.s32 1, %v2831_v60 }
  0xee   : > { %v2391_v10 = vpop.f32.mrb[0].mxu1 }
  0xef   : > { %v422_v11 = vpop.f32.mrb[1].mxu1  ;;  %v445_v15 = vsel %vm441_vm1, %v2391_v10, 0.0 }
  0xf0   : > { %v442_v12 = vsel %vm441_vm1, %v422_v11, 0.0  ;;  %v661_v11 = vadd.s32 24, %v2831_v60 }
  0xf1   : > { %443 = vadd.xlane.f32.xlu0 %v442_v12 }
  0xf2   : > { %v2394_v13 = vpop.f32.mrb[2].mxu1 }
  0xf3   : > { %v432_v14 = vpop.f32.mrb[3].mxu1  ;;  %v451_v17 = vsel %vm441_vm1, %v2394_v13, 0.0  ;;  %v2863_v13 = vsub.s32 %v661_v11, %v667_v63 }
  0xf4   : > { %v448_v16 = vsel %vm441_vm1, %v432_v14, 0.0  ;;  %v662_v14 = vadd.s32 32, %v2831_v60 }
  0xf5   : > { %446 = vadd.xlane.f32.xlu0 %v445_v15  ;;  %449 = vadd.xlane.f32.xlu1 %v448_v16  ;;  %v663_v15 = vadd.s32 40, %v2831_v60  ;;  %vm767_vm9 = vcmp.eq.s32.totalorder %v2863_v13, 4294967288  ;;  %vm680_vm11 = vcmp.eq.s32.totalorder %v2863_v13, 4294967287 }
  0xf6   : > { %v2872_v16 = vsub.s32 %v662_v14, %v667_v63 }
  0xf8   : > { %vm768_vm14 = vcmp.eq.s32.totalorder %v2872_v16, 4294967288 }
  0xf9   : > { %452 = vadd.xlane.f32.xlu1 %v451_v17  ;;  %v2874_v17 = vsub.s32 %v663_v15, %v667_v63 }
  0xfb   : > { %vm769_vm15 = vcmp.eq.s32.totalorder %v2874_v17, 4294967288 }
 0x17e   : > { %v444_v18 = vpop.xlane.xlu0 %443 }
 0x17f   : > { %v454_v19 = vmul.f32 0.00390625, %v444_v18  ;;  %v664_v18 = vadd.s32 48, %v2831_v60 }
 0x181   : > { %v2767_v22 = vsub.f32 %v327_v1, %v454_v19  ;;  %v676_v1 = vld [vmem:[%s3220_s6] sm:$0x7]  ;;  %v665_v19 = vadd.s32 56, %v2831_v60 }
 0x182   : > { %v447_v20 = vpop.xlane.xlu0 %446  ;;  %v450_v21 = vpop.xlane.xlu1 %449 }
 0x183   : > { %v455_v23 = vmul.f32 0.00390625, %v447_v20  ;;  %v456_v24 = vmul.f32 0.00390625, %v450_v21  ;;  %v462_v27 = vmul.f32 %v2767_v22, %v2767_v22  ;;  %v2887_v20 = vsub.s32 %v664_v18, %v667_v63 }
 0x184   : > { %v2889_v21 = vsub.s32 %v665_v19, %v667_v63 }
 0x185   : > { %v2769_v25 = vsub.f32 %v328_v2, %v455_v23  ;;  %v2775_v29 = vsub.f32 %v329_v3, %v456_v24  ;;  %v687_v2 = vsub.s32 0, %v2831_v60  ;;  %v2840_v3 = vsub.s32 %v2831_v60, %v667_v63 }
 0x186   : > { %v453_v26 = vpop.xlane.xlu1 %452  ;;  %v966_v23 = vsub.s32 2, %v2831_v60 }
 0x187   : > { %v463_v28 = vmul.f32 %v2769_v25, %v2769_v25  ;;  %v457_v30 = vmul.f32 0.00390625, %v453_v26  ;;  %v464_v33 = vmul.f32 %v2775_v29, %v2775_v29  ;;  %vm764_vm2 = vcmp.eq.s32.totalorder %v2840_v3, 4294967288 }
 0x188   : > { %vm2100_vm4 = vmpackc.low %vm765_vm3, %vm764_vm2  ;;  %vm677_vm5 = vcmp.eq.s32.totalorder %v2840_v3, 4294967287  ;;  %vm681_vm3 = vcmp.eq.s32.totalorder %v2872_v16, 4294967287  ;;  %v2899_v24 = vrot.slane %v676_v1, %v966_v23 }
 0x189   : > { %v2777_v31 = vsub.f32 %v330_v5, %v457_v30  ;;  %v2597_v32 = vpack.c.bf16 %v463_v28, %v462_v27  ;;  %v2844_v5 = vrot.slane %v676_v1, %v774_v0  ;;  %vm2086_vm7 = vmpackc.low %vm678_vm6, %vm677_vm5  ;;  %vm770_vm6 = vcmp.eq.s32.totalorder %v2887_v20, 4294967288 }
 0x18a   : > { %vm2106_vm2 = vmpackc.low %vm769_vm15, %vm768_vm14  ;;  %v2905_v26 = vpack.c.bf16 %v2899_v24, %v2899_v24  ;;  %v2683_v27 = vmov 0.0  }
 0x18b   : > { %v465_v34 = vmul.f32 %v2777_v31, %v2777_v31  ;;  %2598 = vmatprep.subr.bf16.mxu1 %v2597_v32 }
 0x18c   : > { %2600 = vmatpush3.bf16.msra.mxu1 %v2597_v32 }
 0x18d   : > { %v2601_v35 = vpack.c.bf16 %v465_v34, %v464_v33 }
 0x18f   : > { %2602 = vmatprep.subr.bf16.mxu1 %v2601_v35 }
 0x190   : > { %2604 = vmatpush3.bf16.msra.mxu1 %v2601_v35 }
 0x193   : > { %2404 = vmatmul.mubr.msk.f32.vlgmr.msra.gmra.mrb[4].mxu1 %vm343_vm0, %v332_v7  ;;  %v688_v7 = vrot.slane %v676_v1, %v687_v2 }
 0x194   : > { %2406 = vmatprep.mubr.msk.f32.mxu1 %vm343_vm0, %v333_v8  ;;  %v2850_v8 = vpack.c.bf16 %v2844_v5, %v2844_v5 }
 0x195   : > { %v2853_v10 = vpack.c.bf16 %v688_v7, %v688_v7 }
 0x196   : > { %2421 = vmatprep.subr.msk.bf16.mxu1 %vm2100_vm4, %v2850_v8 }
 0x197   : > { %2407 = vmatmul.mubr.msk.f32.gmra.mrb[6].mxu1 %vm343_vm0, %v334_v9  ;;  %v660_v9 = vadd.s32 16, %v2831_v60  ;;  %2409 = vmatprep.subr.msk.bf16.mxu0 %vm2086_vm7, %v2853_v10 }
 0x198   : > { %2422 = vmatpush3.bf16.msk.msra.mxu1 %vm2100_vm4, %v2850_v8  ;;  %2410 = vmatpush3.bf16.msk.msra.mxu0 %vm2086_vm7, %v2853_v10  ;;  %vm682_vm4 = vcmp.eq.s32.totalorder %v2874_v17, 4294967287  ;;  %vm771_vm7 = vcmp.eq.s32.totalorder %v2889_v21, 4294967288 }
 0x199   : > { %v2859_v12 = vsub.s32 %v660_v9, %v667_v63  ;;  %vm2092_vm5 = vmpackc.low %vm682_vm4, %vm681_vm3  ;;  %vm960_vm4 = vcmp.eq.s32.totalorder %v2872_v16, 4294967289 }
 0x19b   : > { %vm766_vm8 = vcmp.eq.s32.totalorder %v2859_v12, 4294967288  ;;  %vm679_vm10 = vcmp.eq.s32.totalorder %v2859_v12, 4294967287  ;;  %vm958_vm15 = vcmp.eq.s32.totalorder %v2859_v12, 4294967289 }
 0x19c   : > { %vm2103_vm12 = vmpackc.low %vm767_vm9, %vm766_vm8  ;;  %vm683_vm9 = vcmp.eq.s32.totalorder %v2887_v20, 4294967287 }
 0x19d   : > { %2423 = vmatprep.subr.msk.bf16.mxu1 %vm2103_vm12, %v2850_v8  ;;  %vm2089_vm13 = vmpackc.low %vm680_vm11, %vm679_vm10  ;;  %vm684_vm10 = vcmp.eq.s32.totalorder %v2889_v21, 4294967287 }
 0x19e   : > { %2411 = vmatprep.subr.msk.bf16.mxu0 %vm2089_vm13, %v2853_v10  ;;  %2424 = vmatpush3.bf16.msk.msra.mxu1 %vm2103_vm12, %v2850_v8  ;;  %vm2109_vm8 = vmpackc.low %vm771_vm7, %vm770_vm6  ;;  %vm956_vm12 = vcmp.eq.s32.totalorder %v2840_v3, 4294967289  ;;  %vm962_vm7 = vcmp.eq.s32.totalorder %v2887_v20, 4294967289 }
 0x19f   : > { %2412 = vmatpush3.bf16.msk.msra.mxu0 %vm2089_vm13, %v2853_v10  ;;  %2425 = vmatprep.subr.msk.bf16.mxu1 %vm2106_vm2, %v2850_v8  ;;  %vm2095_vm11 = vmpackc.low %vm684_vm10, %vm683_vm9  ;;  %vm957_vm13 = vcmp.eq.s32.totalorder %v2842_v4, 4294967289  ;;  %vm1097_vm10 = vcmp.eq.s32.totalorder %v2840_v3, 4294967295 }
 0x1a0   : > { %2413 = vmatprep.subr.msk.bf16.mxu0 %vm2092_vm5, %v2853_v10  ;;  %vm2911_vm14 = vmpackc.low %vm957_vm13, %vm956_vm12  ;;  %vm1099_vm13 = vcmp.eq.s32.totalorder %v2859_v12, 4294967295 }
 0x1a2   : > { %2426 = vmatpush3.bf16.msk.msra.mxu1 %vm2106_vm2, %v2850_v8  ;;  %vm959_vm2 = vcmp.eq.s32.totalorder %v2863_v13, 4294967289 }
 0x1a3   : > { %2414 = vmatpush3.bf16.msk.msra.mxu0 %vm2092_vm5, %v2853_v10  ;;  %2427 = vmatprep.subr.msk.bf16.mxu1 %vm2109_vm8, %v2850_v8  ;;  %vm2125_vm3 = vmpackc.low %vm959_vm2, %vm958_vm15  ;;  %vm961_vm5 = vcmp.eq.s32.totalorder %v2874_v17, 4294967289  ;;  %vm1101_vm2 = vcmp.eq.s32.totalorder %v2872_v16, 4294967295 }
 0x1a4   : > { %2415 = vmatprep.subr.msk.bf16.mxu0 %vm2095_vm11, %v2853_v10  ;;  %vm2128_vm6 = vmpackc.low %vm961_vm5, %vm960_vm4  ;;  %vm1103_vm5 = vcmp.eq.s32.totalorder %v2887_v20, 4294967295 }
 0x1a6   : > { %2428 = vmatpush3.bf16.msk.msra.mxu1 %vm2109_vm8, %v2850_v8  ;;  %vm963_vm8 = vcmp.eq.s32.totalorder %v2889_v21, 4294967289 }
 0x1a7   : > { %2416 = vmatpush3.bf16.msk.msra.mxu0 %vm2095_vm11, %v2853_v10  ;;  %2449 = vmatprep.subr.msk.bf16.mxu1 %vm2911_vm14, %v2905_v26  ;;  %vm2131_vm9 = vmpackc.low %vm963_vm8, %vm962_vm7  ;;  %vm1098_vm11 = vcmp.eq.s32.totalorder %v2842_v4, 4294967295  ;;  %vm1371_vm8 = vcmp.eq.s32.totalorder %v2840_v3, 1 }
 0x1a8   : > { %vm2142_vm12 = vmpackc.low %vm1098_vm11, %vm1097_vm10  ;;  %vm1373_vm11 = vcmp.eq.s32.totalorder %v2859_v12, 1 }
 0x266   : > { %v2405_v37 = vpop.f32.mrb[4].mxu1 }
 0x267   : > { %v532_v38 = vpop.f32.mrb[5].mxu1  ;;  %v554_v39 = vsel %vm441_vm1, %v2405_v37, 0.0 }
 0x268   : > { %555 = vadd.xlane.f32.xlu1 %v554_v39  ;;  %v551_v40 = vsel %vm441_vm1, %v532_v38, 0.0 }
 0x269   : > { %552 = vadd.xlane.f32.xlu0 %v551_v40 }
 0x26a   : > { %v2408_v41 = vpop.f32.mrb[6].mxu1 }
 0x26b   : > { %v542_v42 = vpop.f32.mrb[7].mxu1  ;;  %v560_v43 = vsel %vm441_vm1, %v2408_v41, 0.0 }
 0x26c   : > { %561 = vadd.xlane.f32.xlu1 %v560_v43  ;;  %v557_v44 = vsel %vm441_vm1, %v542_v42, 0.0 }
 0x26d   : > { %558 = vadd.xlane.f32.xlu0 %v557_v44 }
 0x27d   : > { %586 = vperm.xlu1 %2649, %v336_v45  }
 0x281   : > { %591 = vperm.xlu1 %2649, %v337_v46  }
 0x283   : > { %581 = vperm.xlu0 %2648, %v335_v47  }
 0x285   : > { %596 = vperm.xlu1 %2649, %v338_v48  }
 0x287   : > { %1930 = vperm.xlu0 %2648, %v1920_v49  }
 0x289   : > { %605 = vperm.xlu1 %2649, %v339_v50  }
 0x28b   : > { %1940 = vperm.xlu0 %2648, %v1922_v51  }
 0x28d   : > { %610 = vperm.xlu1 %2649, %v340_v52  }
 0x28f   : > { %1958 = vperm.xlu0 %2648, %v1948_v53  }
 0x291   : > { %615 = vperm.xlu1 %2649, %v341_v54  }
 0x293   : > { %1968 = vperm.xlu0 %2648, %v1950_v55  }
 0x295   : > { %620 = vperm.xlu1 %2649, %v342_v56  }
 0x299   : > { %1925 = vperm.xlu1 %2649, %v1919_v57  }
 0x29d   : > { %1935 = vperm.xlu1 %2649, %v1921_v58  }
 0x2a1   : > { %1953 = vperm.xlu1 %2649, %v1947_v61  }
 0x2a5   : > { %1963 = vperm.xlu1 %2649, %v1949_v6  }
 0x2f5   : > { %v556_v28 = vpop.xlane.xlu1 %555 }
 0x2f6   : > { %v564_v30 = vmul.f32 0.00390625, %v556_v28  ;;  %v553_v32 = vpop.xlane.xlu0 %552 }
 0x2f7   : > { %v563_v33 = vmul.f32 0.00390625, %v553_v32 }
 0x2f8   : > { %v568_v34 = vadd.f32 1e-05, %v564_v30 }
 0x2f9   : > { %v567_v35 = vadd.f32 1e-05, %v563_v33  ;;  %v562_v36 = vpop.xlane.xlu1 %561 }
 0x2fa   : > { %2650 = vrsqrt.f32 %v568_v34  ;;  %v559_v37 = vpop.xlane.xlu0 %558  ;;  %v566_v38 = vmul.f32 0.00390625, %v562_v36 }
 0x2fb   : > { %2652 = vrsqrt.f32 %v567_v35  ;;  %v565_v39 = vmul.f32 0.00390625, %v559_v37 }
 0x2fc   : > { %v570_v42 = vadd.f32 1e-05, %v566_v38  ;;  %v2223_v38 = vpack.c.bf16 %v2844_v5, %v2683_v27  ;;  %v2114_v5 = vld [vmem:[%s3218_s4 + $0x20] sm:$0xff] }
 0x2fd   : > { %v569_v40 = vadd.f32 1e-05, %v565_v39  ;;  %v587_v41 = vpop.permute.xlu1 %586 }
 0x2ff   : > { %2654 = vrsqrt.f32 %v569_v40 }
 0x300   : > { %2656 = vrsqrt.f32 %v570_v42 }
 0x301   : > { %v592_v43 = vpop.permute.xlu1 %591 }
 0x302   : > { %v582_v48 = vpop.permute.xlu0 %581 }
 0x304   : > { %v2651_v44 = vpop.eup %2650 }
 0x305   : > { %v2653_v45 = vpop.eup %2652  ;;  %v597_v46 = vpop.permute.xlu1 %596  ;;  %v576_v49 = vmul.f32 %v2651_v44, %v2769_v25 }
 0x306   : > { %v575_v47 = vmul.f32 %v2653_v45, %v2767_v22 }
 0x307   : > { %v600_v54 = vmul.f32 %v587_v41, %v576_v49 }
 0x308   : > { %v599_v50 = vmul.f32 %v582_v48, %v575_v47 }
 0x309   : > { %v2655_v51 = vpop.eup %2654  ;;  %v606_v52 = vpop.permute.xlu1 %605 }
 0x30a   : > { %v623_v53 = vadd.f32 %v606_v52, %v599_v50  ;;  %v577_v55 = vmul.f32 %v2655_v51, %v2775_v29  ;;  %v2657_v57 = vpop.eup %2656  ;;  %v2116_v52 = vld [vmem:[%s3218_s4 + $0x30] sm:$0xff] }
 0x30b   : > { %v578_v61 = vmul.f32 %v2657_v57, %v2777_v31 }
 0x30c   : > { %v2082_v56 = vmul.f32 -1.442695, %v623_v53  ;;  %v601_v60 = vmul.f32 %v592_v43, %v577_v55  ;;  %v757_v55 = vld [vmem:[%s3218_s4 + $0x8] sm:$0xff] }
 0x30d   : > { %v611_v58 = vpop.permute.xlu1 %610  ;;  %v602_v25 = vmul.f32 %v597_v46, %v578_v61 }
 0x30e   : > { %2658 = vpow2.f32 %v2082_v56  ;;  %v624_v59 = vadd.f32 %v611_v58, %v600_v54  ;;  %v756_v54 = vld [vmem:[%s3218_s4] sm:$0xff] }
 0x30f   : > { %v760_v57 = vpack.c.bf16 %v757_v55, %v756_v54 }
 0x310   : > { %v2083_v62 = vmul.f32 -1.442695, %v624_v59 }
 0x311   : > { %v616_v22 = vpop.permute.xlu1 %615 }
 0x312   : > { %2660 = vpow2.f32 %v2083_v62  ;;  %v625_v63 = vadd.f32 %v616_v22, %v601_v60  ;;  %v758_v22 = vld [vmem:[%s3218_s4 + $0x10] sm:$0xff] }
 0x314   : > { %v2084_v0 = vmul.f32 -1.442695, %v625_v63 }
 0x315   : > { %v621_v1 = vpop.permute.xlu1 %620 }
 0x316   : > { %2662 = vpow2.f32 %v2084_v0  ;;  %v626_v2 = vadd.f32 %v621_v1, %v602_v25  ;;  %v2136_v0 = vld [vmem:[%s3218_s4 + $0x40] sm:$0xff]  ;;  %v2137_v1 = vld [vmem:[%s3218_s4 + $0x48] sm:$0xff] }
 0x318   : > { %v2659_v6 = vpop.eup %2658  ;;  %v2085_v7 = vmul.f32 -1.442695, %v626_v2 }
 0x319   : > { %v639_v29 = vadd.f32 1.0, %v2659_v6  ;;  %v1034_v6 = vpack.c.bf16 %v2137_v1, %v2136_v0  ;;  %v2198_v1 = vld [vmem:[%s3218_s4 + $0xb0] sm:$0xff] }
 0x31a   : > { %2664 = vpow2.f32 %v2085_v7  ;;  %v2138_v7 = vld [vmem:[%s3218_s4 + $0x50] sm:$0xff] }
 0x31b   : > { %2666 = vrcp.f32 %v639_v29  ;;  %v2139_v29 = vld [vmem:[%s3218_s4 + $0x58] sm:$0xff] }
 0x31c   : > { %v2661_v9 = vpop.eup %2660 }
 0x31d   : > { %v640_v11 = vadd.f32 1.0, %v2661_v9 }
 0x31f   : > { %2668 = vrcp.f32 %v640_v11  ;;  %v2156_v11 = vld [vmem:[%s3218_s4 + $0x60] sm:$0xff] }
 0x320   : > { %v2663_v14 = vpop.eup %2662 }
 0x321   : > { %v641_v15 = vadd.f32 1.0, %v2663_v14  ;;  %v2157_v14 = vld [vmem:[%s3218_s4 + $0x68] sm:$0xff] }
 0x323   : > { %2670 = vrcp.f32 %v641_v15 }
 0x324   : > { %v2665_v31 = vpop.eup %2664 }
 0x325   : > { %v642_v18 = vadd.f32 1.0, %v2665_v31  ;;  %v2667_v19 = vpop.eup %2666 }
 0x326   : > { %v651_v28 = vmul.f32 %v2667_v19, %v623_v53  ;;  %v2117_v53 = vld [vmem:[%s3218_s4 + $0x38] sm:$0xff] }
 0x327   : > { %2672 = vrcp.f32 %v642_v18  ;;  %v843_v56 = vpack.c.bf16 %v2117_v53, %v2116_v52  ;;  %v1035_v18 = vpack.c.bf16 %v2139_v29, %v2138_v7  ;;  %v2176_v53 = vld [vmem:[%s3218_s4 + $0x80] sm:$0xff]  ;;  %v2217_v7 = vld [vmem:[%s3218_s4 + $0xc8] sm:$0xff] }
 0x329   : > { %v2669_v23 = vpop.eup %2668 }
 0x32a   : > { %v652_v30 = vmul.f32 %v2669_v23, %v624_v59 }
 0x32c   : > { %v2922_v32 = vpack.c.bf16 %v652_v30, %v651_v28  ;;  %v1171_v28 = vpack.c.bf16 %v2157_v14, %v2156_v11  ;;  %v2218_v11 = vld [vmem:[%s3218_s4 + $0xd0] sm:$0xff]  ;;  %v2219_v14 = vld [vmem:[%s3218_s4 + $0xd8] sm:$0xff] }
 0x32d   : > { %v2671_v33 = vpop.eup %2670 }
 0x32e   : > { %2417 = vmatprep.mubr.msk.bf16.mxu0 %vm441_vm1, %v2922_v32  ;;  %2429 = vmatprep.mubr.msk.bf16.mxu1 %vm441_vm1, %v2922_v32  ;;  %v653_v35 = vmul.f32 %v2671_v33, %v625_v63  ;;  %v759_v63 = vld [vmem:[%s3218_s4 + $0x18] sm:$0xff] }
 0x331   : > { %v2673_v34 = vpop.eup %2672 }
 0x332   : > { %v654_v36 = vmul.f32 %v2673_v34, %v626_v2  ;;  %v761_v2 = vpack.c.bf16 %v759_v63, %v758_v22  ;;  %v2158_v34 = vld [vmem:[%s3218_s4 + $0x70] sm:$0xff]  ;;  %v2196_v22 = vld [vmem:[%s3218_s4 + $0xa0] sm:$0xff]  ;;  %v2197_v63 = vld [vmem:[%s3218_s4 + $0xa8] sm:$0xff] }
 0x333   : > { %v1445_v0 = vpack.c.bf16 %v2197_v63, %v2196_v22 }
 0x334   : > { %v2930_v37 = vpack.c.bf16 %v654_v36, %v653_v35  ;;  %v2159_v35 = vld [vmem:[%s3218_s4 + $0x78] sm:$0xff] }
 0x336   : > { %2418 = vmatmul.mubr.msk.bf16.vlgmr.msra.gmra.mrb[0].mxu0 %vm441_vm1, %v2930_v37  ;;  %2430 = vmatmul.mubr.msk.bf16.vlgmr.msra.gmra.mrb[8].mxu1 %vm441_vm1, %v2930_v37 }
 0x337   : > { %2450 = vmatpush3.bf16.msk.msra.mxu1 %vm2911_vm14, %v2905_v26  ;;  %2457 = vmatprep.mubr.msk.bf16.mxu1 %vm441_vm1, %v2922_v32  ;;  %vm1100_vm14 = vcmp.eq.s32.totalorder %v2863_v13, 4294967295 }
 0x338   : > { %2451 = vmatprep.subr.msk.bf16.mxu1 %vm2125_vm3, %v2905_v26  ;;  %vm2145_vm15 = vmpackc.low %vm1100_vm14, %vm1099_vm13  ;;  %vm1375_vm14 = vcmp.eq.s32.totalorder %v2872_v16, 1 }
 0x33b   : > { %2452 = vmatpush3.bf16.msk.msra.mxu1 %vm2125_vm3, %v2905_v26  ;;  %vm1102_vm3 = vcmp.eq.s32.totalorder %v2874_v17, 4294967295 }
 0x33c   : > { %2453 = vmatprep.subr.msk.bf16.mxu1 %vm2128_vm6, %v2905_v26  ;;  %vm2148_vm4 = vmpackc.low %vm1102_vm3, %vm1101_vm2  ;;  %vm1377_vm3 = vcmp.eq.s32.totalorder %v2887_v20, 1 }
 0x33f   : > { %2454 = vmatpush3.bf16.msk.msra.mxu1 %vm2128_vm6, %v2905_v26  ;;  %vm1104_vm6 = vcmp.eq.s32.totalorder %v2889_v21, 4294967295 }
 0x340   : > { %2455 = vmatprep.subr.msk.bf16.mxu1 %vm2131_vm9, %v2905_v26  ;;  %vm2151_vm7 = vmpackc.low %vm1104_vm6, %vm1103_vm5  ;;  %vm1508_vm6 = vcmp.eq.s32.totalorder %v2840_v3, 7 }
 0x343   : > { %2456 = vmatpush3.bf16.msk.msra.mxu1 %vm2131_vm9, %v2905_v26  ;;  %vm1372_vm9 = vcmp.eq.s32.totalorder %v2842_v4, 1 }
 0x344   : > { %2469 = vmatprep.subr.msk.bf16.mxu1 %vm2142_vm12, %v2853_v10  ;;  %vm2182_vm10 = vmpackc.low %vm1372_vm9, %vm1371_vm8  ;;  %vm1510_vm9 = vcmp.eq.s32.totalorder %v2859_v12, 7 }
 0x346   : > { %2458 = vmatmul.mubr.msk.bf16.vlgmr.msra.gmra.mrb[12].mxu1 %vm441_vm1, %v2930_v37 }
 0x347   : > { %2470 = vmatpush3.bf16.msk.msra.mxu1 %vm2142_vm12, %v2853_v10  ;;  %2477 = vmatprep.mubr.msk.bf16.mxu1 %vm441_vm1, %v2922_v32  ;;  %vm1374_vm12 = vcmp.eq.s32.totalorder %v2863_v13, 1 }
 0x348   : > { %2471 = vmatprep.subr.msk.bf16.mxu1 %vm2145_vm15, %v2853_v10  ;;  %vm2185_vm13 = vmpackc.low %vm1374_vm12, %vm1373_vm11  ;;  %vm1512_vm12 = vcmp.eq.s32.totalorder %v2872_v16, 7 }
 0x34b   : > { %2472 = vmatpush3.bf16.msk.msra.mxu1 %vm2145_vm15, %v2853_v10  ;;  %vm1376_vm15 = vcmp.eq.s32.totalorder %v2874_v17, 1 }
 0x34c   : > { %2473 = vmatprep.subr.msk.bf16.mxu1 %vm2148_vm4, %v2853_v10  ;;  %vm2188_vm2 = vmpackc.low %vm1376_vm15, %vm1375_vm14  ;;  %vm1514_vm15 = vcmp.eq.s32.totalorder %v2887_v20, 7 }
 0x34f   : > { %2474 = vmatpush3.bf16.msk.msra.mxu1 %vm2148_vm4, %v2853_v10  ;;  %vm1378_vm4 = vcmp.eq.s32.totalorder %v2889_v21, 1 }
 0x350   : > { %2475 = vmatprep.subr.msk.bf16.mxu1 %vm2151_vm7, %v2853_v10  ;;  %vm2191_vm5 = vmpackc.low %vm1378_vm4, %vm1377_vm3  ;;  %vm1646_vm4 = vcmp.eq.s32.totalorder %v2842_v4, 8 }
 0x353   : > { %2476 = vmatpush3.bf16.msk.msra.mxu1 %vm2151_vm7, %v2853_v10  ;;  %vm1509_vm7 = vcmp.eq.s32.totalorder %v2842_v4, 7 }
 0x354   : > { %2509 = vmatprep.subr.msk.bf16.mxu1 %vm2182_vm10, %v2905_v26  ;;  %vm2202_vm8 = vmpackc.low %vm1509_vm7, %vm1508_vm6  ;;  %vm1647_vm7 = vcmp.eq.s32.totalorder %v2859_v12, 8 }
 0x356   : > { %2478 = vmatmul.mubr.msk.bf16.vlgmr.msra.gmra.mrb[16].mxu1 %vm441_vm1, %v2930_v37 }
 0x357   : > { %2510 = vmatpush3.bf16.msk.msra.mxu1 %vm2182_vm10, %v2905_v26  ;;  %2517 = vmatprep.mubr.msk.bf16.mxu1 %vm441_vm1, %v2922_v32  ;;  %vm1511_vm10 = vcmp.eq.s32.totalorder %v2863_v13, 7 }
 0x358   : > { %2511 = vmatprep.subr.msk.bf16.mxu1 %vm2185_vm13, %v2905_v26  ;;  %vm2205_vm11 = vmpackc.low %vm1511_vm10, %vm1510_vm9  ;;  %vm1649_vm10 = vcmp.eq.s32.totalorder %v2872_v16, 8 }
 0x35b   : > { %2512 = vmatpush3.bf16.msk.msra.mxu1 %vm2185_vm13, %v2905_v26  ;;  %vm1513_vm13 = vcmp.eq.s32.totalorder %v2874_v17, 7 }
 0x35c   : > { %2513 = vmatprep.subr.msk.bf16.mxu1 %vm2188_vm2, %v2905_v26  ;;  %vm2208_vm14 = vmpackc.low %vm1513_vm13, %vm1512_vm12  ;;  %vm1651_vm13 = vcmp.eq.s32.totalorder %v2887_v20, 8 }
 0x35f   : > { %2514 = vmatpush3.bf16.msk.msra.mxu1 %vm2188_vm2, %v2905_v26  ;;  %vm1515_vm2 = vcmp.eq.s32.totalorder %v2889_v21, 7 }
 0x360   : > { %2515 = vmatprep.subr.msk.bf16.mxu1 %vm2191_vm5, %v2905_v26  ;;  %vm2211_vm3 = vmpackc.low %vm1515_vm2, %vm1514_vm15  ;;  %vm1234_vm2 = vcmp.eq.s32.totalorder %v2840_v3, 0  ;;  %v1172_v3 = vpack.c.bf16 %v2159_v35, %v2158_v34  ;;  %v1926_v34 = vpop.permute.xlu1 %1925  ;;  %v1931_v35 = vpop.permute.xlu0 %1930 }
 0x363   : > { %2516 = vmatpush3.bf16.msk.msra.mxu1 %vm2191_vm5, %v2905_v26  ;;  %vm2684_vm5 = vmmov 1  }
 0x364   : > { %2529 = vmatprep.subr.msk.bf16.mxu1 %vm2202_vm8, %v2853_v10  ;;  %vm2222_vm6 = vmpackc.low %vm1646_vm4, %vm2684_vm5 }
 0x366   : > { %2518 = vmatmul.mubr.msk.bf16.vlgmr.msra.gmra.mrb[20].mxu1 %vm441_vm1, %v2930_v37 }
 0x367   : > { %2530 = vmatpush3.bf16.msk.msra.mxu1 %vm2202_vm8, %v2853_v10  ;;  %2537 = vmatprep.mubr.msk.bf16.mxu1 %vm441_vm1, %v2922_v32  ;;  %vm1648_vm8 = vcmp.eq.s32.totalorder %v2863_v13, 8 }
 0x368   : > { %2531 = vmatprep.subr.msk.bf16.mxu1 %vm2205_vm11, %v2853_v10  ;;  %vm2225_vm9 = vmpackc.low %vm1648_vm8, %vm1647_vm7  ;;  %vm1237_vm7 = vcmp.eq.s32.totalorder %v2863_v13, 0 }
 0x36b   : > { %2532 = vmatpush3.bf16.msk.msra.mxu1 %vm2205_vm11, %v2853_v10  ;;  %vm1650_vm11 = vcmp.eq.s32.totalorder %v2874_v17, 8 }
 0x36c   : > { %2533 = vmatprep.subr.msk.bf16.mxu1 %vm2208_vm14, %v2853_v10  ;;  %vm2228_vm12 = vmpackc.low %vm1650_vm11, %vm1649_vm10  ;;  %vm1239_vm10 = vcmp.eq.s32.totalorder %v2874_v17, 0 }
 0x36f   : > { %2534 = vmatpush3.bf16.msk.msra.mxu1 %vm2208_vm14, %v2853_v10  ;;  %vm1652_vm14 = vcmp.eq.s32.totalorder %v2889_v21, 8 }
 0x370   : > { %2535 = vmatprep.subr.msk.bf16.mxu1 %vm2211_vm3, %v2853_v10  ;;  %vm2231_vm15 = vmpackc.low %vm1652_vm14, %vm1651_vm13  ;;  %vm1241_vm13 = vcmp.eq.s32.totalorder %v2889_v21, 0 }
 0x373   : > { %2536 = vmatpush3.bf16.msk.msra.mxu1 %vm2211_vm3, %v2853_v10  ;;  %v2115_v10 = vld [vmem:[%s3218_s4 + $0x28] sm:$0xff]  ;;  %vm1235_vm3 = vcmp.eq.s32.totalorder %v2842_v4, 0 }
 0x374   : > { %2549 = vmatprep.subr.msk.bf16.mxu1 %vm2222_vm6, %v2223_v38  ;;  %v842_v39 = vpack.c.bf16 %v2115_v10, %v2114_v5  ;;  %vm3084_vm4 = vmpackc.low %vm1235_vm3, %vm1234_vm2  ;;  %vm1784_vm3 = vcmp.eq.s32.totalorder %v2859_v12, 9 }
 0x376   : > { %2538 = vmatmul.mubr.msk.bf16.vlgmr.msra.gmra.mrb[24].mxu1 %vm441_vm1, %v2930_v37  ;;  %2437 = vmatprep.mubr.msk.bf16.mxu0 %vm343_vm0, %v842_v39 }
 0x377   : > { %2550 = vmatpush3.bf16.msk.msra.mxu1 %vm2222_vm6, %v2223_v38  ;;  %2557 = vmatprep.mubr.msk.bf16.mxu1 %vm441_vm1, %v2922_v32  ;;  %vm1236_vm6 = vcmp.eq.s32.totalorder %v2859_v12, 0  ;;  %v2256_v12 = vld [vmem:[%s3218_s4 + $0x100] sm:$0xff] }
 0x378   : > { %2551 = vmatprep.subr.msk.bf16.mxu1 %vm2225_vm9, %v2850_v8  ;;  %vm2165_vm8 = vmpackc.low %vm1237_vm7, %vm1236_vm6  ;;  %vm1787_vm7 = vcmp.eq.s32.totalorder %v2874_v17, 9 }
 0x37b   : > { %2552 = vmatpush3.bf16.msk.msra.mxu1 %vm2225_vm9, %v2850_v8  ;;  %vm1238_vm9 = vcmp.eq.s32.totalorder %v2872_v16, 0 }
 0x37c   : > { %2553 = vmatprep.subr.msk.bf16.mxu1 %vm2228_vm12, %v2850_v8  ;;  %vm2168_vm11 = vmpackc.low %vm1239_vm10, %vm1238_vm9  ;;  %vm1788_vm9 = vcmp.eq.s32.totalorder %v2887_v20, 9  ;;  %vm1789_vm10 = vcmp.eq.s32.totalorder %v2889_v21, 9 }
 0x37f   : > { %2554 = vmatpush3.bf16.msk.msra.mxu1 %vm2228_vm12, %v2850_v8  ;;  %vm1240_vm12 = vcmp.eq.s32.totalorder %v2887_v20, 0 }
 0x380   : > { %2555 = vmatprep.subr.msk.bf16.mxu1 %vm2231_vm15, %v2850_v8  ;;  %vm2171_vm14 = vmpackc.low %vm1241_vm13, %vm1240_vm12 }
 0x383   : > { %2556 = vmatpush3.bf16.msk.msra.mxu1 %vm2231_vm15, %v2850_v8  ;;  %vm1783_vm15 = vcmp.eq.s32.totalorder %v2842_v4, 9 }
 0x384   : > { %vm2242_vm2 = vmpackc.low %vm1783_vm15, %vm2684_vm5  ;;  %vm1786_vm5 = vcmp.eq.s32.totalorder %v2872_v16, 9 }
 0x386   : > { %2558 = vmatmul.mubr.msk.bf16.vlgmr.msra.gmra.mrb[28].mxu1 %vm441_vm1, %v2930_v37 }
 0x409   : > { %v2419_v40 = vpop.f32.mrb[0].mxu0  ;;  %v2431_v41 = vpop.f32.mrb[8].mxu1 }
 0x40a   : > { %v741_v42 = vpop.f32.mrb[1].mxu0  ;;  %v822_v43 = vpop.f32.mrb[9].mxu1 }
 0x40b   : > { %v2420_v44 = vpop.f32.mrb[2].mxu0  ;;  %v2432_v45 = vpop.f32.mrb[10].mxu1 }
 0x40c   : > { %v763_v46 = vpack.c.bf16 %v2420_v44, %v2419_v40  ;;  %v845_v47 = vpack.c.bf16 %v2432_v45, %v2431_v41  ;;  %v744_v48 = vpop.f32.mrb[3].mxu0  ;;  %v825_v49 = vpop.f32.mrb[11].mxu1 }
 0x40d   : > { %v762_v50 = vpack.c.bf16 %v744_v48, %v741_v42  ;;  %v844_v51 = vpack.c.bf16 %v825_v49, %v822_v43 }
 0x40f   : > { %2433 = vmatprep.subr.bf16.mxu0 %v844_v51 }
 0x410   : > { %2434 = vmatpush3.bf16.msra.mxu0 %v844_v51 }
 0x411   : > { %2435 = vmatprep.subr.bf16.mxu0 %v845_v47 }
 0x414   : > { %2436 = vmatpush3.bf16.msra.mxu0 %v845_v47 }
 0x415   : > { %2441 = vmatprep.subr.bf16.mxu0 %v762_v50 }
 0x417   : > { %2438 = vmatmul.mubr.msk.bf16.vlgmr.msra.gmra.mrb[4].mxu0 %vm343_vm0, %v843_v56 }
 0x418   : > { %2442 = vmatpush3.bf16.msra.mxu0 %v762_v50  ;;  %2445 = vmatprep.mubr.msk.bf16.mxu0 %vm343_vm0, %v760_v57 }
 0x419   : > { %v2459_v58 = vpop.f32.mrb[12].mxu1  ;;  %2443 = vmatprep.subr.bf16.mxu0 %v763_v46 }
 0x41a   : > { %v1014_v59 = vpop.f32.mrb[13].mxu1 }
 0x41b   : > { %v2460_v60 = vpop.f32.mrb[14].mxu1 }
 0x41c   : > { %v1037_v61 = vpack.c.bf16 %v2460_v60, %v2459_v58  ;;  %v1017_v62 = vpop.f32.mrb[15].mxu1  ;;  %2444 = vmatpush3.bf16.msra.mxu0 %v763_v46 }
 0x41d   : > { %v1036_v25 = vpack.c.bf16 %v1017_v62, %v1014_v59  ;;  %v2179_v62 = vld [vmem:[%s3218_s4 + $0x98] sm:$0xff] }
 0x41f   : > { %2461 = vmatprep.subr.bf16.mxu0 %v1036_v25 }
 0x423   : > { %2446 = vmatmul.mubr.msk.bf16.vlgmr.msra.gmra.mrb[4].mxu0 %vm343_vm0, %v761_v2  ;;  %v2199_v2 = vld [vmem:[%s3218_s4 + $0xb8] sm:$0xff] }
 0x424   : > { %2462 = vmatpush3.bf16.msra.mxu0 %v1036_v25  ;;  %2465 = vmatprep.mubr.msk.bf16.mxu0 %vm343_vm0, %v1034_v6  ;;  %v2216_v6 = vld [vmem:[%s3218_s4 + $0xc0] sm:$0xff]  ;;  %v1446_v29 = vpack.c.bf16 %v2199_v2, %v2198_v1 }
 0x425   : > { %2463 = vmatprep.subr.bf16.mxu0 %v1037_v61 }
 0x428   : > { %2464 = vmatpush3.bf16.msra.mxu0 %v1037_v61  ;;  %v2178_v61 = vld [vmem:[%s3218_s4 + $0x90] sm:$0xff] }
 0x429   : > { %v2479_v9 = vpop.f32.mrb[16].mxu1  ;;  %v1309_v25 = vpack.c.bf16 %v2179_v62, %v2178_v61 }
 0x42a   : > { %v1151_v15 = vpop.f32.mrb[17].mxu1 }
 0x42b   : > { %v2480_v31 = vpop.f32.mrb[18].mxu1 }
 0x42c   : > { %v1174_v19 = vpack.c.bf16 %v2480_v31, %v2479_v9  ;;  %v1154_v23 = vpop.f32.mrb[19].mxu1  ;;  %v1582_v9 = vpack.c.bf16 %v2217_v7, %v2216_v6  ;;  %v2237_v31 = vld [vmem:[%s3218_s4 + $0xe8] sm:$0xff] }
 0x42d   : > { %v1173_v30 = vpack.c.bf16 %v1154_v23, %v1151_v15  ;;  %v2236_v15 = vld [vmem:[%s3218_s4 + $0xe0] sm:$0xff]  ;;  %v2243_v23 = vpack.c.bf16 %v2899_v24, %v2683_v27  ;;  %v2259_v27 = vld [vmem:[%s3218_s4 + $0x118] sm:$0xff] }
 0x42f   : > { %2481 = vmatprep.subr.bf16.mxu0 %v1173_v30  ;;  %2466 = vmatmul.mubr.msk.bf16.vlgmr.msra.gmra.mrb[4].mxu0 %vm343_vm0, %v1035_v18  ;;  %v1583_v18 = vpack.c.bf16 %v2219_v14, %v2218_v11 }
 0x430   : > { %2482 = vmatpush3.bf16.msra.mxu0 %v1173_v30  ;;  %2485 = vmatprep.mubr.msk.bf16.mxu0 %vm343_vm0, %v1171_v28  ;;  %v2238_v28 = vld [vmem:[%s3218_s4 + $0xf0] sm:$0xff]  ;;  %v2239_v30 = vld [vmem:[%s3218_s4 + $0xf8] sm:$0xff] }
 0x431   : > { %2483 = vmatprep.subr.bf16.mxu0 %v1174_v19  ;;  %v1720_v4 = vpack.c.bf16 %v2239_v30, %v2238_v28 }
 0x434   : > { %2484 = vmatpush3.bf16.msra.mxu0 %v1174_v19  ;;  %v1719_v19 = vpack.c.bf16 %v2237_v31, %v2236_v15 }
 0x435   : > { %2489 = vmatprep.subr.msk.bf16.mxu0 %vm3084_vm4, %v2850_v8 }
 0x439   : > { %v2519_v36 = vpop.f32.mrb[20].mxu1 }
 0x43a   : > { %v1425_v38 = vpop.f32.mrb[21].mxu1 }
 0x43b   : > { %v2520_v5 = vpop.f32.mrb[22].mxu1  ;;  %2486 = vmatmul.mubr.msk.bf16.vlgmr.msra.gmra.mrb[4].mxu0 %vm343_vm0, %v1172_v3  ;;  %v1936_v3 = vpop.permute.xlu1 %1935 }
 0x43c   : > { %v1448_v10 = vpack.c.bf16 %v2520_v5, %v2519_v36  ;;  %2490 = vmatpush3.bf16.msk.msra.mxu0 %vm3084_vm4, %v2850_v8  ;;  %v1428_v39 = vpop.f32.mrb[23].mxu1  ;;  %2497 = vmatprep.mubr.msk.bf16.mxu0 %vm441_vm1, %v2922_v32  ;;  %vm1785_vm4 = vcmp.eq.s32.totalorder %v2863_v13, 9  ;;  %v2257_v13 = vld [vmem:[%s3218_s4 + $0x108] sm:$0xff]  ;;  %v1941_v36 = vpop.permute.xlu0 %1940 }
 0x43d   : > { %v1447_v40 = vpack.c.bf16 %v1428_v39, %v1425_v38  ;;  %2491 = vmatprep.subr.msk.bf16.mxu0 %vm2165_vm8, %v2850_v8  ;;  %vm2245_vm6 = vmpackc.low %vm1785_vm4, %vm1784_vm3  ;;  %v1856_v16 = vpack.c.bf16 %v2257_v13, %v2256_v12 }
 0x43f   : > { %v1954_v38 = vpop.permute.xlu1 %1953 }
 0x440   : > { %2492 = vmatpush3.bf16.msk.msra.mxu0 %vm2165_vm8, %v2850_v8  ;;  %vm2248_vm8 = vmpackc.low %vm1787_vm7, %vm1786_vm5  ;;  %v1959_v5 = vpop.permute.xlu0 %1958 }
 0x441   : > { %2493 = vmatprep.subr.msk.bf16.mxu0 %vm2168_vm11, %v2850_v8 }
 0x444   : > { %2494 = vmatpush3.bf16.msk.msra.mxu0 %vm2168_vm11, %v2850_v8  ;;  %vm2251_vm11 = vmpackc.low %vm1789_vm10, %vm1788_vm9 }
 0x445   : > { %2495 = vmatprep.subr.msk.bf16.mxu0 %vm2171_vm14, %v2850_v8 }
 0x448   : > { %2496 = vmatpush3.bf16.msk.msra.mxu0 %vm2171_vm14, %v2850_v8  ;;  %v2177_v8 = vld [vmem:[%s3218_s4 + $0x88] sm:$0xff] }
 0x449   : > { %v2539_v41 = vpop.f32.mrb[24].mxu1  ;;  %v1308_v54 = vpack.c.bf16 %v2177_v8, %v2176_v53 }
 0x44a   : > { %v1562_v42 = vpop.f32.mrb[25].mxu1 }
 0x44b   : > { %2498 = vmatmul.mubr.msk.bf16.vlgmr.msra.gmra.mrb[8].mxu0 %vm441_vm1, %v2930_v37  ;;  %v2540_v43 = vpop.f32.mrb[26].mxu1 }
 0x44c   : > { %v1585_v44 = vpack.c.bf16 %v2540_v43, %v2539_v41  ;;  %v1565_v45 = vpop.f32.mrb[27].mxu1  ;;  %2505 = vmatprep.mubr.msk.bf16.mxu0 %vm343_vm0, %v1308_v54  ;;  %v1964_v41 = vpop.permute.xlu1 %1963 }
 0x44d   : > { %v1584_v46 = vpack.c.bf16 %v1565_v45, %v1562_v42 }
 0x459   : > { %v2559_v47 = vpop.f32.mrb[28].mxu1 }
 0x45a   : > { %v1699_v48 = vpop.f32.mrb[29].mxu1 }
 0x45b   : > { %v2560_v49 = vpop.f32.mrb[30].mxu1 }
 0x45c   : > { %v1722_v50 = vpack.c.bf16 %v2560_v49, %v2559_v47  ;;  %v1702_v51 = vpop.f32.mrb[31].mxu1  ;;  %v1969_v47 = vpop.permute.xlu0 %1968 }
 0x45d   : > { %v1721_v52 = vpack.c.bf16 %v1702_v51, %v1699_v48 }
 0x51e   : > { %v2499_v55 = vpop.f32.mrb[8].mxu0 }
 0x51f   : > { %v1288_v56 = vpop.f32.mrb[9].mxu0 }
 0x520   : > { %v2500_v57 = vpop.f32.mrb[10].mxu0 }
 0x521   : > { %v1311_v58 = vpack.c.bf16 %v2500_v57, %v2499_v55  ;;  %v1291_v59 = vpop.f32.mrb[11].mxu0 }
 0x522   : > { %v1310_v60 = vpack.c.bf16 %v1291_v59, %v1288_v56 }
 0x524   : > { %2501 = vmatprep.subr.bf16.mxu0 %v1310_v60 }
 0x525   : > { %2502 = vmatpush3.bf16.msra.mxu0 %v1310_v60 }
 0x526   : > { %2503 = vmatprep.subr.bf16.mxu0 %v1311_v58 }
 0x529   : > { %2504 = vmatpush3.bf16.msra.mxu0 %v1311_v58 }
 0x52a   : > { %2521 = vmatprep.subr.bf16.mxu0 %v1447_v40 }
 0x52c   : > { %2506 = vmatmul.mubr.msk.bf16.vlgmr.msra.gmra.mrb[4].mxu0 %vm343_vm0, %v1309_v25 }
 0x52d   : > { %2522 = vmatpush3.bf16.msra.mxu0 %v1447_v40  ;;  %2525 = vmatprep.mubr.msk.bf16.mxu0 %vm343_vm0, %v1445_v0 }
 0x52e   : > { %2523 = vmatprep.subr.bf16.mxu0 %v1448_v10 }
 0x531   : > { %2524 = vmatpush3.bf16.msra.mxu0 %v1448_v10 }
 0x532   : > { %2541 = vmatprep.subr.bf16.mxu0 %v1584_v46 }
 0x538   : > { %2526 = vmatmul.mubr.msk.bf16.vlgmr.msra.gmra.mrb[4].mxu0 %vm343_vm0, %v1446_v29 }
 0x539   : > { %2542 = vmatpush3.bf16.msra.mxu0 %v1584_v46  ;;  %2545 = vmatprep.mubr.msk.bf16.mxu0 %vm343_vm0, %v1582_v9 }
 0x53a   : > { %2543 = vmatprep.subr.bf16.mxu0 %v1585_v44 }
 0x53d   : > { %2544 = vmatpush3.bf16.msra.mxu0 %v1585_v44 }
 0x53e   : > { %2561 = vmatprep.subr.bf16.mxu0 %v1721_v52 }
 0x544   : > { %2546 = vmatmul.mubr.msk.bf16.vlgmr.msra.gmra.mrb[4].mxu0 %vm343_vm0, %v1583_v18 }
 0x545   : > { %2562 = vmatpush3.bf16.msra.mxu0 %v1721_v52  ;;  %2565 = vmatprep.mubr.msk.bf16.mxu0 %vm343_vm0, %v1719_v19 }
 0x546   : > { %2563 = vmatprep.subr.bf16.mxu0 %v1722_v50 }
 0x549   : > { %2564 = vmatpush3.bf16.msra.mxu0 %v1722_v50 }
 0x54a   : > { %2569 = vmatprep.subr.msk.bf16.mxu0 %vm2242_vm2, %v2243_v23 }
 0x550   : > { %2566 = vmatmul.mubr.msk.bf16.vlgmr.msra.gmra.mrb[4].mxu0 %vm343_vm0, %v1720_v4 }
 0x551   : > { %2570 = vmatpush3.bf16.msk.msra.mxu0 %vm2242_vm2, %v2243_v23  ;;  %2577 = vmatprep.mubr.msk.bf16.mxu0 %vm441_vm1, %v2922_v32 }
 0x552   : > { %2571 = vmatprep.subr.msk.bf16.mxu0 %vm2245_vm6, %v2905_v26 }
 0x555   : > { %2572 = vmatpush3.bf16.msk.msra.mxu0 %vm2245_vm6, %v2905_v26 }
 0x556   : > { %2573 = vmatprep.subr.msk.bf16.mxu0 %vm2248_vm8, %v2905_v26 }
 0x559   : > { %2574 = vmatpush3.bf16.msk.msra.mxu0 %vm2248_vm8, %v2905_v26 }
 0x55a   : > { %2575 = vmatprep.subr.msk.bf16.mxu0 %vm2251_vm11, %v2905_v26 }
 0x55d   : > { %2576 = vmatpush3.bf16.msk.msra.mxu0 %vm2251_vm11, %v2905_v26 }
 0x560   : > { %2578 = vmatmul.mubr.msk.bf16.vlgmr.msra.gmra.mrb[12].mxu0 %vm441_vm1, %v2930_v37  ;;  %v2258_v37 = vld [vmem:[%s3218_s4 + $0x110] sm:$0xff] }
 0x561   : > { %2585 = vmatprep.mubr.msk.bf16.mxu0 %vm343_vm0, %v1856_v16  ;;  %v1857_v33 = vpack.c.bf16 %v2259_v27, %v2258_v37 }
 0x633   : > { %v2579_v17 = vpop.f32.mrb[12].mxu0 }
 0x634   : > { %v1836_v20 = vpop.f32.mrb[13].mxu0 }
 0x635   : > { %v2580_v21 = vpop.f32.mrb[14].mxu0 }
 0x636   : > { %v1859_v24 = vpack.c.bf16 %v2580_v21, %v2579_v17  ;;  %v1839_v32 = vpop.f32.mrb[15].mxu0 }
 0x637   : > { %v1858_v26 = vpack.c.bf16 %v1839_v32, %v1836_v20 }
 0x639   : > { %2581 = vmatprep.subr.bf16.mxu0 %v1858_v26 }
 0x63a   : > { %2582 = vmatpush3.bf16.msra.mxu0 %v1858_v26 }
 0x63b   : > { %2583 = vmatprep.subr.bf16.mxu0 %v1859_v24 }
 0x63e   : > { %2584 = vmatpush3.bf16.msra.mxu0 %v1859_v24 }
 0x641   : > { %2586 = vmatmul.mubr.msk.bf16.vlgmr.msra.gmra.mrb[4].mxu0 %vm343_vm0, %v1857_v33  ;;  %vm1991_vm0 = vcmask 519168  }
 0x714   : > { %v2587_v10 = vpop.f32.mrb[4].mxu0 }
 0x715   : > { %v1945_v39 = vadd.f32 %v2587_v10, %v1936_v3  ;;  %v1900_v40 = vpop.f32.mrb[5].mxu0 }
 0x716   : > { %v1943_v42 = vadd.f32 %v1926_v34, %v1900_v40  ;;  %v2588_v43 = vpop.f32.mrb[6].mxu0 }
 0x717   : > { %v1973_v44 = vadd.f32 %v1964_v41, %v1945_v39  ;;  %v1946_v45 = vadd.f32 %v2588_v43, %v1941_v36  ;;  %v1903_v46 = vpop.f32.mrb[7].mxu0 }
 0x718   : > { %v1971_v48 = vadd.f32 %v1954_v38, %v1943_v42  ;;  %v1944_v49 = vadd.f32 %v1931_v35, %v1903_v46 }
 0x719   : > { %v2273_v50 = vpack.c.bf16 %v1973_v44, %v1973_v44  ;;  %v1974_v51 = vadd.f32 %v1969_v47, %v1946_v45 }
 0x71a   : > { %v2271_v52 = vpack.c.bf16 %v1971_v48, %v1971_v48  ;;  %v1972_v53 = vadd.f32 %v1959_v5, %v1944_v49 }
 0x71b   : > { %1994 = vst.msk [vmem:[%s325_s23 + $0x8] sm:$0xf] %vm1991_vm0, %v2273_v50  ;;  %v2274_v8 = vpack.c.bf16 %v1974_v51, %v1974_v51 }
 0x71c   : > { %1992 = vst.msk [vmem:[%s325_s23] sm:$0xf] %vm1991_vm0, %v2271_v52  ;;  %v2272_v54 = vpack.c.bf16 %v1972_v53, %v1972_v53 }
 0x71d   : > { %1995 = vst.msk [vmem:[%s325_s23 + $0xc] sm:$0xf] %vm1991_vm0, %v2274_v8 }
 0x71e   : > { %1993 = vst.msk [vmem:[%s325_s23 + $0x4] sm:$0xf] %vm1991_vm0, %v2272_v54 }
 0x71f PF: > { %s18_s27 = sadd.s32 1, %s2680_s27  }
 0x720   : > { %p15_p4 = scmp.ge.s32.totalorder %s18_s27, 4  }
 0x722   :  { %17 = sbr.rel (!%p15_p4) target bundleno = 1 (0x1), region = 93 }

// kernel: middle_block_forward.9
= control target key start
LH: loop header
LB: loop body
LE: loop exit
PB: predicated region body
PF: predicated region fallthrough
CT: control target
= control target key end

     0   :  { %s2698_s27 = smov 0   ;;  %s3169_s0 = inlined_call_operand.vmem [shape: bf16[2,32,64], index: 0, kind: input, shape index: {}]   ;;  %s3170_s1 = inlined_call_operand.vmem [shape: f32[32,32], index: 1, kind: input, shape index: {}]   ;;  %s3171_s2 = inlined_call_operand.vmem [shape: f32[32,1], index: 2, kind: input, shape index: {}]   ;;  %s3172_s3 = inlined_call_operand.vmem [shape: f32[32,1], index: 3, kind: input, shape index: {}]   ;;  %s3173_s4 = inlined_call_operand.vmem [shape: f32[9,32,32], index: 4, kind: input, shape index: {}]   ;;  %s3174_s5 = inlined_call_operand.vmem [shape: f32[32,1], index: 5, kind: input, shape index: {}]   ;;  %s3175_s6 = inlined_call_operand.vmem [shape: f32[3,64], index: 6, kind: input, shape index: {}]   ;;  %s3176_s7 = inlined_call_operand.vmem [shape: f32[2,32,64], index: 7, kind: input, shape index: {}]   ;;  %s3177_s8 = inlined_call_operand.vmem [shape: f32[2,32,64], index: 8, kind: output, shape index: {}]  }
   0x1 LB: > { %s2030_s28 = sadd.s32 4294967295, %s2648_s27   ;;  %p2034_p0 = scmp.ge.s32.totalorder %s2648_s27, 1  ;;  %s2648_s27 = sphi %s2698_s27, %s18_s27  }
   0x2   : > { %p272_p1 = scmp.lt.s32.totalorder %s2648_s27, 3 }
   0x4   : > { %p273_p2 = pnand %p2034_p0, %p272_p1 }
   0x5   : > { %p311_p3 = scmp.lt.s32.totalorder (!%p273_p2), %s2030_s28, 1  ;;  %v335_v0 = vld [vmem:[%s3170_s1] sm:$0xff] (!%p273_p2)  ;;  %vm347_vm0 = vcmask (!%p273_p2), 261120   ;;  %v336_v3 = vld [vmem:[%s3170_s1 + $0x8] sm:$0xff] (!%p273_p2)  ;;  %v337_v4 = vld [vmem:[%s3170_s1 + $0x10] sm:$0xff] (!%p273_p2)  ;;  %vm445_vm1 = vcmask (!%p273_p2), 523264   ;;  %v661_v57 = vlaneseq (!%p273_p2) }
   0x6   : > { %276 = sbr.rel (%p273_p2) target bundleno = 1819 (0x71b), region = 52  ;;  %2357 = vmatprep.mubr.msk.f32.mxu1 (!%p273_p2), %vm347_vm0, %v335_v0  ;;  %v338_v5 = vld [vmem:[%s3170_s1 + $0x18] sm:$0xff] (!%p273_p2)  ;;  %v2650_v36 = vmov (!%p273_p2), 0   ;;  %v340_v45 = vld [vmem:[%s3171_s2 + $0x8] sm:$0xff] (!%p273_p2)  ;;  %v341_v46 = vld [vmem:[%s3171_s2 + $0x10] sm:$0xff] (!%p273_p2) }
   0x7   : > { %2617 = vset.pattern.permute.xlu1 (!%p273_p2), %v2650_v36  ;;  %2616 = vset.pattern.permute.xlu0 (!%p273_p2), %v2650_v36  ;;  %v339_v47 = vld [vmem:[%s3171_s2] sm:$0xff] (!%p273_p2)  ;;  %v342_v48 = vld [vmem:[%s3171_s2 + $0x18] sm:$0xff] (!%p273_p2)  ;;  %v1924_v49 = vld [vmem:[%s3174_s5 + $0x8] sm:$0xff] (!%p273_p2)  ;;  %v662_v58 = vshrl.u32 (!%p273_p2), %v661_v57, 7  ;;  %v671_v60 = vand.u32 (!%p273_p2), 127, %v661_v57 }
   0x8   : > { %v343_v50 = vld [vmem:[%s3172_s3] sm:$0xff] (!%p273_p2)  ;;  %v1926_v51 = vld [vmem:[%s3174_s5 + $0x18] sm:$0xff] (!%p273_p2)  ;;  %v344_v52 = vld [vmem:[%s3172_s3 + $0x8] sm:$0xff] (!%p273_p2) }
   0x9   : > { %v345_v53 = vld [vmem:[%s3172_s3 + $0x10] sm:$0xff] (!%p273_p2)  ;;  %v346_v54 = vld [vmem:[%s3172_s3 + $0x18] sm:$0xff] (!%p273_p2)  ;;  %v1923_v55 = vld [vmem:[%s3174_s5] sm:$0xff] (!%p273_p2)  ;;  %v663_v59 = vadd.s32 (!%p273_p2), 8, %v662_v58  ;;  %v778_v61 = vsub.s32 (!%p273_p2), 1, %v662_v58  ;;  %v691_v63 = vsub.s32 (!%p273_p2), 0, %v662_v58 }
   0xa   : > { %v1925_v56 = vld [vmem:[%s3174_s5 + $0x10] sm:$0xff] (!%p273_p2)  ;;  %v680_v62 = vld [vmem:[%s3175_s6] sm:$0x7] (!%p273_p2) }
   0xd   : > { %s3183_s28 = smov (!%p311_p3, %s2030_s28), 1 }
   0xe   : > { %s2231_s9 = sshll.u32 %s3183_s28, 4  ;;  %s2232_s17 = sshll.u32 %s3183_s28, 5 }
   0xf   : > { %s315_s12 = scalar_lea.vmem %s3169_s0, %s2231_s9  ;;  %s320_s20 = scalar_lea.vmem %s3176_s7, %s2232_s17 }
  0x10   : > { %v2235_v1 = vld [vmem:[%s315_s12] sm:$0xff]   ;;  %v2242_v2 = vld [vmem:[%s315_s12 + $0x8] sm:$0xff]   ;;  %s325_s23 = scalar_lea.vmem %s3177_s8, %s2232_s17 }
  0x11   : > { %2558 = vmatprep.subr.bf16.mxu1 %v2235_v1  ;;  %v2236_v15 = vunpack.c.l.bf16 %v2235_v1  ;;  %v2237_v17 = vunpack.c.h.bf16 %v2235_v1  ;;  %v2240_v22 = vunpack.c.l.bf16 %v2242_v2  ;;  %v2241_v25 = vunpack.c.h.bf16 %v2242_v2 }
  0x12   : > { %2560 = vmatpush3.bf16.msra.mxu1 %v2235_v1  ;;  %v2797_v1 = vsub.s32 %v663_v59, %v671_v60 }
  0x13   : > { %2562 = vmatprep.subr.bf16.mxu1 %v2242_v2 }
  0x14   : > { %vm769_vm3 = vcmp.eq.s32.totalorder %v2797_v1, 4294967288  ;;  %vm682_vm6 = vcmp.eq.s32.totalorder %v2797_v1, 4294967287 }
  0x16   : > { %2564 = vmatpush3.bf16.msra.mxu1 %v2242_v2  ;;  %v2799_v2 = vrot.slane %v680_v62, %v778_v61 }
  0x19   : > { %2358 = vmatmul.mubr.msk.f32.vlgmr.msra.gmra.mrb[0].mxu1 %vm347_vm0, %v336_v3 }
  0x1a   : > { %2360 = vmatprep.mubr.msk.f32.mxu1 %vm347_vm0, %v337_v4 }
  0x1d   : > { %2361 = vmatmul.mubr.msk.f32.gmra.mrb[2].mxu1 %vm347_vm0, %v338_v5 }
  0x1e   : > { %2371 = vmatprep.mubr.msk.f32.mxu1 %vm347_vm0, %v335_v0  ;;  %v2795_v0 = vsub.s32 %v662_v58, %v671_v60 }
  0x20   : > { %vm768_vm2 = vcmp.eq.s32.totalorder %v2795_v0, 4294967288  ;;  %vm681_vm5 = vcmp.eq.s32.totalorder %v2795_v0, 4294967287 }
  0x21   : > { %vm2067_vm4 = vmpackc.low %vm769_vm3, %vm768_vm2 }
  0x22   : > { %vm2053_vm7 = vmpackc.low %vm682_vm6, %vm681_vm5 }
  0xec   : > { %v2359_v6 = vpop.f32.mrb[0].mxu1 }
  0xed   : > { %v426_v7 = vpop.f32.mrb[1].mxu1  ;;  %v449_v11 = vsel %vm445_vm1, %v2359_v6, 0.0 }
  0xee   : > { %v446_v8 = vsel %vm445_vm1, %v426_v7, 0.0  ;;  %v665_v7 = vadd.s32 24, %v662_v58 }
  0xef   : > { %447 = vadd.xlane.f32.xlu0 %v446_v8 }
  0xf0   : > { %v2362_v9 = vpop.f32.mrb[2].mxu1 }
  0xf1   : > { %v436_v10 = vpop.f32.mrb[3].mxu1  ;;  %v455_v13 = vsel %vm445_vm1, %v2362_v9, 0.0  ;;  %v2816_v9 = vsub.s32 %v665_v7, %v671_v60 }
  0xf2   : > { %v452_v12 = vsel %vm445_vm1, %v436_v10, 0.0  ;;  %v666_v10 = vadd.s32 32, %v662_v58 }
  0xf3   : > { %450 = vadd.xlane.f32.xlu0 %v449_v11  ;;  %453 = vadd.xlane.f32.xlu1 %v452_v12  ;;  %v667_v11 = vadd.s32 40, %v662_v58  ;;  %vm771_vm9 = vcmp.eq.s32.totalorder %v2816_v9, 4294967288  ;;  %vm684_vm11 = vcmp.eq.s32.totalorder %v2816_v9, 4294967287 }
  0xf4   : > { %v2823_v12 = vsub.s32 %v666_v10, %v671_v60 }
  0xf6   : > { %vm772_vm14 = vcmp.eq.s32.totalorder %v2823_v12, 4294967288  ;;  %vm685_vm3 = vcmp.eq.s32.totalorder %v2823_v12, 4294967287 }
  0xf7   : > { %456 = vadd.xlane.f32.xlu1 %v455_v13  ;;  %v2825_v13 = vsub.s32 %v667_v11, %v671_v60 }
  0xf9   : > { %vm773_vm15 = vcmp.eq.s32.totalorder %v2825_v13, 4294967288 }
  0xfa   : > { %vm2073_vm2 = vmpackc.low %vm773_vm15, %vm772_vm14 }
 0x17c   : > { %v448_v14 = vpop.xlane.xlu0 %447 }
 0x17d   : > { %v458_v16 = vmul.f32 0.00390625, %v448_v14  ;;  %v668_v14 = vadd.s32 48, %v662_v58 }
 0x17f   : > { %v2733_v20 = vsub.f32 %v2236_v15, %v458_v16  ;;  %v669_v15 = vadd.s32 56, %v662_v58  ;;  %v2836_v16 = vsub.s32 %v668_v14, %v671_v60 }
 0x180   : > { %v451_v18 = vpop.xlane.xlu0 %450  ;;  %v454_v19 = vpop.xlane.xlu1 %453 }
 0x181   : > { %v459_v21 = vmul.f32 0.00390625, %v451_v18  ;;  %v460_v23 = vmul.f32 0.00390625, %v454_v19  ;;  %v466_v27 = vmul.f32 %v2733_v20, %v2733_v20  ;;  %v970_v18 = vsub.s32 2, %v662_v58 }
 0x182   : > { %vm774_vm6 = vcmp.eq.s32.totalorder %v2836_v16, 4294967288 }
 0x183   : > { %v2735_v24 = vsub.f32 %v2237_v17, %v459_v21  ;;  %v2741_v29 = vsub.f32 %v2240_v22, %v460_v23  ;;  %v2838_v17 = vsub.s32 %v669_v15, %v671_v60  ;;  %v2847_v19 = vrot.slane %v680_v62, %v970_v18 }
 0x184   : > { %v457_v26 = vpop.xlane.xlu1 %456  ;;  %v2651_v22 = vmov 0.0  }
 0x185   : > { %v467_v28 = vmul.f32 %v2735_v24, %v2735_v24  ;;  %v461_v30 = vmul.f32 0.00390625, %v457_v26  ;;  %v468_v33 = vmul.f32 %v2741_v29, %v2741_v29  ;;  %v2853_v21 = vpack.c.bf16 %v2847_v19, %v2847_v19 }
 0x187   : > { %v2743_v31 = vsub.f32 %v2241_v25, %v461_v30  ;;  %v2565_v32 = vpack.c.bf16 %v467_v28, %v466_v27 }
 0x189   : > { %v469_v34 = vmul.f32 %v2743_v31, %v2743_v31  ;;  %2566 = vmatprep.subr.bf16.mxu1 %v2565_v32 }
 0x18a   : > { %2568 = vmatpush3.bf16.msra.mxu1 %v2565_v32 }
 0x18b   : > { %v2569_v35 = vpack.c.bf16 %v469_v34, %v468_v33 }
 0x18d   : > { %2570 = vmatprep.subr.bf16.mxu1 %v2569_v35 }
 0x18e   : > { %2572 = vmatpush3.bf16.msra.mxu1 %v2569_v35 }
 0x191   : > { %2372 = vmatmul.mubr.msk.f32.vlgmr.msra.gmra.mrb[4].mxu1 %vm347_vm0, %v336_v3  ;;  %v692_v3 = vrot.slane %v680_v62, %v691_v63 }
 0x192   : > { %2374 = vmatprep.mubr.msk.f32.mxu1 %vm347_vm0, %v337_v4  ;;  %v2805_v4 = vpack.c.bf16 %v2799_v2, %v2799_v2 }
 0x193   : > { %v2807_v6 = vpack.c.bf16 %v692_v3, %v692_v3 }
 0x194   : > { %2389 = vmatprep.subr.msk.bf16.mxu1 %vm2067_vm4, %v2805_v4 }
 0x195   : > { %2375 = vmatmul.mubr.msk.f32.gmra.mrb[6].mxu1 %vm347_vm0, %v338_v5  ;;  %v664_v5 = vadd.s32 16, %v662_v58  ;;  %2377 = vmatprep.subr.msk.bf16.mxu0 %vm2053_vm7, %v2807_v6 }
 0x196   : > { %2390 = vmatpush3.bf16.msk.msra.mxu1 %vm2067_vm4, %v2805_v4  ;;  %2378 = vmatpush3.bf16.msk.msra.mxu0 %vm2053_vm7, %v2807_v6  ;;  %vm686_vm4 = vcmp.eq.s32.totalorder %v2825_v13, 4294967287  ;;  %vm775_vm7 = vcmp.eq.s32.totalorder %v2838_v17, 4294967288 }
 0x197   : > { %v2812_v8 = vsub.s32 %v664_v5, %v671_v60  ;;  %vm2059_vm5 = vmpackc.low %vm686_vm4, %vm685_vm3  ;;  %vm964_vm4 = vcmp.eq.s32.totalorder %v2823_v12, 4294967289 }
 0x199   : > { %vm770_vm8 = vcmp.eq.s32.totalorder %v2812_v8, 4294967288  ;;  %vm683_vm10 = vcmp.eq.s32.totalorder %v2812_v8, 4294967287  ;;  %vm962_vm15 = vcmp.eq.s32.totalorder %v2812_v8, 4294967289 }
 0x19a   : > { %vm2070_vm12 = vmpackc.low %vm771_vm9, %vm770_vm8  ;;  %vm687_vm9 = vcmp.eq.s32.totalorder %v2836_v16, 4294967287 }
 0x19b   : > { %2391 = vmatprep.subr.msk.bf16.mxu1 %vm2070_vm12, %v2805_v4  ;;  %vm2056_vm13 = vmpackc.low %vm684_vm11, %vm683_vm10  ;;  %vm688_vm10 = vcmp.eq.s32.totalorder %v2838_v17, 4294967287 }
 0x19c   : > { %2379 = vmatprep.subr.msk.bf16.mxu0 %vm2056_vm13, %v2807_v6  ;;  %2392 = vmatpush3.bf16.msk.msra.mxu1 %vm2070_vm12, %v2805_v4  ;;  %vm2076_vm8 = vmpackc.low %vm775_vm7, %vm774_vm6  ;;  %vm960_vm12 = vcmp.eq.s32.totalorder %v2795_v0, 4294967289  ;;  %vm966_vm7 = vcmp.eq.s32.totalorder %v2836_v16, 4294967289 }
 0x19d   : > { %2380 = vmatpush3.bf16.msk.msra.mxu0 %vm2056_vm13, %v2807_v6  ;;  %2393 = vmatprep.subr.msk.bf16.mxu1 %vm2073_vm2, %v2805_v4  ;;  %vm2062_vm11 = vmpackc.low %vm688_vm10, %vm687_vm9  ;;  %vm961_vm13 = vcmp.eq.s32.totalorder %v2797_v1, 4294967289  ;;  %vm1101_vm10 = vcmp.eq.s32.totalorder %v2795_v0, 4294967295 }
 0x19e   : > { %2381 = vmatprep.subr.msk.bf16.mxu0 %vm2059_vm5, %v2807_v6  ;;  %vm2859_vm14 = vmpackc.low %vm961_vm13, %vm960_vm12  ;;  %vm1103_vm13 = vcmp.eq.s32.totalorder %v2812_v8, 4294967295 }
 0x1a0   : > { %2394 = vmatpush3.bf16.msk.msra.mxu1 %vm2073_vm2, %v2805_v4  ;;  %vm963_vm2 = vcmp.eq.s32.totalorder %v2816_v9, 4294967289 }
 0x1a1   : > { %2382 = vmatpush3.bf16.msk.msra.mxu0 %vm2059_vm5, %v2807_v6  ;;  %2395 = vmatprep.subr.msk.bf16.mxu1 %vm2076_vm8, %v2805_v4  ;;  %vm2092_vm3 = vmpackc.low %vm963_vm2, %vm962_vm15  ;;  %vm965_vm5 = vcmp.eq.s32.totalorder %v2825_v13, 4294967289  ;;  %vm1105_vm2 = vcmp.eq.s32.totalorder %v2823_v12, 4294967295 }
 0x1a2   : > { %2383 = vmatprep.subr.msk.bf16.mxu0 %vm2062_vm11, %v2807_v6  ;;  %vm2095_vm6 = vmpackc.low %vm965_vm5, %vm964_vm4  ;;  %vm1107_vm5 = vcmp.eq.s32.totalorder %v2836_v16, 4294967295 }
 0x1a4   : > { %2396 = vmatpush3.bf16.msk.msra.mxu1 %vm2076_vm8, %v2805_v4  ;;  %vm967_vm8 = vcmp.eq.s32.totalorder %v2838_v17, 4294967289 }
 0x1a5   : > { %2384 = vmatpush3.bf16.msk.msra.mxu0 %vm2062_vm11, %v2807_v6  ;;  %2417 = vmatprep.subr.msk.bf16.mxu1 %vm2859_vm14, %v2853_v21  ;;  %vm2098_vm9 = vmpackc.low %vm967_vm8, %vm966_vm7  ;;  %vm1102_vm11 = vcmp.eq.s32.totalorder %v2797_v1, 4294967295  ;;  %vm1375_vm8 = vcmp.eq.s32.totalorder %v2795_v0, 1 }
 0x1a6   : > { %vm2109_vm12 = vmpackc.low %vm1102_vm11, %vm1101_vm10  ;;  %vm1377_vm11 = vcmp.eq.s32.totalorder %v2812_v8, 1 }
 0x264   : > { %v2373_v37 = vpop.f32.mrb[4].mxu1 }
 0x265   : > { %v536_v38 = vpop.f32.mrb[5].mxu1  ;;  %v558_v39 = vsel %vm445_vm1, %v2373_v37, 0.0 }
 0x266   : > { %559 = vadd.xlane.f32.xlu1 %v558_v39  ;;  %v555_v40 = vsel %vm445_vm1, %v536_v38, 0.0 }
 0x267   : > { %556 = vadd.xlane.f32.xlu0 %v555_v40 }
 0x268   : > { %v2376_v41 = vpop.f32.mrb[6].mxu1 }
 0x269   : > { %v546_v42 = vpop.f32.mrb[7].mxu1  ;;  %v564_v43 = vsel %vm445_vm1, %v2376_v41, 0.0 }
 0x26a   : > { %565 = vadd.xlane.f32.xlu1 %v564_v43  ;;  %v561_v44 = vsel %vm445_vm1, %v546_v42, 0.0 }
 0x26b   : > { %562 = vadd.xlane.f32.xlu0 %v561_v44 }
 0x27b   : > { %590 = vperm.xlu1 %2617, %v340_v45  }
 0x27f   : > { %595 = vperm.xlu1 %2617, %v341_v46  }
 0x281   : > { %585 = vperm.xlu0 %2616, %v339_v47  }
 0x283   : > { %600 = vperm.xlu1 %2617, %v342_v48  }
 0x285   : > { %1934 = vperm.xlu0 %2616, %v1924_v49  }
 0x287   : > { %609 = vperm.xlu1 %2617, %v343_v50  }
 0x289   : > { %1944 = vperm.xlu0 %2616, %v1926_v51  }
 0x28b   : > { %614 = vperm.xlu1 %2617, %v344_v52  }
 0x28f   : > { %619 = vperm.xlu1 %2617, %v345_v53  }
 0x293   : > { %624 = vperm.xlu1 %2617, %v346_v54  }
 0x297   : > { %1929 = vperm.xlu1 %2617, %v1923_v55  }
 0x29b   : > { %1939 = vperm.xlu1 %2617, %v1925_v56  }
 0x2f3   : > { %v560_v23 = vpop.xlane.xlu1 %559 }
 0x2f4   : > { %v568_v25 = vmul.f32 0.00390625, %v560_v23  ;;  %v557_v26 = vpop.xlane.xlu0 %556 }
 0x2f5   : > { %v567_v27 = vmul.f32 0.00390625, %v557_v26 }
 0x2f6   : > { %v572_v28 = vadd.f32 1e-05, %v568_v25 }
 0x2f7   : > { %v571_v30 = vadd.f32 1e-05, %v567_v27  ;;  %v566_v32 = vpop.xlane.xlu1 %565 }
 0x2f8   : > { %2618 = vrsqrt.f32 %v572_v28  ;;  %v563_v33 = vpop.xlane.xlu0 %562  ;;  %v570_v34 = vmul.f32 0.00390625, %v566_v32 }
 0x2f9   : > { %2620 = vrsqrt.f32 %v571_v30  ;;  %v569_v35 = vmul.f32 0.00390625, %v563_v33 }
 0x2fa   : > { %v574_v38 = vadd.f32 1e-05, %v570_v34  ;;  %v2190_v34 = vpack.c.bf16 %v2799_v2, %v2651_v22  ;;  %v2081_v2 = vld [vmem:[%s3173_s4 + $0x20] sm:$0xff] }
 0x2fb   : > { %v573_v36 = vadd.f32 1e-05, %v569_v35  ;;  %v591_v37 = vpop.permute.xlu1 %590 }
 0x2fd   : > { %2622 = vrsqrt.f32 %v573_v36 }
 0x2fe   : > { %2624 = vrsqrt.f32 %v574_v38 }
 0x2ff   : > { %v596_v39 = vpop.permute.xlu1 %595 }
 0x300   : > { %v586_v43 = vpop.permute.xlu0 %585 }
 0x302   : > { %v2619_v40 = vpop.eup %2618 }
 0x303   : > { %v2621_v41 = vpop.eup %2620  ;;  %v601_v42 = vpop.permute.xlu1 %600  ;;  %v580_v45 = vmul.f32 %v2619_v40, %v2735_v24 }
 0x304   : > { %v579_v44 = vmul.f32 %v2621_v41, %v2733_v20 }
 0x305   : > { %v604_v50 = vmul.f32 %v591_v37, %v580_v45 }
 0x306   : > { %v603_v46 = vmul.f32 %v586_v43, %v579_v44 }
 0x307   : > { %v2623_v47 = vpop.eup %2622  ;;  %v610_v48 = vpop.permute.xlu1 %609 }
 0x308   : > { %v627_v49 = vadd.f32 %v610_v48, %v603_v46  ;;  %v581_v51 = vmul.f32 %v2623_v47, %v2741_v29  ;;  %v2625_v53 = vpop.eup %2624  ;;  %v2083_v48 = vld [vmem:[%s3173_s4 + $0x30] sm:$0xff] }
 0x309   : > { %v582_v57 = vmul.f32 %v2625_v53, %v2743_v31 }
 0x30a   : > { %v2049_v52 = vmul.f32 -1.442695, %v627_v49  ;;  %v605_v56 = vmul.f32 %v596_v39, %v581_v51  ;;  %v761_v51 = vld [vmem:[%s3173_s4 + $0x8] sm:$0xff] }
 0x30b   : > { %v615_v54 = vpop.permute.xlu1 %614  ;;  %v606_v24 = vmul.f32 %v601_v42, %v582_v57 }
 0x30c   : > { %2626 = vpow2.f32 %v2049_v52  ;;  %v628_v55 = vadd.f32 %v615_v54, %v604_v50  ;;  %v760_v50 = vld [vmem:[%s3173_s4] sm:$0xff] }
 0x30d   : > { %v764_v53 = vpack.c.bf16 %v761_v51, %v760_v50 }
 0x30e   : > { %v2050_v58 = vmul.f32 -1.442695, %v628_v55 }
 0x30f   : > { %v620_v59 = vpop.permute.xlu1 %619 }
 0x310   : > { %2628 = vpow2.f32 %v2050_v58  ;;  %v629_v20 = vadd.f32 %v620_v59, %v605_v56  ;;  %v762_v59 = vld [vmem:[%s3173_s4 + $0x10] sm:$0xff] }
 0x312   : > { %v2051_v60 = vmul.f32 -1.442695, %v629_v20 }
 0x313   : > { %v625_v61 = vpop.permute.xlu1 %624 }
 0x314   : > { %2630 = vpow2.f32 %v2051_v60  ;;  %v630_v62 = vadd.f32 %v625_v61, %v606_v24  ;;  %v2103_v60 = vld [vmem:[%s3173_s4 + $0x40] sm:$0xff]  ;;  %v2104_v61 = vld [vmem:[%s3173_s4 + $0x48] sm:$0xff] }
 0x316   : > { %v2627_v63 = vpop.eup %2626  ;;  %v2052_v3 = vmul.f32 -1.442695, %v630_v62 }
 0x317   : > { %v643_v29 = vadd.f32 1.0, %v2627_v63  ;;  %v1038_v63 = vpack.c.bf16 %v2104_v61, %v2103_v60  ;;  %v2165_v61 = vld [vmem:[%s3173_s4 + $0xb0] sm:$0xff] }
 0x318   : > { %2632 = vpow2.f32 %v2052_v3  ;;  %v2105_v3 = vld [vmem:[%s3173_s4 + $0x50] sm:$0xff] }
 0x319   : > { %2634 = vrcp.f32 %v643_v29  ;;  %v2106_v29 = vld [vmem:[%s3173_s4 + $0x58] sm:$0xff] }
 0x31a   : > { %v2629_v5 = vpop.eup %2628 }
 0x31b   : > { %v644_v7 = vadd.f32 1.0, %v2629_v5 }
 0x31d   : > { %2636 = vrcp.f32 %v644_v7  ;;  %v2123_v7 = vld [vmem:[%s3173_s4 + $0x60] sm:$0xff] }
 0x31e   : > { %v2631_v10 = vpop.eup %2630 }
 0x31f   : > { %v645_v11 = vadd.f32 1.0, %v2631_v10  ;;  %v2124_v10 = vld [vmem:[%s3173_s4 + $0x68] sm:$0xff] }
 0x321   : > { %2638 = vrcp.f32 %v645_v11 }
 0x322   : > { %v2633_v31 = vpop.eup %2632 }
 0x323   : > { %v646_v14 = vadd.f32 1.0, %v2633_v31  ;;  %v2635_v15 = vpop.eup %2634 }
 0x324   : > { %v655_v23 = vmul.f32 %v2635_v15, %v627_v49  ;;  %v2084_v49 = vld [vmem:[%s3173_s4 + $0x38] sm:$0xff] }
 0x325   : > { %2640 = vrcp.f32 %v646_v14  ;;  %v847_v52 = vpack.c.bf16 %v2084_v49, %v2083_v48  ;;  %v1039_v14 = vpack.c.bf16 %v2106_v29, %v2105_v3  ;;  %v2143_v49 = vld [vmem:[%s3173_s4 + $0x80] sm:$0xff]  ;;  %v2184_v3 = vld [vmem:[%s3173_s4 + $0xc8] sm:$0xff] }
 0x327   : > { %v2637_v18 = vpop.eup %2636 }
 0x328   : > { %v656_v25 = vmul.f32 %v2637_v18, %v628_v55 }
 0x32a   : > { %v2870_v26 = vpack.c.bf16 %v656_v25, %v655_v23  ;;  %v1175_v23 = vpack.c.bf16 %v2124_v10, %v2123_v7  ;;  %v2185_v7 = vld [vmem:[%s3173_s4 + $0xd0] sm:$0xff]  ;;  %v2186_v10 = vld [vmem:[%s3173_s4 + $0xd8] sm:$0xff] }
 0x32b   : > { %v2639_v27 = vpop.eup %2638 }
 0x32c   : > { %2385 = vmatprep.mubr.msk.bf16.mxu0 %vm445_vm1, %v2870_v26  ;;  %2397 = vmatprep.mubr.msk.bf16.mxu1 %vm445_vm1, %v2870_v26  ;;  %v657_v30 = vmul.f32 %v2639_v27, %v629_v20  ;;  %v763_v20 = vld [vmem:[%s3173_s4 + $0x18] sm:$0xff] }
 0x32f   : > { %v2641_v28 = vpop.eup %2640 }
 0x330   : > { %v658_v32 = vmul.f32 %v2641_v28, %v630_v62  ;;  %v765_v62 = vpack.c.bf16 %v763_v20, %v762_v59  ;;  %v2125_v28 = vld [vmem:[%s3173_s4 + $0x70] sm:$0xff]  ;;  %v2163_v59 = vld [vmem:[%s3173_s4 + $0xa0] sm:$0xff]  ;;  %v2164_v20 = vld [vmem:[%s3173_s4 + $0xa8] sm:$0xff] }
 0x331   : > { %v1449_v60 = vpack.c.bf16 %v2164_v20, %v2163_v59 }
 0x332   : > { %v2878_v33 = vpack.c.bf16 %v658_v32, %v657_v30  ;;  %v2126_v30 = vld [vmem:[%s3173_s4 + $0x78] sm:$0xff] }
 0x334   : > { %2386 = vmatmul.mubr.msk.bf16.vlgmr.msra.gmra.mrb[0].mxu0 %vm445_vm1, %v2878_v33  ;;  %2398 = vmatmul.mubr.msk.bf16.vlgmr.msra.gmra.mrb[8].mxu1 %vm445_vm1, %v2878_v33 }
 0x335   : > { %2418 = vmatpush3.bf16.msk.msra.mxu1 %vm2859_vm14, %v2853_v21  ;;  %2425 = vmatprep.mubr.msk.bf16.mxu1 %vm445_vm1, %v2870_v26  ;;  %vm1104_vm14 = vcmp.eq.s32.totalorder %v2816_v9, 4294967295 }
 0x336   : > { %2419 = vmatprep.subr.msk.bf16.mxu1 %vm2092_vm3, %v2853_v21  ;;  %vm2112_vm15 = vmpackc.low %vm1104_vm14, %vm1103_vm13  ;;  %vm1379_vm14 = vcmp.eq.s32.totalorder %v2823_v12, 1 }
 0x339   : > { %2420 = vmatpush3.bf16.msk.msra.mxu1 %vm2092_vm3, %v2853_v21  ;;  %vm1106_vm3 = vcmp.eq.s32.totalorder %v2825_v13, 4294967295 }
 0x33a   : > { %2421 = vmatprep.subr.msk.bf16.mxu1 %vm2095_vm6, %v2853_v21  ;;  %vm2115_vm4 = vmpackc.low %vm1106_vm3, %vm1105_vm2  ;;  %vm1381_vm3 = vcmp.eq.s32.totalorder %v2836_v16, 1 }
 0x33d   : > { %2422 = vmatpush3.bf16.msk.msra.mxu1 %vm2095_vm6, %v2853_v21  ;;  %vm1108_vm6 = vcmp.eq.s32.totalorder %v2838_v17, 4294967295 }
 0x33e   : > { %2423 = vmatprep.subr.msk.bf16.mxu1 %vm2098_vm9, %v2853_v21  ;;  %vm2118_vm7 = vmpackc.low %vm1108_vm6, %vm1107_vm5  ;;  %vm1512_vm6 = vcmp.eq.s32.totalorder %v2795_v0, 7 }
 0x341   : > { %2424 = vmatpush3.bf16.msk.msra.mxu1 %vm2098_vm9, %v2853_v21  ;;  %vm1376_vm9 = vcmp.eq.s32.totalorder %v2797_v1, 1 }
 0x342   : > { %2437 = vmatprep.subr.msk.bf16.mxu1 %vm2109_vm12, %v2807_v6  ;;  %vm2149_vm10 = vmpackc.low %vm1376_vm9, %vm1375_vm8  ;;  %vm1514_vm9 = vcmp.eq.s32.totalorder %v2812_v8, 7 }
 0x344   : > { %2426 = vmatmul.mubr.msk.bf16.vlgmr.msra.gmra.mrb[12].mxu1 %vm445_vm1, %v2878_v33 }
 0x345   : > { %2438 = vmatpush3.bf16.msk.msra.mxu1 %vm2109_vm12, %v2807_v6  ;;  %2445 = vmatprep.mubr.msk.bf16.mxu1 %vm445_vm1, %v2870_v26  ;;  %vm1378_vm12 = vcmp.eq.s32.totalorder %v2816_v9, 1 }
 0x346   : > { %2439 = vmatprep.subr.msk.bf16.mxu1 %vm2112_vm15, %v2807_v6  ;;  %vm2152_vm13 = vmpackc.low %vm1378_vm12, %vm1377_vm11  ;;  %vm1516_vm12 = vcmp.eq.s32.totalorder %v2823_v12, 7 }
 0x349   : > { %2440 = vmatpush3.bf16.msk.msra.mxu1 %vm2112_vm15, %v2807_v6  ;;  %vm1380_vm15 = vcmp.eq.s32.totalorder %v2825_v13, 1 }
 0x34a   : > { %2441 = vmatprep.subr.msk.bf16.mxu1 %vm2115_vm4, %v2807_v6  ;;  %vm2155_vm2 = vmpackc.low %vm1380_vm15, %vm1379_vm14  ;;  %vm1518_vm15 = vcmp.eq.s32.totalorder %v2836_v16, 7 }
 0x34d   : > { %2442 = vmatpush3.bf16.msk.msra.mxu1 %vm2115_vm4, %v2807_v6  ;;  %vm1382_vm4 = vcmp.eq.s32.totalorder %v2838_v17, 1 }
 0x34e   : > { %2443 = vmatprep.subr.msk.bf16.mxu1 %vm2118_vm7, %v2807_v6  ;;  %vm2158_vm5 = vmpackc.low %vm1382_vm4, %vm1381_vm3  ;;  %vm1650_vm4 = vcmp.eq.s32.totalorder %v2797_v1, 8 }
 0x351   : > { %2444 = vmatpush3.bf16.msk.msra.mxu1 %vm2118_vm7, %v2807_v6  ;;  %vm1513_vm7 = vcmp.eq.s32.totalorder %v2797_v1, 7 }
 0x352   : > { %2477 = vmatprep.subr.msk.bf16.mxu1 %vm2149_vm10, %v2853_v21  ;;  %vm2169_vm8 = vmpackc.low %vm1513_vm7, %vm1512_vm6  ;;  %vm1651_vm7 = vcmp.eq.s32.totalorder %v2812_v8, 8 }
 0x354   : > { %2446 = vmatmul.mubr.msk.bf16.vlgmr.msra.gmra.mrb[16].mxu1 %vm445_vm1, %v2878_v33 }
 0x355   : > { %2478 = vmatpush3.bf16.msk.msra.mxu1 %vm2149_vm10, %v2853_v21  ;;  %2485 = vmatprep.mubr.msk.bf16.mxu1 %vm445_vm1, %v2870_v26  ;;  %vm1515_vm10 = vcmp.eq.s32.totalorder %v2816_v9, 7 }
 0x356   : > { %2479 = vmatprep.subr.msk.bf16.mxu1 %vm2152_vm13, %v2853_v21  ;;  %vm2172_vm11 = vmpackc.low %vm1515_vm10, %vm1514_vm9  ;;  %vm1653_vm10 = vcmp.eq.s32.totalorder %v2823_v12, 8 }
 0x359   : > { %2480 = vmatpush3.bf16.msk.msra.mxu1 %vm2152_vm13, %v2853_v21  ;;  %vm1517_vm13 = vcmp.eq.s32.totalorder %v2825_v13, 7 }
 0x35a   : > { %2481 = vmatprep.subr.msk.bf16.mxu1 %vm2155_vm2, %v2853_v21  ;;  %vm2175_vm14 = vmpackc.low %vm1517_vm13, %vm1516_vm12  ;;  %vm1655_vm13 = vcmp.eq.s32.totalorder %v2836_v16, 8 }
 0x35d   : > { %2482 = vmatpush3.bf16.msk.msra.mxu1 %vm2155_vm2, %v2853_v21  ;;  %vm1519_vm2 = vcmp.eq.s32.totalorder %v2838_v17, 7 }
 0x35e   : > { %2483 = vmatprep.subr.msk.bf16.mxu1 %vm2158_vm5, %v2853_v21  ;;  %vm2178_vm3 = vmpackc.low %vm1519_vm2, %vm1518_vm15  ;;  %vm1238_vm2 = vcmp.eq.s32.totalorder %v2795_v0, 0  ;;  %v1176_v0 = vpack.c.bf16 %v2126_v30, %v2125_v28  ;;  %v1930_v28 = vpop.permute.xlu1 %1929  ;;  %v1935_v30 = vpop.permute.xlu0 %1934 }
 0x361   : > { %2484 = vmatpush3.bf16.msk.msra.mxu1 %vm2158_vm5, %v2853_v21  ;;  %vm2652_vm5 = vmmov 1  }
 0x362   : > { %2497 = vmatprep.subr.msk.bf16.mxu1 %vm2169_vm8, %v2807_v6  ;;  %vm2189_vm6 = vmpackc.low %vm1650_vm4, %vm2652_vm5 }
 0x364   : > { %2486 = vmatmul.mubr.msk.bf16.vlgmr.msra.gmra.mrb[20].mxu1 %vm445_vm1, %v2878_v33 }
 0x365   : > { %2498 = vmatpush3.bf16.msk.msra.mxu1 %vm2169_vm8, %v2807_v6  ;;  %2505 = vmatprep.mubr.msk.bf16.mxu1 %vm445_vm1, %v2870_v26  ;;  %vm1652_vm8 = vcmp.eq.s32.totalorder %v2816_v9, 8 }
 0x366   : > { %2499 = vmatprep.subr.msk.bf16.mxu1 %vm2172_vm11, %v2807_v6  ;;  %vm2192_vm9 = vmpackc.low %vm1652_vm8, %vm1651_vm7  ;;  %vm1241_vm7 = vcmp.eq.s32.totalorder %v2816_v9, 0 }
 0x369   : > { %2500 = vmatpush3.bf16.msk.msra.mxu1 %vm2172_vm11, %v2807_v6  ;;  %vm1654_vm11 = vcmp.eq.s32.totalorder %v2825_v13, 8 }
 0x36a   : > { %2501 = vmatprep.subr.msk.bf16.mxu1 %vm2175_vm14, %v2807_v6  ;;  %vm2195_vm12 = vmpackc.low %vm1654_vm11, %vm1653_vm10  ;;  %vm1243_vm10 = vcmp.eq.s32.totalorder %v2825_v13, 0 }
 0x36d   : > { %2502 = vmatpush3.bf16.msk.msra.mxu1 %vm2175_vm14, %v2807_v6  ;;  %vm1656_vm14 = vcmp.eq.s32.totalorder %v2838_v17, 8 }
 0x36e   : > { %2503 = vmatprep.subr.msk.bf16.mxu1 %vm2178_vm3, %v2807_v6  ;;  %vm2198_vm15 = vmpackc.low %vm1656_vm14, %vm1655_vm13  ;;  %vm1245_vm13 = vcmp.eq.s32.totalorder %v2838_v17, 0 }
 0x371   : > { %2504 = vmatpush3.bf16.msk.msra.mxu1 %vm2178_vm3, %v2807_v6  ;;  %v2082_v6 = vld [vmem:[%s3173_s4 + $0x28] sm:$0xff]  ;;  %vm1239_vm3 = vcmp.eq.s32.totalorder %v2797_v1, 0 }
 0x372   : > { %2517 = vmatprep.subr.msk.bf16.mxu1 %vm2189_vm6, %v2190_v34  ;;  %v846_v35 = vpack.c.bf16 %v2082_v6, %v2081_v2  ;;  %vm3032_vm4 = vmpackc.low %vm1239_vm3, %vm1238_vm2  ;;  %vm1788_vm3 = vcmp.eq.s32.totalorder %v2812_v8, 9 }
 0x374   : > { %2506 = vmatmul.mubr.msk.bf16.vlgmr.msra.gmra.mrb[24].mxu1 %vm445_vm1, %v2878_v33  ;;  %2405 = vmatprep.mubr.msk.bf16.mxu0 %vm347_vm0, %v846_v35 }
 0x375   : > { %2518 = vmatpush3.bf16.msk.msra.mxu1 %vm2189_vm6, %v2190_v34  ;;  %2525 = vmatprep.mubr.msk.bf16.mxu1 %vm445_vm1, %v2870_v26  ;;  %vm1240_vm6 = vcmp.eq.s32.totalorder %v2812_v8, 0  ;;  %v2223_v8 = vld [vmem:[%s3173_s4 + $0x100] sm:$0xff] }
 0x376   : > { %2519 = vmatprep.subr.msk.bf16.mxu1 %vm2192_vm9, %v2805_v4  ;;  %vm2132_vm8 = vmpackc.low %vm1241_vm7, %vm1240_vm6  ;;  %vm1791_vm7 = vcmp.eq.s32.totalorder %v2825_v13, 9 }
 0x379   : > { %2520 = vmatpush3.bf16.msk.msra.mxu1 %vm2192_vm9, %v2805_v4  ;;  %vm1242_vm9 = vcmp.eq.s32.totalorder %v2823_v12, 0 }
 0x37a   : > { %2521 = vmatprep.subr.msk.bf16.mxu1 %vm2195_vm12, %v2805_v4  ;;  %vm2135_vm11 = vmpackc.low %vm1243_vm10, %vm1242_vm9  ;;  %vm1792_vm9 = vcmp.eq.s32.totalorder %v2836_v16, 9  ;;  %vm1793_vm10 = vcmp.eq.s32.totalorder %v2838_v17, 9 }
 0x37d   : > { %2522 = vmatpush3.bf16.msk.msra.mxu1 %vm2195_vm12, %v2805_v4  ;;  %vm1244_vm12 = vcmp.eq.s32.totalorder %v2836_v16, 0 }
 0x37e   : > { %2523 = vmatprep.subr.msk.bf16.mxu1 %vm2198_vm15, %v2805_v4  ;;  %vm2138_vm14 = vmpackc.low %vm1245_vm13, %vm1244_vm12 }
 0x381   : > { %2524 = vmatpush3.bf16.msk.msra.mxu1 %vm2198_vm15, %v2805_v4  ;;  %vm1787_vm15 = vcmp.eq.s32.totalorder %v2797_v1, 9 }
 0x382   : > { %vm2209_vm2 = vmpackc.low %vm1787_vm15, %vm2652_vm5  ;;  %vm1790_vm5 = vcmp.eq.s32.totalorder %v2823_v12, 9 }
 0x384   : > { %2526 = vmatmul.mubr.msk.bf16.vlgmr.msra.gmra.mrb[28].mxu1 %vm445_vm1, %v2878_v33 }
 0x407   : > { %v2387_v36 = vpop.f32.mrb[0].mxu0  ;;  %v2399_v37 = vpop.f32.mrb[8].mxu1 }
 0x408   : > { %v745_v38 = vpop.f32.mrb[1].mxu0  ;;  %v826_v39 = vpop.f32.mrb[9].mxu1 }
 0x409   : > { %v2388_v40 = vpop.f32.mrb[2].mxu0  ;;  %v2400_v41 = vpop.f32.mrb[10].mxu1 }
 0x40a   : > { %v767_v42 = vpack.c.bf16 %v2388_v40, %v2387_v36  ;;  %v849_v43 = vpack.c.bf16 %v2400_v41, %v2399_v37  ;;  %v748_v44 = vpop.f32.mrb[3].mxu0  ;;  %v829_v45 = vpop.f32.mrb[11].mxu1 }
 0x40b   : > { %v766_v46 = vpack.c.bf16 %v748_v44, %v745_v38  ;;  %v848_v47 = vpack.c.bf16 %v829_v45, %v826_v39 }
 0x40d   : > { %2401 = vmatprep.subr.bf16.mxu0 %v848_v47 }
 0x40e   : > { %2402 = vmatpush3.bf16.msra.mxu0 %v848_v47 }
 0x40f   : > { %2403 = vmatprep.subr.bf16.mxu0 %v849_v43 }
 0x412   : > { %2404 = vmatpush3.bf16.msra.mxu0 %v849_v43 }
 0x413   : > { %2409 = vmatprep.subr.bf16.mxu0 %v766_v46 }
 0x415   : > { %2406 = vmatmul.mubr.msk.bf16.vlgmr.msra.gmra.mrb[4].mxu0 %vm347_vm0, %v847_v52 }
 0x416   : > { %2410 = vmatpush3.bf16.msra.mxu0 %v766_v46  ;;  %2413 = vmatprep.mubr.msk.bf16.mxu0 %vm347_vm0, %v764_v53 }
 0x417   : > { %v2427_v54 = vpop.f32.mrb[12].mxu1  ;;  %2411 = vmatprep.subr.bf16.mxu0 %v767_v42 }
 0x418   : > { %v1018_v55 = vpop.f32.mrb[13].mxu1 }
 0x419   : > { %v2428_v56 = vpop.f32.mrb[14].mxu1 }
 0x41a   : > { %v1041_v57 = vpack.c.bf16 %v2428_v56, %v2427_v54  ;;  %v1021_v58 = vpop.f32.mrb[15].mxu1  ;;  %2412 = vmatpush3.bf16.msra.mxu0 %v767_v42 }
 0x41b   : > { %v1040_v24 = vpack.c.bf16 %v1021_v58, %v1018_v55  ;;  %v2146_v58 = vld [vmem:[%s3173_s4 + $0x98] sm:$0xff] }
 0x41d   : > { %2429 = vmatprep.subr.bf16.mxu0 %v1040_v24 }
 0x421   : > { %2414 = vmatmul.mubr.msk.bf16.vlgmr.msra.gmra.mrb[4].mxu0 %vm347_vm0, %v765_v62  ;;  %v2166_v62 = vld [vmem:[%s3173_s4 + $0xb8] sm:$0xff] }
 0x422   : > { %2430 = vmatpush3.bf16.msra.mxu0 %v1040_v24  ;;  %2433 = vmatprep.mubr.msk.bf16.mxu0 %vm347_vm0, %v1038_v63  ;;  %v2183_v63 = vld [vmem:[%s3173_s4 + $0xc0] sm:$0xff]  ;;  %v1450_v29 = vpack.c.bf16 %v2166_v62, %v2165_v61 }
 0x423   : > { %2431 = vmatprep.subr.bf16.mxu0 %v1041_v57 }
 0x426   : > { %2432 = vmatpush3.bf16.msra.mxu0 %v1041_v57  ;;  %v2145_v57 = vld [vmem:[%s3173_s4 + $0x90] sm:$0xff] }
 0x427   : > { %v2447_v5 = vpop.f32.mrb[16].mxu1  ;;  %v1313_v24 = vpack.c.bf16 %v2146_v58, %v2145_v57 }
 0x428   : > { %v1155_v11 = vpop.f32.mrb[17].mxu1 }
 0x429   : > { %v2448_v31 = vpop.f32.mrb[18].mxu1 }
 0x42a   : > { %v1178_v15 = vpack.c.bf16 %v2448_v31, %v2447_v5  ;;  %v1158_v18 = vpop.f32.mrb[19].mxu1  ;;  %v1586_v5 = vpack.c.bf16 %v2184_v3, %v2183_v63  ;;  %v2204_v31 = vld [vmem:[%s3173_s4 + $0xe8] sm:$0xff] }
 0x42b   : > { %v1177_v25 = vpack.c.bf16 %v1158_v18, %v1155_v11  ;;  %v2203_v11 = vld [vmem:[%s3173_s4 + $0xe0] sm:$0xff]  ;;  %v2210_v18 = vpack.c.bf16 %v2847_v19, %v2651_v22  ;;  %v2226_v22 = vld [vmem:[%s3173_s4 + $0x118] sm:$0xff] }
 0x42d   : > { %2449 = vmatprep.subr.bf16.mxu0 %v1177_v25  ;;  %2434 = vmatmul.mubr.msk.bf16.vlgmr.msra.gmra.mrb[4].mxu0 %vm347_vm0, %v1039_v14  ;;  %v1587_v14 = vpack.c.bf16 %v2186_v10, %v2185_v7 }
 0x42e   : > { %2450 = vmatpush3.bf16.msra.mxu0 %v1177_v25  ;;  %2453 = vmatprep.mubr.msk.bf16.mxu0 %vm347_vm0, %v1175_v23  ;;  %v2205_v23 = vld [vmem:[%s3173_s4 + $0xf0] sm:$0xff]  ;;  %v2206_v25 = vld [vmem:[%s3173_s4 + $0xf8] sm:$0xff] }
 0x42f   : > { %2451 = vmatprep.subr.bf16.mxu0 %v1178_v15  ;;  %v1724_v1 = vpack.c.bf16 %v2206_v25, %v2205_v23 }
 0x432   : > { %2452 = vmatpush3.bf16.msra.mxu0 %v1178_v15  ;;  %v1723_v15 = vpack.c.bf16 %v2204_v31, %v2203_v11 }
 0x433   : > { %2457 = vmatprep.subr.msk.bf16.mxu0 %vm3032_vm4, %v2805_v4 }
 0x437   : > { %v2487_v32 = vpop.f32.mrb[20].mxu1 }
 0x438   : > { %v1429_v34 = vpop.f32.mrb[21].mxu1 }
 0x439   : > { %v2488_v2 = vpop.f32.mrb[22].mxu1  ;;  %2454 = vmatmul.mubr.msk.bf16.vlgmr.msra.gmra.mrb[4].mxu0 %vm347_vm0, %v1176_v0  ;;  %v1940_v0 = vpop.permute.xlu1 %1939 }
 0x43a   : > { %v1452_v6 = vpack.c.bf16 %v2488_v2, %v2487_v32  ;;  %2458 = vmatpush3.bf16.msk.msra.mxu0 %vm3032_vm4, %v2805_v4  ;;  %v1432_v35 = vpop.f32.mrb[23].mxu1  ;;  %2465 = vmatprep.mubr.msk.bf16.mxu0 %vm445_vm1, %v2870_v26  ;;  %vm1789_vm4 = vcmp.eq.s32.totalorder %v2816_v9, 9  ;;  %v2224_v9 = vld [vmem:[%s3173_s4 + $0x108] sm:$0xff] }
 0x43b   : > { %v1451_v36 = vpack.c.bf16 %v1432_v35, %v1429_v34  ;;  %2459 = vmatprep.subr.msk.bf16.mxu0 %vm2132_vm8, %v2805_v4  ;;  %vm2212_vm6 = vmpackc.low %vm1789_vm4, %vm1788_vm3  ;;  %v1860_v12 = vpack.c.bf16 %v2224_v9, %v2223_v8  ;;  %v1953_v34 = vld [vmem:[%s320_s20 + $0x10] sm:$0xff]  ;;  %v1951_v35 = vld [vmem:[%s320_s20] sm:$0xff] }
 0x43e   : > { %2460 = vmatpush3.bf16.msk.msra.mxu0 %vm2132_vm8, %v2805_v4  ;;  %vm2215_vm8 = vmpackc.low %vm1791_vm7, %vm1790_vm5 }
 0x43f   : > { %2461 = vmatprep.subr.msk.bf16.mxu0 %vm2135_vm11, %v2805_v4 }
 0x442   : > { %2462 = vmatpush3.bf16.msk.msra.mxu0 %vm2135_vm11, %v2805_v4  ;;  %vm2218_vm11 = vmpackc.low %vm1793_vm10, %vm1792_vm9 }
 0x443   : > { %2463 = vmatprep.subr.msk.bf16.mxu0 %vm2138_vm14, %v2805_v4 }
 0x446   : > { %2464 = vmatpush3.bf16.msk.msra.mxu0 %vm2138_vm14, %v2805_v4  ;;  %v2144_v4 = vld [vmem:[%s3173_s4 + $0x88] sm:$0xff] }
 0x447   : > { %v2507_v37 = vpop.f32.mrb[24].mxu1  ;;  %v1312_v50 = vpack.c.bf16 %v2144_v4, %v2143_v49 }
 0x448   : > { %v1566_v38 = vpop.f32.mrb[25].mxu1 }
 0x449   : > { %2466 = vmatmul.mubr.msk.bf16.vlgmr.msra.gmra.mrb[8].mxu0 %vm445_vm1, %v2878_v33  ;;  %v2508_v39 = vpop.f32.mrb[26].mxu1 }
 0x44a   : > { %v1589_v40 = vpack.c.bf16 %v2508_v39, %v2507_v37  ;;  %v1569_v41 = vpop.f32.mrb[27].mxu1  ;;  %2473 = vmatprep.mubr.msk.bf16.mxu0 %vm347_vm0, %v1312_v50  ;;  %v1954_v39 = vld [vmem:[%s320_s20 + $0x18] sm:$0xff] }
 0x44b   : > { %v1588_v42 = vpack.c.bf16 %v1569_v41, %v1566_v38 }
 0x457   : > { %v2527_v43 = vpop.f32.mrb[28].mxu1 }
 0x458   : > { %v1703_v44 = vpop.f32.mrb[29].mxu1 }
 0x459   : > { %v2528_v45 = vpop.f32.mrb[30].mxu1 }
 0x45a   : > { %v1726_v46 = vpack.c.bf16 %v2528_v45, %v2527_v43  ;;  %v1706_v47 = vpop.f32.mrb[31].mxu1  ;;  %v1952_v43 = vld [vmem:[%s320_s20 + $0x8] sm:$0xff] }
 0x45b   : > { %v1725_v48 = vpack.c.bf16 %v1706_v47, %v1703_v44 }
 0x51c   : > { %v2467_v51 = vpop.f32.mrb[8].mxu0 }
 0x51d   : > { %v1292_v52 = vpop.f32.mrb[9].mxu0 }
 0x51e   : > { %v2468_v53 = vpop.f32.mrb[10].mxu0 }
 0x51f   : > { %v1315_v54 = vpack.c.bf16 %v2468_v53, %v2467_v51  ;;  %v1295_v55 = vpop.f32.mrb[11].mxu0 }
 0x520   : > { %v1314_v56 = vpack.c.bf16 %v1295_v55, %v1292_v52 }
 0x522   : > { %2469 = vmatprep.subr.bf16.mxu0 %v1314_v56 }
 0x523   : > { %2470 = vmatpush3.bf16.msra.mxu0 %v1314_v56 }
 0x524   : > { %2471 = vmatprep.subr.bf16.mxu0 %v1315_v54 }
 0x527   : > { %2472 = vmatpush3.bf16.msra.mxu0 %v1315_v54 }
 0x528   : > { %2489 = vmatprep.subr.bf16.mxu0 %v1451_v36 }
 0x52a   : > { %2474 = vmatmul.mubr.msk.bf16.vlgmr.msra.gmra.mrb[4].mxu0 %vm347_vm0, %v1313_v24 }
 0x52b   : > { %2490 = vmatpush3.bf16.msra.mxu0 %v1451_v36  ;;  %2493 = vmatprep.mubr.msk.bf16.mxu0 %vm347_vm0, %v1449_v60  ;;  %v1945_v36 = vpop.permute.xlu0 %1944 }
 0x52c   : > { %2491 = vmatprep.subr.bf16.mxu0 %v1452_v6 }
 0x52f   : > { %2492 = vmatpush3.bf16.msra.mxu0 %v1452_v6 }
 0x530   : > { %2509 = vmatprep.subr.bf16.mxu0 %v1588_v42 }
 0x536   : > { %2494 = vmatmul.mubr.msk.bf16.vlgmr.msra.gmra.mrb[4].mxu0 %vm347_vm0, %v1450_v29 }
 0x537   : > { %2510 = vmatpush3.bf16.msra.mxu0 %v1588_v42  ;;  %2513 = vmatprep.mubr.msk.bf16.mxu0 %vm347_vm0, %v1586_v5 }
 0x538   : > { %2511 = vmatprep.subr.bf16.mxu0 %v1589_v40 }
 0x53b   : > { %2512 = vmatpush3.bf16.msra.mxu0 %v1589_v40 }
 0x53c   : > { %2529 = vmatprep.subr.bf16.mxu0 %v1725_v48 }
 0x542   : > { %2514 = vmatmul.mubr.msk.bf16.vlgmr.msra.gmra.mrb[4].mxu0 %vm347_vm0, %v1587_v14 }
 0x543   : > { %2530 = vmatpush3.bf16.msra.mxu0 %v1725_v48  ;;  %2533 = vmatprep.mubr.msk.bf16.mxu0 %vm347_vm0, %v1723_v15 }
 0x544   : > { %2531 = vmatprep.subr.bf16.mxu0 %v1726_v46 }
 0x547   : > { %2532 = vmatpush3.bf16.msra.mxu0 %v1726_v46 }
 0x548   : > { %2537 = vmatprep.subr.msk.bf16.mxu0 %vm2209_vm2, %v2210_v18 }
 0x54e   : > { %2534 = vmatmul.mubr.msk.bf16.vlgmr.msra.gmra.mrb[4].mxu0 %vm347_vm0, %v1724_v1 }
 0x54f   : > { %2538 = vmatpush3.bf16.msk.msra.mxu0 %vm2209_vm2, %v2210_v18  ;;  %2545 = vmatprep.mubr.msk.bf16.mxu0 %vm445_vm1, %v2870_v26 }
 0x550   : > { %2539 = vmatprep.subr.msk.bf16.mxu0 %vm2212_vm6, %v2853_v21 }
 0x553   : > { %2540 = vmatpush3.bf16.msk.msra.mxu0 %vm2212_vm6, %v2853_v21 }
 0x554   : > { %2541 = vmatprep.subr.msk.bf16.mxu0 %vm2215_vm8, %v2853_v21 }
 0x557   : > { %2542 = vmatpush3.bf16.msk.msra.mxu0 %vm2215_vm8, %v2853_v21 }
 0x558   : > { %2543 = vmatprep.subr.msk.bf16.mxu0 %vm2218_vm11, %v2853_v21 }
 0x55b   : > { %2544 = vmatpush3.bf16.msk.msra.mxu0 %vm2218_vm11, %v2853_v21 }
 0x55e   : > { %2546 = vmatmul.mubr.msk.bf16.vlgmr.msra.gmra.mrb[12].mxu0 %vm445_vm1, %v2878_v33  ;;  %v2225_v33 = vld [vmem:[%s3173_s4 + $0x110] sm:$0xff] }
 0x55f   : > { %2553 = vmatprep.mubr.msk.bf16.mxu0 %vm347_vm0, %v1860_v12  ;;  %v1861_v27 = vpack.c.bf16 %v2226_v22, %v2225_v33 }
 0x631   : > { %v2547_v13 = vpop.f32.mrb[12].mxu0 }
 0x632   : > { %v1840_v16 = vpop.f32.mrb[13].mxu0 }
 0x633   : > { %v2548_v17 = vpop.f32.mrb[14].mxu0 }
 0x634   : > { %v1863_v19 = vpack.c.bf16 %v2548_v17, %v2547_v13  ;;  %v1843_v21 = vpop.f32.mrb[15].mxu0 }
 0x635   : > { %v1862_v26 = vpack.c.bf16 %v1843_v21, %v1840_v16 }
 0x637   : > { %2549 = vmatprep.subr.bf16.mxu0 %v1862_v26 }
 0x638   : > { %2550 = vmatpush3.bf16.msra.mxu0 %v1862_v26 }
 0x639   : > { %2551 = vmatprep.subr.bf16.mxu0 %v1863_v19 }
 0x63c   : > { %2552 = vmatpush3.bf16.msra.mxu0 %v1863_v19 }
 0x63f   : > { %2554 = vmatmul.mubr.msk.bf16.vlgmr.msra.gmra.mrb[4].mxu0 %vm347_vm0, %v1861_v27 }
 0x712   : > { %v2555_v32 = vpop.f32.mrb[4].mxu0 }
 0x713   : > { %v1949_v2 = vadd.f32 %v2555_v32, %v1940_v0  ;;  %v1904_v6 = vpop.f32.mrb[5].mxu0 }
 0x714   : > { %v1947_v37 = vadd.f32 %v1930_v28, %v1904_v6  ;;  %v2556_v38 = vpop.f32.mrb[6].mxu0 }
 0x715   : > { %v1957_v40 = vadd.f32 %v1953_v34, %v1949_v2  ;;  %v1950_v41 = vadd.f32 %v2556_v38, %v1945_v36  ;;  %v1907_v42 = vpop.f32.mrb[7].mxu0 }
 0x716   : > { %v1955_v44 = vadd.f32 %v1951_v35, %v1947_v37  ;;  %v1948_v45 = vadd.f32 %v1935_v30, %v1907_v42 }
 0x717   : > { %1961 = vst.msk [vmem:[%s325_s23 + $0x10] sm:$0xff] %vm445_vm1, %v1957_v40  ;;  %v1958_v46 = vadd.f32 %v1954_v39, %v1950_v41 }
 0x718   : > { %1959 = vst.msk [vmem:[%s325_s23] sm:$0xff] %vm445_vm1, %v1955_v44  ;;  %v1956_v47 = vadd.f32 %v1952_v43, %v1948_v45 }
 0x719   : > { %1962 = vst.msk [vmem:[%s325_s23 + $0x18] sm:$0xff] %vm445_vm1, %v1958_v46 }
 0x71a   : > { %1960 = vst.msk [vmem:[%s325_s23 + $0x8] sm:$0xff] %vm445_vm1, %v1956_v47 }
 0x71b PF: > { %s18_s27 = sadd.s32 1, %s2648_s27  }
 0x71c   : > { %p15_p4 = scmp.ge.s32.totalorder %s18_s27, 4  }
 0x71e   :  { %17 = sbr.rel (!%p15_p4) target bundleno = 1 (0x1), region = 93 }

</bundles_post_ra>
